<compile_context>
chip_gen: v7x
topology: tpu7x:2x2x1
jax: 0.10.0
libtpu: 0.0.40
codegen_flags: <defaults>
</compile_context>

<pallas_src>
import jax
import jax.numpy as jnp
from jax import lax
from jax.experimental import pallas as pl
from jax.experimental.pallas import tpu as pltpu


# --------------------------------------------------------------------------
# Fused patchify + projection kernel
# --------------------------------------------------------------------------
def _downsample_kernel(x_ref, w_ref, sel_ref, b_ref, o_ref):
    # x_ref:   (1, Cin, tf, Hb, sf*W)   one (n, to, h-block) tile (NCTHW layout)
    # w_ref:   (tf, sf, sf, Cout, Cin)  conv weight, rearranged in the wrapper
    # sel_ref: (W, sf*Wo)               constant 0/1 column de-interleave matrix
    # b_ref:   (Cout, 1)
    # o_ref:   (1, Cout, 1, Hb, Wo)     NCTHW output tile (no transposes needed)
    _, _, tf, Hb, sfW = x_ref.shape
    _, sf, _, Cout, _ = w_ref.shape
    Wo = o_ref.shape[-1]
    W = sfW // sf

    sel = sel_ref[...]                       # hoisted out of all loops
    b = b_ref[...]                           # (Cout, 1)

    # Static loops: tf, sf are tiny (typically 2) and Hb <= 8-16; each hb's
    # accumulator dies at its store, so vreg pressure stays bounded.
    # TODO(synk): switch the hb loop to lax.fori_loop if Hb is ever made large.
    for hb in range(Hb):
        acc = jnp.zeros((Cout, Wo), jnp.float32)
        for kt in range(tf):
            xrow = x_ref[0, :, kt, hb, :]                       # (Cin, sf*W)
            for kh in range(sf):
                xkh = xrow[:, kh * W:(kh + 1) * W]              # (Cin, W)
                # De-interleave every kw column in one MXU op: result column
                # kw*Wo + wo holds x[cin, wo*sf + kw] (exact 0/1 selection).
                ysel = jnp.dot(xkh, sel)                        # (Cin, sf*Wo)
                for kw in range(sf):
                    acc += jnp.dot(
                        w_ref[kt, kh, kw],                      # (Cout, Cin)
                        ysel[:, kw * Wo:(kw + 1) * Wo],         # (Cin, Wo)
                        preferred_element_type=jnp.float32)
        # Direct NCTHW store, already in (Cout, Wo) orientation.
        o_ref[0, :, 0, hb, :] = (acc + b).astype(o_ref.dtype)


# --------------------------------------------------------------------------
# Public forward
# --------------------------------------------------------------------------
def downsample_forward(inp, weight, bias, *, time_factor, space_factor):
    """Strided conv3d with kernel == stride == (tf, sf, sf); NCTHW -> NCTHW."""
    N, Cin, T, H, W = inp.shape
    tf, sf = time_factor, space_factor
    assert T % tf == 0 and H % sf == 0 and W % sf == 0
    To, Ho, Wo = T // tf, H // sf, W // sf
    Cout = weight.shape[0]
    itemsize = inp.dtype.itemsize

    # Free (layout-preserving) reshape only: (H, W) -> (Ho, sf*W).
    x5 = inp.reshape(N, Cin, T, Ho, sf * W)

    # Pick an H-row block: multiple of 8 (sublane-dense) when possible, sized
    # so double-buffered in/out blocks stay well inside the VMEM budget.
    budget = 12 * 1024 * 1024

    def _blk_bytes(hb):
        return 2 * (Cin * tf * hb * sf * W + Cout * hb * Wo) * itemsize

    if Ho % 8 == 0:
        Hb = 8
        while Hb * 2 <= Ho and Ho % (Hb * 2) == 0 and _blk_bytes(Hb * 2) <= budget:
            Hb *= 2
    else:
        # TODO(synk): Ho not a multiple of 8 -> take the full dim (legal but
        #             sublane-padded); production video shapes have Ho % 8 == 0.
        Hb = Ho
    nHb = Ho // Hb

    # Tiny host-side rearrangements (negligible bytes).
    w_r = jnp.transpose(weight, (2, 3, 4, 0, 1))      # (tf, sf, sf, Cout, Cin)
    b2 = bias.reshape(Cout, 1)

    # Constant de-interleave matrix: sel[w, kw*Wo + wo] = [w == wo*sf + kw].
    col = jnp.arange(sf * Wo)[None, :]
    sel = (jnp.arange(W)[:, None] == (col % Wo) * sf + col // Wo).astype(inp.dtype)

    return pl.pallas_call(
        _downsample_kernel,
        out_shape=jax.ShapeDtypeStruct((N, Cout, To, Ho, Wo), inp.dtype),
        grid_spec=pltpu.PrefetchScalarGridSpec(
            num_scalar_prefetch=0,
            grid=(N, To, nHb),
            in_specs=[
                pl.BlockSpec((1, Cin, tf, Hb, sf * W),
                             lambda n, t, h: (n, 0, t, h, 0)),
                pl.BlockSpec((tf, sf, sf, Cout, Cin),
                             lambda n, t, h: (0, 0, 0, 0, 0)),
                pl.BlockSpec((W, sf * Wo), lambda n, t, h: (0, 0)),
                pl.BlockSpec((Cout, 1), lambda n, t, h: (0, 0)),
            ],
            out_specs=pl.BlockSpec((1, Cout, 1, Hb, Wo),
                                   lambda n, t, h: (n, 0, t, h, 0)),
        ),
        compiler_params=pltpu.CompilerParams(
            dimension_semantics=("parallel", "parallel", "parallel"),
            vmem_limit_bytes=32 * 1024 * 1024),
    )(x5, w_r, sel, b2)


downsample = jax.jit(downsample_forward,
                     static_argnames=("time_factor", "space_factor"))


if __name__ == "__main__":
    key = jax.random.PRNGKey(0)
    k_inp, k_w, k_b = jax.random.split(key, 3)

    # Small shapes consistent with the module: video (N, C, T, H, W).
    N, Cin, T, H, W = 2, 4, 8, 16, 16
    time_factor, space_factor = 2, 2
    Cout = 8

    inp = jax.random.normal(k_inp, (N, Cin, T, H, W), dtype=jnp.float32)
    weight = jax.random.normal(
        k_w, (Cout, Cin, time_factor, space_factor, space_factor),
        dtype=jnp.float32) * 0.1
    bias = jax.random.normal(k_b, (Cout,), dtype=jnp.float32) * 0.1

    out = downsample(inp, weight, bias,
                     time_factor=time_factor, space_factor=space_factor)
    out = jax.block_until_ready(out)

    # Reference check (plain JAX conv with stride == kernel).
    ref = lax.conv_general_dilated(
        inp, weight,
        window_strides=(time_factor, space_factor, space_factor),
        padding="VALID",
        dimension_numbers=("NCDHW", "OIDHW", "NCDHW"),
    ) + bias.reshape(1, Cout, 1, 1, 1)

    assert out.shape == (N, Cout, T // time_factor,
                         H // space_factor, W // space_factor)
    assert jnp.allclose(out, ref, atol=1e-4, rtol=1e-4)
    print("KERNEL_OK")
</pallas_src>

<mosaic_0001>
module attributes {stable_mosaic.version = 11 : i64} {
  func.func @_downsample_kernel(%arg0: i32, %arg1: i32, %arg2: i32, %arg3: memref<1x4x2x8x32xf32, #tpu.memory_space<vmem>>, %arg4: memref<2x2x2x8x4xf32, #tpu.memory_space<vmem>>, %arg5: memref<16x16xf32, #tpu.memory_space<vmem>>, %arg6: memref<8x1xf32, #tpu.memory_space<vmem>>, %arg7: memref<1x8x1x8x8xf32, #tpu.memory_space<vmem>>) attributes {dimension_semantics = [#tpu.dimension_semantics<parallel>, #tpu.dimension_semantics<parallel>, #tpu.dimension_semantics<parallel>], iteration_bounds = array<i64: 2, 4, 1>, scalar_prefetch = 0 : i64, scratch_operands = 0 : i64, tpu.core_type = #tpu.core_type<tc>, window_params = [{transform_indices = @transform_0, window_bounds = array<i64: 1, 4, 2, 8, 32>}, {pipeline_mode = #tpu.pipeline_mode<synchronous>, transform_indices = @transform_1, window_bounds = array<i64: 2, 2, 2, 8, 4>}, {pipeline_mode = #tpu.pipeline_mode<synchronous>, transform_indices = @transform_2, window_bounds = array<i64: 16, 16>}, {pipeline_mode = #tpu.pipeline_mode<synchronous>, transform_indices = @transform_3, window_bounds = array<i64: 8, 1>}, {transform_indices = @transform_4, window_bounds = array<i64: 1, 8, 1, 8, 8>}]} {
    %c0 = arith.constant 0 : index
    %c0_0 = arith.constant 0 : index
    %0 = vector.load %arg5[%c0, %c0_0] : memref<16x16xf32, #tpu.memory_space<vmem>>, vector<16x16xf32>
    %c0_1 = arith.constant 0 : index
    %c0_2 = arith.constant 0 : index
    %1 = vector.load %arg6[%c0_1, %c0_2] : memref<8x1xf32, #tpu.memory_space<vmem>>, vector<8x1xf32>
    %cst = arith.constant 0.000000e+00 : f32
    %2 = vector.broadcast %cst : f32 to vector<8x8xf32>
    %c0_3 = arith.constant 0 : index
    %c0_4 = arith.constant 0 : index
    %c0_5 = arith.constant 0 : index
    %c0_6 = arith.constant 0 : index
    %c0_7 = arith.constant 0 : index
    %3 = vector.load %arg3[%c0_3, %c0_4, %c0_5, %c0_6, %c0_7] : memref<1x4x2x8x32xf32, #tpu.memory_space<vmem>>, vector<1x4x1x1x32xf32>
    %4 = vector.shape_cast %3 : vector<1x4x1x1x32xf32> to vector<4x32xf32>
    %5 = vector.extract_strided_slice %4 {offsets = [0, 0], sizes = [4, 16], strides = [1, 1]} : vector<4x32xf32> to vector<4x16xf32>
    %cst_8 = arith.constant dense<0.000000e+00> : vector<4x16xf32>
    %6 = tpu.matmul %5, %0, %cst_8 {dimension_numbers = #tpu.dot_dimension_numbers<[1], [0], [0], [1], [0, 0, 1, 1], [], []>} : vector<4x16xf32>, vector<16x16xf32>, vector<4x16xf32> -> vector<4x16xf32>
    %c0_9 = arith.constant 0 : index
    %c0_10 = arith.constant 0 : index
    %c0_11 = arith.constant 0 : index
    %c0_12 = arith.constant 0 : index
    %c0_13 = arith.constant 0 : index
    %7 = vector.load %arg4[%c0_9, %c0_10, %c0_11, %c0_12, %c0_13] : memref<2x2x2x8x4xf32, #tpu.memory_space<vmem>>, vector<1x1x1x8x4xf32>
    %8 = vector.shape_cast %7 : vector<1x1x1x8x4xf32> to vector<8x4xf32>
    %9 = vector.extract_strided_slice %6 {offsets = [0, 0], sizes = [4, 8], strides = [1, 1]} : vector<4x16xf32> to vector<4x8xf32>
    %cst_14 = arith.constant dense<0.000000e+00> : vector<8x8xf32>
    %10 = tpu.matmul %8, %9, %cst_14 {dimension_numbers = #tpu.dot_dimension_numbers<[1], [0], [0], [1], [0, 0, 1, 1], [], []>} : vector<8x4xf32>, vector<4x8xf32>, vector<8x8xf32> -> vector<8x8xf32>
    %11 = arith.addf %2, %10 : vector<8x8xf32>
    %c0_15 = arith.constant 0 : index
    %c0_16 = arith.constant 0 : index
    %c1 = arith.constant 1 : index
    %c0_17 = arith.constant 0 : index
    %c0_18 = arith.constant 0 : index
    %12 = vector.load %arg4[%c0_15, %c0_16, %c1, %c0_17, %c0_18] : memref<2x2x2x8x4xf32, #tpu.memory_space<vmem>>, vector<1x1x1x8x4xf32>
    %13 = vector.shape_cast %12 : vector<1x1x1x8x4xf32> to vector<8x4xf32>
    %14 = vector.extract_strided_slice %6 {offsets = [0, 8], sizes = [4, 8], strides = [1, 1]} : vector<4x16xf32> to vector<4x8xf32>
    %cst_19 = arith.constant dense<0.000000e+00> : vector<8x8xf32>
    %15 = tpu.matmul %13, %14, %cst_19 {dimension_numbers = #tpu.dot_dimension_numbers<[1], [0], [0], [1], [0, 0, 1, 1], [], []>} : vector<8x4xf32>, vector<4x8xf32>, vector<8x8xf32> -> vector<8x8xf32>
    %16 = arith.addf %11, %15 : vector<8x8xf32>
    %17 = vector.extract_strided_slice %4 {offsets = [0, 16], sizes = [4, 16], strides = [1, 1]} : vector<4x32xf32> to vector<4x16xf32>
    %cst_20 = arith.constant dense<0.000000e+00> : vector<4x16xf32>
    %18 = tpu.matmul %17, %0, %cst_20 {dimension_numbers = #tpu.dot_dimension_numbers<[1], [0], [0], [1], [0, 0, 1, 1], [], []>} : vector<4x16xf32>, vector<16x16xf32>, vector<4x16xf32> -> vector<4x16xf32>
    %c0_21 = arith.constant 0 : index
    %c1_22 = arith.constant 1 : index
    %c0_23 = arith.constant 0 : index
    %c0_24 = arith.constant 0 : index
    %c0_25 = arith.constant 0 : index
    %19 = vector.load %arg4[%c0_21, %c1_22, %c0_23, %c0_24, %c0_25] : memref<2x2x2x8x4xf32, #tpu.memory_space<vmem>>, vector<1x1x1x8x4xf32>
    %20 = vector.shape_cast %19 : vector<1x1x1x8x4xf32> to vector<8x4xf32>
    %21 = vector.extract_strided_slice %18 {offsets = [0, 0], sizes = [4, 8], strides = [1, 1]} : vector<4x16xf32> to vector<4x8xf32>
    %cst_26 = arith.constant dense<0.000000e+00> : vector<8x8xf32>
    %22 = tpu.matmul %20, %21, %cst_26 {dimension_numbers = #tpu.dot_dimension_numbers<[1], [0], [0], [1], [0, 0, 1, 1], [], []>} : vector<8x4xf32>, vector<4x8xf32>, vector<8x8xf32> -> vector<8x8xf32>
    %23 = arith.addf %16, %22 : vector<8x8xf32>
    %c0_27 = arith.constant 0 : index
    %c1_28 = arith.constant 1 : index
    %c1_29 = arith.constant 1 : index
    %c0_30 = arith.constant 0 : index
    %c0_31 = arith.constant 0 : index
    %24 = vector.load %arg4[%c0_27, %c1_28, %c1_29, %c0_30, %c0_31] : memref<2x2x2x8x4xf32, #tpu.memory_space<vmem>>, vector<1x1x1x8x4xf32>
    %25 = vector.shape_cast %24 : vector<1x1x1x8x4xf32> to vector<8x4xf32>
    %26 = vector.extract_strided_slice %18 {offsets = [0, 8], sizes = [4, 8], strides = [1, 1]} : vector<4x16xf32> to vector<4x8xf32>
    %cst_32 = arith.constant dense<0.000000e+00> : vector<8x8xf32>
    %27 = tpu.matmul %25, %26, %cst_32 {dimension_numbers = #tpu.dot_dimension_numbers<[1], [0], [0], [1], [0, 0, 1, 1], [], []>} : vector<8x4xf32>, vector<4x8xf32>, vector<8x8xf32> -> vector<8x8xf32>
    %28 = arith.addf %23, %27 : vector<8x8xf32>
    %c0_33 = arith.constant 0 : index
    %c0_34 = arith.constant 0 : index
    %c1_35 = arith.constant 1 : index
    %c0_36 = arith.constant 0 : index
    %c0_37 = arith.constant 0 : index
    %29 = vector.load %arg3[%c0_33, %c0_34, %c1_35, %c0_36, %c0_37] : memref<1x4x2x8x32xf32, #tpu.memory_space<vmem>>, vector<1x4x1x1x32xf32>
    %30 = vector.shape_cast %29 : vector<1x4x1x1x32xf32> to vector<4x32xf32>
    %31 = vector.extract_strided_slice %30 {offsets = [0, 0], sizes = [4, 16], strides = [1, 1]} : vector<4x32xf32> to vector<4x16xf32>
    %cst_38 = arith.constant dense<0.000000e+00> : vector<4x16xf32>
    %32 = tpu.matmul %31, %0, %cst_38 {dimension_numbers = #tpu.dot_dimension_numbers<[1], [0], [0], [1], [0, 0, 1, 1], [], []>} : vector<4x16xf32>, vector<16x16xf32>, vector<4x16xf32> -> vector<4x16xf32>
    %c1_39 = arith.constant 1 : index
    %c0_40 = arith.constant 0 : index
    %c0_41 = arith.constant 0 : index
    %c0_42 = arith.constant 0 : index
    %c0_43 = arith.constant 0 : index
    %33 = vector.load %arg4[%c1_39, %c0_40, %c0_41, %c0_42, %c0_43] : memref<2x2x2x8x4xf32, #tpu.memory_space<vmem>>, vector<1x1x1x8x4xf32>
    %34 = vector.shape_cast %33 : vector<1x1x1x8x4xf32> to vector<8x4xf32>
    %35 = vector.extract_strided_slice %32 {offsets = [0, 0], sizes = [4, 8], strides = [1, 1]} : vector<4x16xf32> to vector<4x8xf32>
    %cst_44 = arith.constant dense<0.000000e+00> : vector<8x8xf32>
    %36 = tpu.matmul %34, %35, %cst_44 {dimension_numbers = #tpu.dot_dimension_numbers<[1], [0], [0], [1], [0, 0, 1, 1], [], []>} : vector<8x4xf32>, vector<4x8xf32>, vector<8x8xf32> -> vector<8x8xf32>
    %37 = arith.addf %28, %36 : vector<8x8xf32>
    %c1_45 = arith.constant 1 : index
    %c0_46 = arith.constant 0 : index
    %c1_47 = arith.constant 1 : index
    %c0_48 = arith.constant 0 : index
    %c0_49 = arith.constant 0 : index
    %38 = vector.load %arg4[%c1_45, %c0_46, %c1_47, %c0_48, %c0_49] : memref<2x2x2x8x4xf32, #tpu.memory_space<vmem>>, vector<1x1x1x8x4xf32>
    %39 = vector.shape_cast %38 : vector<1x1x1x8x4xf32> to vector<8x4xf32>
    %40 = vector.extract_strided_slice %32 {offsets = [0, 8], sizes = [4, 8], strides = [1, 1]} : vector<4x16xf32> to vector<4x8xf32>
    %cst_50 = arith.constant dense<0.000000e+00> : vector<8x8xf32>
    %41 = tpu.matmul %39, %40, %cst_50 {dimension_numbers = #tpu.dot_dimension_numbers<[1], [0], [0], [1], [0, 0, 1, 1], [], []>} : vector<8x4xf32>, vector<4x8xf32>, vector<8x8xf32> -> vector<8x8xf32>
    %42 = arith.addf %37, %41 : vector<8x8xf32>
    %43 = vector.extract_strided_slice %30 {offsets = [0, 16], sizes = [4, 16], strides = [1, 1]} : vector<4x32xf32> to vector<4x16xf32>
    %cst_51 = arith.constant dense<0.000000e+00> : vector<4x16xf32>
    %44 = tpu.matmul %43, %0, %cst_51 {dimension_numbers = #tpu.dot_dimension_numbers<[1], [0], [0], [1], [0, 0, 1, 1], [], []>} : vector<4x16xf32>, vector<16x16xf32>, vector<4x16xf32> -> vector<4x16xf32>
    %c1_52 = arith.constant 1 : index
    %c1_53 = arith.constant 1 : index
    %c0_54 = arith.constant 0 : index
    %c0_55 = arith.constant 0 : index
    %c0_56 = arith.constant 0 : index
    %45 = vector.load %arg4[%c1_52, %c1_53, %c0_54, %c0_55, %c0_56] : memref<2x2x2x8x4xf32, #tpu.memory_space<vmem>>, vector<1x1x1x8x4xf32>
    %46 = vector.shape_cast %45 : vector<1x1x1x8x4xf32> to vector<8x4xf32>
    %47 = vector.extract_strided_slice %44 {offsets = [0, 0], sizes = [4, 8], strides = [1, 1]} : vector<4x16xf32> to vector<4x8xf32>
    %cst_57 = arith.constant dense<0.000000e+00> : vector<8x8xf32>
    %48 = tpu.matmul %46, %47, %cst_57 {dimension_numbers = #tpu.dot_dimension_numbers<[1], [0], [0], [1], [0, 0, 1, 1], [], []>} : vector<8x4xf32>, vector<4x8xf32>, vector<8x8xf32> -> vector<8x8xf32>
    %49 = arith.addf %42, %48 : vector<8x8xf32>
    %c1_58 = arith.constant 1 : index
    %c1_59 = arith.constant 1 : index
    %c1_60 = arith.constant 1 : index
    %c0_61 = arith.constant 0 : index
    %c0_62 = arith.constant 0 : index
    %50 = vector.load %arg4[%c1_58, %c1_59, %c1_60, %c0_61, %c0_62] : memref<2x2x2x8x4xf32, #tpu.memory_space<vmem>>, vector<1x1x1x8x4xf32>
    %51 = vector.shape_cast %50 : vector<1x1x1x8x4xf32> to vector<8x4xf32>
    %52 = vector.extract_strided_slice %44 {offsets = [0, 8], sizes = [4, 8], strides = [1, 1]} : vector<4x16xf32> to vector<4x8xf32>
    %cst_63 = arith.constant dense<0.000000e+00> : vector<8x8xf32>
    %53 = tpu.matmul %51, %52, %cst_63 {dimension_numbers = #tpu.dot_dimension_numbers<[1], [0], [0], [1], [0, 0, 1, 1], [], []>} : vector<8x4xf32>, vector<4x8xf32>, vector<8x8xf32> -> vector<8x8xf32>
    %54 = arith.addf %49, %53 : vector<8x8xf32>
    %55 = vector.broadcast %1 : vector<8x1xf32> to vector<8x8xf32>
    %56 = arith.addf %54, %55 : vector<8x8xf32>
    %c0_64 = arith.constant 0 : index
    %c0_65 = arith.constant 0 : index
    %c0_66 = arith.constant 0 : index
    %c0_67 = arith.constant 0 : index
    %c0_68 = arith.constant 0 : index
    %57 = vector.load %arg7[%c0_64, %c0_65, %c0_66, %c0_67, %c0_68] : memref<1x8x1x8x8xf32, #tpu.memory_space<vmem>>, vector<1x8x1x1x8xf32>
    %58 = vector.shape_cast %57 : vector<1x8x1x1x8xf32> to vector<8x8xf32>
    %59 = vector.shape_cast %56 : vector<8x8xf32> to vector<1x8x1x1x8xf32>
    tpu.vector_store %arg7[%c0_64, %c0_65, %c0_66, %c0_67, %c0_68], %59 {strides = array<i32>} : memref<1x8x1x8x8xf32, #tpu.memory_space<vmem>>, vector<1x8x1x1x8xf32>,
    %cst_69 = arith.constant 0.000000e+00 : f32
    %60 = vector.broadcast %cst_69 : f32 to vector<8x8xf32>
    %c0_70 = arith.constant 0 : index
    %c0_71 = arith.constant 0 : index
    %c0_72 = arith.constant 0 : index
    %c1_73 = arith.constant 1 : index
    %c0_74 = arith.constant 0 : index
    %61 = vector.load %arg3[%c0_70, %c0_71, %c0_72, %c1_73, %c0_74] : memref<1x4x2x8x32xf32, #tpu.memory_space<vmem>>, vector<1x4x1x1x32xf32>
    %62 = vector.shape_cast %61 : vector<1x4x1x1x32xf32> to vector<4x32xf32>
    %63 = vector.extract_strided_slice %62 {offsets = [0, 0], sizes = [4, 16], strides = [1, 1]} : vector<4x32xf32> to vector<4x16xf32>
    %cst_75 = arith.constant dense<0.000000e+00> : vector<4x16xf32>
    %64 = tpu.matmul %63, %0, %cst_75 {dimension_numbers = #tpu.dot_dimension_numbers<[1], [0], [0], [1], [0, 0, 1, 1], [], []>} : vector<4x16xf32>, vector<16x16xf32>, vector<4x16xf32> -> vector<4x16xf32>
    %c0_76 = arith.constant 0 : index
    %c0_77 = arith.constant 0 : index
    %c0_78 = arith.constant 0 : index
    %c0_79 = arith.constant 0 : index
    %c0_80 = arith.constant 0 : index
    %65 = vector.load %arg4[%c0_76, %c0_77, %c0_78, %c0_79, %c0_80] : memref<2x2x2x8x4xf32, #tpu.memory_space<vmem>>, vector<1x1x1x8x4xf32>
    %66 = vector.shape_cast %65 : vector<1x1x1x8x4xf32> to vector<8x4xf32>
    %67 = vector.extract_strided_slice %64 {offsets = [0, 0], sizes = [4, 8], strides = [1, 1]} : vector<4x16xf32> to vector<4x8xf32>
    %cst_81 = arith.constant dense<0.000000e+00> : vector<8x8xf32>
    %68 = tpu.matmul %66, %67, %cst_81 {dimension_numbers = #tpu.dot_dimension_numbers<[1], [0], [0], [1], [0, 0, 1, 1], [], []>} : vector<8x4xf32>, vector<4x8xf32>, vector<8x8xf32> -> vector<8x8xf32>
    %69 = arith.addf %60, %68 : vector<8x8xf32>
    %c0_82 = arith.constant 0 : index
    %c0_83 = arith.constant 0 : index
    %c1_84 = arith.constant 1 : index
    %c0_85 = arith.constant 0 : index
    %c0_86 = arith.constant 0 : index
    %70 = vector.load %arg4[%c0_82, %c0_83, %c1_84, %c0_85, %c0_86] : memref<2x2x2x8x4xf32, #tpu.memory_space<vmem>>, vector<1x1x1x8x4xf32>
    %71 = vector.shape_cast %70 : vector<1x1x1x8x4xf32> to vector<8x4xf32>
    %72 = vector.extract_strided_slice %64 {offsets = [0, 8], sizes = [4, 8], strides = [1, 1]} : vector<4x16xf32> to vector<4x8xf32>
    %cst_87 = arith.constant dense<0.000000e+00> : vector<8x8xf32>
    %73 = tpu.matmul %71, %72, %cst_87 {dimension_numbers = #tpu.dot_dimension_numbers<[1], [0], [0], [1], [0, 0, 1, 1], [], []>} : vector<8x4xf32>, vector<4x8xf32>, vector<8x8xf32> -> vector<8x8xf32>
    %74 = arith.addf %69, %73 : vector<8x8xf32>
    %75 = vector.extract_strided_slice %62 {offsets = [0, 16], sizes = [4, 16], strides = [1, 1]} : vector<4x32xf32> to vector<4x16xf32>
    %cst_88 = arith.constant dense<0.000000e+00> : vector<4x16xf32>
    %76 = tpu.matmul %75, %0, %cst_88 {dimension_numbers = #tpu.dot_dimension_numbers<[1], [0], [0], [1], [0, 0, 1, 1], [], []>} : vector<4x16xf32>, vector<16x16xf32>, vector<4x16xf32> -> vector<4x16xf32>
    %c0_89 = arith.constant 0 : index
    %c1_90 = arith.constant 1 : index
    %c0_91 = arith.constant 0 : index
    %c0_92 = arith.constant 0 : index
    %c0_93 = arith.constant 0 : index
    %77 = vector.load %arg4[%c0_89, %c1_90, %c0_91, %c0_92, %c0_93] : memref<2x2x2x8x4xf32, #tpu.memory_space<vmem>>, vector<1x1x1x8x4xf32>
    %78 = vector.shape_cast %77 : vector<1x1x1x8x4xf32> to vector<8x4xf32>
    %79 = vector.extract_strided_slice %76 {offsets = [0, 0], sizes = [4, 8], strides = [1, 1]} : vector<4x16xf32> to vector<4x8xf32>
    %cst_94 = arith.constant dense<0.000000e+00> : vector<8x8xf32>
    %80 = tpu.matmul %78, %79, %cst_94 {dimension_numbers = #tpu.dot_dimension_numbers<[1], [0], [0], [1], [0, 0, 1, 1], [], []>} : vector<8x4xf32>, vector<4x8xf32>, vector<8x8xf32> -> vector<8x8xf32>
    %81 = arith.addf %74, %80 : vector<8x8xf32>
    %c0_95 = arith.constant 0 : index
    %c1_96 = arith.constant 1 : index
    %c1_97 = arith.constant 1 : index
    %c0_98 = arith.constant 0 : index
    %c0_99 = arith.constant 0 : index
    %82 = vector.load %arg4[%c0_95, %c1_96, %c1_97, %c0_98, %c0_99] : memref<2x2x2x8x4xf32, #tpu.memory_space<vmem>>, vector<1x1x1x8x4xf32>
    %83 = vector.shape_cast %82 : vector<1x1x1x8x4xf32> to vector<8x4xf32>
    %84 = vector.extract_strided_slice %76 {offsets = [0, 8], sizes = [4, 8], strides = [1, 1]} : vector<4x16xf32> to vector<4x8xf32>
    %cst_100 = arith.constant dense<0.000000e+00> : vector<8x8xf32>
    %85 = tpu.matmul %83, %84, %cst_100 {dimension_numbers = #tpu.dot_dimension_numbers<[1], [0], [0], [1], [0, 0, 1, 1], [], []>} : vector<8x4xf32>, vector<4x8xf32>, vector<8x8xf32> -> vector<8x8xf32>
    %86 = arith.addf %81, %85 : vector<8x8xf32>
    %c0_101 = arith.constant 0 : index
    %c0_102 = arith.constant 0 : index
    %c1_103 = arith.constant 1 : index
    %c1_104 = arith.constant 1 : index
    %c0_105 = arith.constant 0 : index
    %87 = vector.load %arg3[%c0_101, %c0_102, %c1_103, %c1_104, %c0_105] : memref<1x4x2x8x32xf32, #tpu.memory_space<vmem>>, vector<1x4x1x1x32xf32>
    %88 = vector.shape_cast %87 : vector<1x4x1x1x32xf32> to vector<4x32xf32>
    %89 = vector.extract_strided_slice %88 {offsets = [0, 0], sizes = [4, 16], strides = [1, 1]} : vector<4x32xf32> to vector<4x16xf32>
    %cst_106 = arith.constant dense<0.000000e+00> : vector<4x16xf32>
    %90 = tpu.matmul %89, %0, %cst_106 {dimension_numbers = #tpu.dot_dimension_numbers<[1], [0], [0], [1], [0, 0, 1, 1], [], []>} : vector<4x16xf32>, vector<16x16xf32>, vector<4x16xf32> -> vector<4x16xf32>
    %c1_107 = arith.constant 1 : index
    %c0_108 = arith.constant 0 : index
    %c0_109 = arith.constant 0 : index
    %c0_110 = arith.constant 0 : index
    %c0_111 = arith.constant 0 : index
    %91 = vector.load %arg4[%c1_107, %c0_108, %c0_109, %c0_110, %c0_111] : memref<2x2x2x8x4xf32, #tpu.memory_space<vmem>>, vector<1x1x1x8x4xf32>
    %92 = vector.shape_cast %91 : vector<1x1x1x8x4xf32> to vector<8x4xf32>
    %93 = vector.extract_strided_slice %90 {offsets = [0, 0], sizes = [4, 8], strides = [1, 1]} : vector<4x16xf32> to vector<4x8xf32>
    %cst_112 = arith.constant dense<0.000000e+00> : vector<8x8xf32>
    %94 = tpu.matmul %92, %93, %cst_112 {dimension_numbers = #tpu.dot_dimension_numbers<[1], [0], [0], [1], [0, 0, 1, 1], [], []>} : vector<8x4xf32>, vector<4x8xf32>, vector<8x8xf32> -> vector<8x8xf32>
    %95 = arith.addf %86, %94 : vector<8x8xf32>
    %c1_113 = arith.constant 1 : index
    %c0_114 = arith.constant 0 : index
    %c1_115 = arith.constant 1 : index
    %c0_116 = arith.constant 0 : index
    %c0_117 = arith.constant 0 : index
    %96 = vector.load %arg4[%c1_113, %c0_114, %c1_115, %c0_116, %c0_117] : memref<2x2x2x8x4xf32, #tpu.memory_space<vmem>>, vector<1x1x1x8x4xf32>
    %97 = vector.shape_cast %96 : vector<1x1x1x8x4xf32> to vector<8x4xf32>
    %98 = vector.extract_strided_slice %90 {offsets = [0, 8], sizes = [4, 8], strides = [1, 1]} : vector<4x16xf32> to vector<4x8xf32>
    %cst_118 = arith.constant dense<0.000000e+00> : vector<8x8xf32>
    %99 = tpu.matmul %97, %98, %cst_118 {dimension_numbers = #tpu.dot_dimension_numbers<[1], [0], [0], [1], [0, 0, 1, 1], [], []>} : vector<8x4xf32>, vector<4x8xf32>, vector<8x8xf32> -> vector<8x8xf32>
    %100 = arith.addf %95, %99 : vector<8x8xf32>
    %101 = vector.extract_strided_slice %88 {offsets = [0, 16], sizes = [4, 16], strides = [1, 1]} : vector<4x32xf32> to vector<4x16xf32>
    %cst_119 = arith.constant dense<0.000000e+00> : vector<4x16xf32>
    %102 = tpu.matmul %101, %0, %cst_119 {dimension_numbers = #tpu.dot_dimension_numbers<[1], [0], [0], [1], [0, 0, 1, 1], [], []>} : vector<4x16xf32>, vector<16x16xf32>, vector<4x16xf32> -> vector<4x16xf32>
    %c1_120 = arith.constant 1 : index
    %c1_121 = arith.constant 1 : index
    %c0_122 = arith.constant 0 : index
    %c0_123 = arith.constant 0 : index
    %c0_124 = arith.constant 0 : index
    %103 = vector.load %arg4[%c1_120, %c1_121, %c0_122, %c0_123, %c0_124] : memref<2x2x2x8x4xf32, #tpu.memory_space<vmem>>, vector<1x1x1x8x4xf32>
    %104 = vector.shape_cast %103 : vector<1x1x1x8x4xf32> to vector<8x4xf32>
    %105 = vector.extract_strided_slice %102 {offsets = [0, 0], sizes = [4, 8], strides = [1, 1]} : vector<4x16xf32> to vector<4x8xf32>
    %cst_125 = arith.constant dense<0.000000e+00> : vector<8x8xf32>
    %106 = tpu.matmul %104, %105, %cst_125 {dimension_numbers = #tpu.dot_dimension_numbers<[1], [0], [0], [1], [0, 0, 1, 1], [], []>} : vector<8x4xf32>, vector<4x8xf32>, vector<8x8xf32> -> vector<8x8xf32>
    %107 = arith.addf %100, %106 : vector<8x8xf32>
    %c1_126 = arith.constant 1 : index
    %c1_127 = arith.constant 1 : index
    %c1_128 = arith.constant 1 : index
    %c0_129 = arith.constant 0 : index
    %c0_130 = arith.constant 0 : index
    %108 = vector.load %arg4[%c1_126, %c1_127, %c1_128, %c0_129, %c0_130] : memref<2x2x2x8x4xf32, #tpu.memory_space<vmem>>, vector<1x1x1x8x4xf32>
    %109 = vector.shape_cast %108 : vector<1x1x1x8x4xf32> to vector<8x4xf32>
    %110 = vector.extract_strided_slice %102 {offsets = [0, 8], sizes = [4, 8], strides = [1, 1]} : vector<4x16xf32> to vector<4x8xf32>
    %cst_131 = arith.constant dense<0.000000e+00> : vector<8x8xf32>
    %111 = tpu.matmul %109, %110, %cst_131 {dimension_numbers = #tpu.dot_dimension_numbers<[1], [0], [0], [1], [0, 0, 1, 1], [], []>} : vector<8x4xf32>, vector<4x8xf32>, vector<8x8xf32> -> vector<8x8xf32>
    %112 = arith.addf %107, %111 : vector<8x8xf32>
    %113 = vector.broadcast %1 : vector<8x1xf32> to vector<8x8xf32>
    %114 = arith.addf %112, %113 : vector<8x8xf32>
    %c0_132 = arith.constant 0 : index
    %c0_133 = arith.constant 0 : index
    %c0_134 = arith.constant 0 : index
    %c1_135 = arith.constant 1 : index
    %c0_136 = arith.constant 0 : index
    %115 = vector.load %arg7[%c0_132, %c0_133, %c0_134, %c1_135, %c0_136] : memref<1x8x1x8x8xf32, #tpu.memory_space<vmem>>, vector<1x8x1x1x8xf32>
    %116 = vector.shape_cast %115 : vector<1x8x1x1x8xf32> to vector<8x8xf32>
    %117 = vector.shape_cast %114 : vector<8x8xf32> to vector<1x8x1x1x8xf32>
    tpu.vector_store %arg7[%c0_132, %c0_133, %c0_134, %c1_135, %c0_136], %117 {strides = array<i32>} : memref<1x8x1x8x8xf32, #tpu.memory_space<vmem>>, vector<1x8x1x1x8xf32>,
    %cst_137 = arith.constant 0.000000e+00 : f32
    %118 = vector.broadcast %cst_137 : f32 to vector<8x8xf32>
    %c0_138 = arith.constant 0 : index
    %c0_139 = arith.constant 0 : index
    %c0_140 = arith.constant 0 : index
    %c2 = arith.constant 2 : index
    %c0_141 = arith.constant 0 : index
    %119 = vector.load %arg3[%c0_138, %c0_139, %c0_140, %c2, %c0_141] : memref<1x4x2x8x32xf32, #tpu.memory_space<vmem>>, vector<1x4x1x1x32xf32>
    %120 = vector.shape_cast %119 : vector<1x4x1x1x32xf32> to vector<4x32xf32>
    %121 = vector.extract_strided_slice %120 {offsets = [0, 0], sizes = [4, 16], strides = [1, 1]} : vector<4x32xf32> to vector<4x16xf32>
    %cst_142 = arith.constant dense<0.000000e+00> : vector<4x16xf32>
    %122 = tpu.matmul %121, %0, %cst_142 {dimension_numbers = #tpu.dot_dimension_numbers<[1], [0], [0], [1], [0, 0, 1, 1], [], []>} : vector<4x16xf32>, vector<16x16xf32>, vector<4x16xf32> -> vector<4x16xf32>
    %c0_143 = arith.constant 0 : index
    %c0_144 = arith.constant 0 : index
    %c0_145 = arith.constant 0 : index
    %c0_146 = arith.constant 0 : index
    %c0_147 = arith.constant 0 : index
    %123 = vector.load %arg4[%c0_143, %c0_144, %c0_145, %c0_146, %c0_147] : memref<2x2x2x8x4xf32, #tpu.memory_space<vmem>>, vector<1x1x1x8x4xf32>
    %124 = vector.shape_cast %123 : vector<1x1x1x8x4xf32> to vector<8x4xf32>
    %125 = vector.extract_strided_slice %122 {offsets = [0, 0], sizes = [4, 8], strides = [1, 1]} : vector<4x16xf32> to vector<4x8xf32>
    %cst_148 = arith.constant dense<0.000000e+00> : vector<8x8xf32>
    %126 = tpu.matmul %124, %125, %cst_148 {dimension_numbers = #tpu.dot_dimension_numbers<[1], [0], [0], [1], [0, 0, 1, 1], [], []>} : vector<8x4xf32>, vector<4x8xf32>, vector<8x8xf32> -> vector<8x8xf32>
    %127 = arith.addf %118, %126 : vector<8x8xf32>
    %c0_149 = arith.constant 0 : index
    %c0_150 = arith.constant 0 : index
    %c1_151 = arith.constant 1 : index
    %c0_152 = arith.constant 0 : index
    %c0_153 = arith.constant 0 : index
    %128 = vector.load %arg4[%c0_149, %c0_150, %c1_151, %c0_152, %c0_153] : memref<2x2x2x8x4xf32, #tpu.memory_space<vmem>>, vector<1x1x1x8x4xf32>
    %129 = vector.shape_cast %128 : vector<1x1x1x8x4xf32> to vector<8x4xf32>
    %130 = vector.extract_strided_slice %122 {offsets = [0, 8], sizes = [4, 8], strides = [1, 1]} : vector<4x16xf32> to vector<4x8xf32>
    %cst_154 = arith.constant dense<0.000000e+00> : vector<8x8xf32>
    %131 = tpu.matmul %129, %130, %cst_154 {dimension_numbers = #tpu.dot_dimension_numbers<[1], [0], [0], [1], [0, 0, 1, 1], [], []>} : vector<8x4xf32>, vector<4x8xf32>, vector<8x8xf32> -> vector<8x8xf32>
    %132 = arith.addf %127, %131 : vector<8x8xf32>
    %133 = vector.extract_strided_slice %120 {offsets = [0, 16], sizes = [4, 16], strides = [1, 1]} : vector<4x32xf32> to vector<4x16xf32>
    %cst_155 = arith.constant dense<0.000000e+00> : vector<4x16xf32>
    %134 = tpu.matmul %133, %0, %cst_155 {dimension_numbers = #tpu.dot_dimension_numbers<[1], [0], [0], [1], [0, 0, 1, 1], [], []>} : vector<4x16xf32>, vector<16x16xf32>, vector<4x16xf32> -> vector<4x16xf32>
    %c0_156 = arith.constant 0 : index
    %c1_157 = arith.constant 1 : index
    %c0_158 = arith.constant 0 : index
    %c0_159 = arith.constant 0 : index
    %c0_160 = arith.constant 0 : index
    %135 = vector.load %arg4[%c0_156, %c1_157, %c0_158, %c0_159, %c0_160] : memref<2x2x2x8x4xf32, #tpu.memory_space<vmem>>, vector<1x1x1x8x4xf32>
    %136 = vector.shape_cast %135 : vector<1x1x1x8x4xf32> to vector<8x4xf32>
    %137 = vector.extract_strided_slice %134 {offsets = [0, 0], sizes = [4, 8], strides = [1, 1]} : vector<4x16xf32> to vector<4x8xf32>
    %cst_161 = arith.constant dense<0.000000e+00> : vector<8x8xf32>
    %138 = tpu.matmul %136, %137, %cst_161 {dimension_numbers = #tpu.dot_dimension_numbers<[1], [0], [0], [1], [0, 0, 1, 1], [], []>} : vector<8x4xf32>, vector<4x8xf32>, vector<8x8xf32> -> vector<8x8xf32>
    %139 = arith.addf %132, %138 : vector<8x8xf32>
    %c0_162 = arith.constant 0 : index
    %c1_163 = arith.constant 1 : index
    %c1_164 = arith.constant 1 : index
    %c0_165 = arith.constant 0 : index
    %c0_166 = arith.constant 0 : index
    %140 = vector.load %arg4[%c0_162, %c1_163, %c1_164, %c0_165, %c0_166] : memref<2x2x2x8x4xf32, #tpu.memory_space<vmem>>, vector<1x1x1x8x4xf32>
    %141 = vector.shape_cast %140 : vector<1x1x1x8x4xf32> to vector<8x4xf32>
    %142 = vector.extract_strided_slice %134 {offsets = [0, 8], sizes = [4, 8], strides = [1, 1]} : vector<4x16xf32> to vector<4x8xf32>
    %cst_167 = arith.constant dense<0.000000e+00> : vector<8x8xf32>
    %143 = tpu.matmul %141, %142, %cst_167 {dimension_numbers = #tpu.dot_dimension_numbers<[1], [0], [0], [1], [0, 0, 1, 1], [], []>} : vector<8x4xf32>, vector<4x8xf32>, vector<8x8xf32> -> vector<8x8xf32>
    %144 = arith.addf %139, %143 : vector<8x8xf32>
    %c0_168 = arith.constant 0 : index
    %c0_169 = arith.constant 0 : index
    %c1_170 = arith.constant 1 : index
    %c2_171 = arith.constant 2 : index
    %c0_172 = arith.constant 0 : index
    %145 = vector.load %arg3[%c0_168, %c0_169, %c1_170, %c2_171, %c0_172] : memref<1x4x2x8x32xf32, #tpu.memory_space<vmem>>, vector<1x4x1x1x32xf32>
    %146 = vector.shape_cast %145 : vector<1x4x1x1x32xf32> to vector<4x32xf32>
    %147 = vector.extract_strided_slice %146 {offsets = [0, 0], sizes = [4, 16], strides = [1, 1]} : vector<4x32xf32> to vector<4x16xf32>
    %cst_173 = arith.constant dense<0.000000e+00> : vector<4x16xf32>
    %148 = tpu.matmul %147, %0, %cst_173 {dimension_numbers = #tpu.dot_dimension_numbers<[1], [0], [0], [1], [0, 0, 1, 1], [], []>} : vector<4x16xf32>, vector<16x16xf32>, vector<4x16xf32> -> vector<4x16xf32>
    %c1_174 = arith.constant 1 : index
    %c0_175 = arith.constant 0 : index
    %c0_176 = arith.constant 0 : index
    %c0_177 = arith.constant 0 : index
    %c0_178 = arith.constant 0 : index
    %149 = vector.load %arg4[%c1_174, %c0_175, %c0_176, %c0_177, %c0_178] : memref<2x2x2x8x4xf32, #tpu.memory_space<vmem>>, vector<1x1x1x8x4xf32>
    %150 = vector.shape_cast %149 : vector<1x1x1x8x4xf32> to vector<8x4xf32>
    %151 = vector.extract_strided_slice %148 {offsets = [0, 0], sizes = [4, 8], strides = [1, 1]} : vector<4x16xf32> to vector<4x8xf32>
    %cst_179 = arith.constant dense<0.000000e+00> : vector<8x8xf32>
    %152 = tpu.matmul %150, %151, %cst_179 {dimension_numbers = #tpu.dot_dimension_numbers<[1], [0], [0], [1], [0, 0, 1, 1], [], []>} : vector<8x4xf32>, vector<4x8xf32>, vector<8x8xf32> -> vector<8x8xf32>
    %153 = arith.addf %144, %152 : vector<8x8xf32>
    %c1_180 = arith.constant 1 : index
    %c0_181 = arith.constant 0 : index
    %c1_182 = arith.constant 1 : index
    %c0_183 = arith.constant 0 : index
    %c0_184 = arith.constant 0 : index
    %154 = vector.load %arg4[%c1_180, %c0_181, %c1_182, %c0_183, %c0_184] : memref<2x2x2x8x4xf32, #tpu.memory_space<vmem>>, vector<1x1x1x8x4xf32>
    %155 = vector.shape_cast %154 : vector<1x1x1x8x4xf32> to vector<8x4xf32>
    %156 = vector.extract_strided_slice %148 {offsets = [0, 8], sizes = [4, 8], strides = [1, 1]} : vector<4x16xf32> to vector<4x8xf32>
    %cst_185 = arith.constant dense<0.000000e+00> : vector<8x8xf32>
    %157 = tpu.matmul %155, %156, %cst_185 {dimension_numbers = #tpu.dot_dimension_numbers<[1], [0], [0], [1], [0, 0, 1, 1], [], []>} : vector<8x4xf32>, vector<4x8xf32>, vector<8x8xf32> -> vector<8x8xf32>
    %158 = arith.addf %153, %157 : vector<8x8xf32>
    %159 = vector.extract_strided_slice %146 {offsets = [0, 16], sizes = [4, 16], strides = [1, 1]} : vector<4x32xf32> to vector<4x16xf32>
    %cst_186 = arith.constant dense<0.000000e+00> : vector<4x16xf32>
    %160 = tpu.matmul %159, %0, %cst_186 {dimension_numbers = #tpu.dot_dimension_numbers<[1], [0], [0], [1], [0, 0, 1, 1], [], []>} : vector<4x16xf32>, vector<16x16xf32>, vector<4x16xf32> -> vector<4x16xf32>
    %c1_187 = arith.constant 1 : index
    %c1_188 = arith.constant 1 : index
    %c0_189 = arith.constant 0 : index
    %c0_190 = arith.constant 0 : index
    %c0_191 = arith.constant 0 : index
    %161 = vector.load %arg4[%c1_187, %c1_188, %c0_189, %c0_190, %c0_191] : memref<2x2x2x8x4xf32, #tpu.memory_space<vmem>>, vector<1x1x1x8x4xf32>
    %162 = vector.shape_cast %161 : vector<1x1x1x8x4xf32> to vector<8x4xf32>
    %163 = vector.extract_strided_slice %160 {offsets = [0, 0], sizes = [4, 8], strides = [1, 1]} : vector<4x16xf32> to vector<4x8xf32>
    %cst_192 = arith.constant dense<0.000000e+00> : vector<8x8xf32>
    %164 = tpu.matmul %162, %163, %cst_192 {dimension_numbers = #tpu.dot_dimension_numbers<[1], [0], [0], [1], [0, 0, 1, 1], [], []>} : vector<8x4xf32>, vector<4x8xf32>, vector<8x8xf32> -> vector<8x8xf32>
    %165 = arith.addf %158, %164 : vector<8x8xf32>
    %c1_193 = arith.constant 1 : index
    %c1_194 = arith.constant 1 : index
    %c1_195 = arith.constant 1 : index
    %c0_196 = arith.constant 0 : index
    %c0_197 = arith.constant 0 : index
    %166 = vector.load %arg4[%c1_193, %c1_194, %c1_195, %c0_196, %c0_197] : memref<2x2x2x8x4xf32, #tpu.memory_space<vmem>>, vector<1x1x1x8x4xf32>
    %167 = vector.shape_cast %166 : vector<1x1x1x8x4xf32> to vector<8x4xf32>
    %168 = vector.extract_strided_slice %160 {offsets = [0, 8], sizes = [4, 8], strides = [1, 1]} : vector<4x16xf32> to vector<4x8xf32>
    %cst_198 = arith.constant dense<0.000000e+00> : vector<8x8xf32>
    %169 = tpu.matmul %167, %168, %cst_198 {dimension_numbers = #tpu.dot_dimension_numbers<[1], [0], [0], [1], [0, 0, 1, 1], [], []>} : vector<8x4xf32>, vector<4x8xf32>, vector<8x8xf32> -> vector<8x8xf32>
    %170 = arith.addf %165, %169 : vector<8x8xf32>
    %171 = vector.broadcast %1 : vector<8x1xf32> to vector<8x8xf32>
    %172 = arith.addf %170, %171 : vector<8x8xf32>
    %c0_199 = arith.constant 0 : index
    %c0_200 = arith.constant 0 : index
    %c0_201 = arith.constant 0 : index
    %c2_202 = arith.constant 2 : index
    %c0_203 = arith.constant 0 : index
    %173 = vector.load %arg7[%c0_199, %c0_200, %c0_201, %c2_202, %c0_203] : memref<1x8x1x8x8xf32, #tpu.memory_space<vmem>>, vector<1x8x1x1x8xf32>
    %174 = vector.shape_cast %173 : vector<1x8x1x1x8xf32> to vector<8x8xf32>
    %175 = vector.shape_cast %172 : vector<8x8xf32> to vector<1x8x1x1x8xf32>
    tpu.vector_store %arg7[%c0_199, %c0_200, %c0_201, %c2_202, %c0_203], %175 {strides = array<i32>} : memref<1x8x1x8x8xf32, #tpu.memory_space<vmem>>, vector<1x8x1x1x8xf32>,
    %cst_204 = arith.constant 0.000000e+00 : f32
    %176 = vector.broadcast %cst_204 : f32 to vector<8x8xf32>
    %c0_205 = arith.constant 0 : index
    %c0_206 = arith.constant 0 : index
    %c0_207 = arith.constant 0 : index
    %c3 = arith.constant 3 : index
    %c0_208 = arith.constant 0 : index
    %177 = vector.load %arg3[%c0_205, %c0_206, %c0_207, %c3, %c0_208] : memref<1x4x2x8x32xf32, #tpu.memory_space<vmem>>, vector<1x4x1x1x32xf32>
    %178 = vector.shape_cast %177 : vector<1x4x1x1x32xf32> to vector<4x32xf32>
    %179 = vector.extract_strided_slice %178 {offsets = [0, 0], sizes = [4, 16], strides = [1, 1]} : vector<4x32xf32> to vector<4x16xf32>
    %cst_209 = arith.constant dense<0.000000e+00> : vector<4x16xf32>
    %180 = tpu.matmul %179, %0, %cst_209 {dimension_numbers = #tpu.dot_dimension_numbers<[1], [0], [0], [1], [0, 0, 1, 1], [], []>} : vector<4x16xf32>, vector<16x16xf32>, vector<4x16xf32> -> vector<4x16xf32>
    %c0_210 = arith.constant 0 : index
    %c0_211 = arith.constant 0 : index
    %c0_212 = arith.constant 0 : index
    %c0_213 = arith.constant 0 : index
    %c0_214 = arith.constant 0 : index
    %181 = vector.load %arg4[%c0_210, %c0_211, %c0_212, %c0_213, %c0_214] : memref<2x2x2x8x4xf32, #tpu.memory_space<vmem>>, vector<1x1x1x8x4xf32>
    %182 = vector.shape_cast %181 : vector<1x1x1x8x4xf32> to vector<8x4xf32>
    %183 = vector.extract_strided_slice %180 {offsets = [0, 0], sizes = [4, 8], strides = [1, 1]} : vector<4x16xf32> to vector<4x8xf32>
    %cst_215 = arith.constant dense<0.000000e+00> : vector<8x8xf32>
    %184 = tpu.matmul %182, %183, %cst_215 {dimension_numbers = #tpu.dot_dimension_numbers<[1], [0], [0], [1], [0, 0, 1, 1], [], []>} : vector<8x4xf32>, vector<4x8xf32>, vector<8x8xf32> -> vector<8x8xf32>
    %185 = arith.addf %176, %184 : vector<8x8xf32>
    %c0_216 = arith.constant 0 : index
    %c0_217 = arith.constant 0 : index
    %c1_218 = arith.constant 1 : index
    %c0_219 = arith.constant 0 : index
    %c0_220 = arith.constant 0 : index
    %186 = vector.load %arg4[%c0_216, %c0_217, %c1_218, %c0_219, %c0_220] : memref<2x2x2x8x4xf32, #tpu.memory_space<vmem>>, vector<1x1x1x8x4xf32>
    %187 = vector.shape_cast %186 : vector<1x1x1x8x4xf32> to vector<8x4xf32>
    %188 = vector.extract_strided_slice %180 {offsets = [0, 8], sizes = [4, 8], strides = [1, 1]} : vector<4x16xf32> to vector<4x8xf32>
    %cst_221 = arith.constant dense<0.000000e+00> : vector<8x8xf32>
    %189 = tpu.matmul %187, %188, %cst_221 {dimension_numbers = #tpu.dot_dimension_numbers<[1], [0], [0], [1], [0, 0, 1, 1], [], []>} : vector<8x4xf32>, vector<4x8xf32>, vector<8x8xf32> -> vector<8x8xf32>
    %190 = arith.addf %185, %189 : vector<8x8xf32>
    %191 = vector.extract_strided_slice %178 {offsets = [0, 16], sizes = [4, 16], strides = [1, 1]} : vector<4x32xf32> to vector<4x16xf32>
    %cst_222 = arith.constant dense<0.000000e+00> : vector<4x16xf32>
    %192 = tpu.matmul %191, %0, %cst_222 {dimension_numbers = #tpu.dot_dimension_numbers<[1], [0], [0], [1], [0, 0, 1, 1], [], []>} : vector<4x16xf32>, vector<16x16xf32>, vector<4x16xf32> -> vector<4x16xf32>
    %c0_223 = arith.constant 0 : index
    %c1_224 = arith.constant 1 : index
    %c0_225 = arith.constant 0 : index
    %c0_226 = arith.constant 0 : index
    %c0_227 = arith.constant 0 : index
    %193 = vector.load %arg4[%c0_223, %c1_224, %c0_225, %c0_226, %c0_227] : memref<2x2x2x8x4xf32, #tpu.memory_space<vmem>>, vector<1x1x1x8x4xf32>
    %194 = vector.shape_cast %193 : vector<1x1x1x8x4xf32> to vector<8x4xf32>
    %195 = vector.extract_strided_slice %192 {offsets = [0, 0], sizes = [4, 8], strides = [1, 1]} : vector<4x16xf32> to vector<4x8xf32>
    %cst_228 = arith.constant dense<0.000000e+00> : vector<8x8xf32>
    %196 = tpu.matmul %194, %195, %cst_228 {dimension_numbers = #tpu.dot_dimension_numbers<[1], [0], [0], [1], [0, 0, 1, 1], [], []>} : vector<8x4xf32>, vector<4x8xf32>, vector<8x8xf32> -> vector<8x8xf32>
    %197 = arith.addf %190, %196 : vector<8x8xf32>
    %c0_229 = arith.constant 0 : index
    %c1_230 = arith.constant 1 : index
    %c1_231 = arith.constant 1 : index
    %c0_232 = arith.constant 0 : index
    %c0_233 = arith.constant 0 : index
    %198 = vector.load %arg4[%c0_229, %c1_230, %c1_231, %c0_232, %c0_233] : memref<2x2x2x8x4xf32, #tpu.memory_space<vmem>>, vector<1x1x1x8x4xf32>
    %199 = vector.shape_cast %198 : vector<1x1x1x8x4xf32> to vector<8x4xf32>
    %200 = vector.extract_strided_slice %192 {offsets = [0, 8], sizes = [4, 8], strides = [1, 1]} : vector<4x16xf32> to vector<4x8xf32>
    %cst_234 = arith.constant dense<0.000000e+00> : vector<8x8xf32>
    %201 = tpu.matmul %199, %200, %cst_234 {dimension_numbers = #tpu.dot_dimension_numbers<[1], [0], [0], [1], [0, 0, 1, 1], [], []>} : vector<8x4xf32>, vector<4x8xf32>, vector<8x8xf32> -> vector<8x8xf32>
    %202 = arith.addf %197, %201 : vector<8x8xf32>
    %c0_235 = arith.constant 0 : index
    %c0_236 = arith.constant 0 : index
    %c1_237 = arith.constant 1 : index
    %c3_238 = arith.constant 3 : index
    %c0_239 = arith.constant 0 : index
    %203 = vector.load %arg3[%c0_235, %c0_236, %c1_237, %c3_238, %c0_239] : memref<1x4x2x8x32xf32, #tpu.memory_space<vmem>>, vector<1x4x1x1x32xf32>
    %204 = vector.shape_cast %203 : vector<1x4x1x1x32xf32> to vector<4x32xf32>
    %205 = vector.extract_strided_slice %204 {offsets = [0, 0], sizes = [4, 16], strides = [1, 1]} : vector<4x32xf32> to vector<4x16xf32>
    %cst_240 = arith.constant dense<0.000000e+00> : vector<4x16xf32>
    %206 = tpu.matmul %205, %0, %cst_240 {dimension_numbers = #tpu.dot_dimension_numbers<[1], [0], [0], [1], [0, 0, 1, 1], [], []>} : vector<4x16xf32>, vector<16x16xf32>, vector<4x16xf32> -> vector<4x16xf32>
    %c1_241 = arith.constant 1 : index
    %c0_242 = arith.constant 0 : index
    %c0_243 = arith.constant 0 : index
    %c0_244 = arith.constant 0 : index
    %c0_245 = arith.constant 0 : index
    %207 = vector.load %arg4[%c1_241, %c0_242, %c0_243, %c0_244, %c0_245] : memref<2x2x2x8x4xf32, #tpu.memory_space<vmem>>, vector<1x1x1x8x4xf32>
    %208 = vector.shape_cast %207 : vector<1x1x1x8x4xf32> to vector<8x4xf32>
    %209 = vector.extract_strided_slice %206 {offsets = [0, 0], sizes = [4, 8], strides = [1, 1]} : vector<4x16xf32> to vector<4x8xf32>
    %cst_246 = arith.constant dense<0.000000e+00> : vector<8x8xf32>
    %210 = tpu.matmul %208, %209, %cst_246 {dimension_numbers = #tpu.dot_dimension_numbers<[1], [0], [0], [1], [0, 0, 1, 1], [], []>} : vector<8x4xf32>, vector<4x8xf32>, vector<8x8xf32> -> vector<8x8xf32>
    %211 = arith.addf %202, %210 : vector<8x8xf32>
    %c1_247 = arith.constant 1 : index
    %c0_248 = arith.constant 0 : index
    %c1_249 = arith.constant 1 : index
    %c0_250 = arith.constant 0 : index
    %c0_251 = arith.constant 0 : index
    %212 = vector.load %arg4[%c1_247, %c0_248, %c1_249, %c0_250, %c0_251] : memref<2x2x2x8x4xf32, #tpu.memory_space<vmem>>, vector<1x1x1x8x4xf32>
    %213 = vector.shape_cast %212 : vector<1x1x1x8x4xf32> to vector<8x4xf32>
    %214 = vector.extract_strided_slice %206 {offsets = [0, 8], sizes = [4, 8], strides = [1, 1]} : vector<4x16xf32> to vector<4x8xf32>
    %cst_252 = arith.constant dense<0.000000e+00> : vector<8x8xf32>
    %215 = tpu.matmul %213, %214, %cst_252 {dimension_numbers = #tpu.dot_dimension_numbers<[1], [0], [0], [1], [0, 0, 1, 1], [], []>} : vector<8x4xf32>, vector<4x8xf32>, vector<8x8xf32> -> vector<8x8xf32>
    %216 = arith.addf %211, %215 : vector<8x8xf32>
    %217 = vector.extract_strided_slice %204 {offsets = [0, 16], sizes = [4, 16], strides = [1, 1]} : vector<4x32xf32> to vector<4x16xf32>
    %cst_253 = arith.constant dense<0.000000e+00> : vector<4x16xf32>
    %218 = tpu.matmul %217, %0, %cst_253 {dimension_numbers = #tpu.dot_dimension_numbers<[1], [0], [0], [1], [0, 0, 1, 1], [], []>} : vector<4x16xf32>, vector<16x16xf32>, vector<4x16xf32> -> vector<4x16xf32>
    %c1_254 = arith.constant 1 : index
    %c1_255 = arith.constant 1 : index
    %c0_256 = arith.constant 0 : index
    %c0_257 = arith.constant 0 : index
    %c0_258 = arith.constant 0 : index
    %219 = vector.load %arg4[%c1_254, %c1_255, %c0_256, %c0_257, %c0_258] : memref<2x2x2x8x4xf32, #tpu.memory_space<vmem>>, vector<1x1x1x8x4xf32>
    %220 = vector.shape_cast %219 : vector<1x1x1x8x4xf32> to vector<8x4xf32>
    %221 = vector.extract_strided_slice %218 {offsets = [0, 0], sizes = [4, 8], strides = [1, 1]} : vector<4x16xf32> to vector<4x8xf32>
    %cst_259 = arith.constant dense<0.000000e+00> : vector<8x8xf32>
    %222 = tpu.matmul %220, %221, %cst_259 {dimension_numbers = #tpu.dot_dimension_numbers<[1], [0], [0], [1], [0, 0, 1, 1], [], []>} : vector<8x4xf32>, vector<4x8xf32>, vector<8x8xf32> -> vector<8x8xf32>
    %223 = arith.addf %216, %222 : vector<8x8xf32>
    %c1_260 = arith.constant 1 : index
    %c1_261 = arith.constant 1 : index
    %c1_262 = arith.constant 1 : index
    %c0_263 = arith.constant 0 : index
    %c0_264 = arith.constant 0 : index
    %224 = vector.load %arg4[%c1_260, %c1_261, %c1_262, %c0_263, %c0_264] : memref<2x2x2x8x4xf32, #tpu.memory_space<vmem>>, vector<1x1x1x8x4xf32>
    %225 = vector.shape_cast %224 : vector<1x1x1x8x4xf32> to vector<8x4xf32>
    %226 = vector.extract_strided_slice %218 {offsets = [0, 8], sizes = [4, 8], strides = [1, 1]} : vector<4x16xf32> to vector<4x8xf32>
    %cst_265 = arith.constant dense<0.000000e+00> : vector<8x8xf32>
    %227 = tpu.matmul %225, %226, %cst_265 {dimension_numbers = #tpu.dot_dimension_numbers<[1], [0], [0], [1], [0, 0, 1, 1], [], []>} : vector<8x4xf32>, vector<4x8xf32>, vector<8x8xf32> -> vector<8x8xf32>
    %228 = arith.addf %223, %227 : vector<8x8xf32>
    %229 = vector.broadcast %1 : vector<8x1xf32> to vector<8x8xf32>
    %230 = arith.addf %228, %229 : vector<8x8xf32>
    %c0_266 = arith.constant 0 : index
    %c0_267 = arith.constant 0 : index
    %c0_268 = arith.constant 0 : index
    %c3_269 = arith.constant 3 : index
    %c0_270 = arith.constant 0 : index
    %231 = vector.load %arg7[%c0_266, %c0_267, %c0_268, %c3_269, %c0_270] : memref<1x8x1x8x8xf32, #tpu.memory_space<vmem>>, vector<1x8x1x1x8xf32>
    %232 = vector.shape_cast %231 : vector<1x8x1x1x8xf32> to vector<8x8xf32>
    %233 = vector.shape_cast %230 : vector<8x8xf32> to vector<1x8x1x1x8xf32>
    tpu.vector_store %arg7[%c0_266, %c0_267, %c0_268, %c3_269, %c0_270], %233 {strides = array<i32>} : memref<1x8x1x8x8xf32, #tpu.memory_space<vmem>>, vector<1x8x1x1x8xf32>,
    %cst_271 = arith.constant 0.000000e+00 : f32
    %234 = vector.broadcast %cst_271 : f32 to vector<8x8xf32>
    %c0_272 = arith.constant 0 : index
    %c0_273 = arith.constant 0 : index
    %c0_274 = arith.constant 0 : index
    %c4 = arith.constant 4 : index
    %c0_275 = arith.constant 0 : index
    %235 = vector.load %arg3[%c0_272, %c0_273, %c0_274, %c4, %c0_275] : memref<1x4x2x8x32xf32, #tpu.memory_space<vmem>>, vector<1x4x1x1x32xf32>
    %236 = vector.shape_cast %235 : vector<1x4x1x1x32xf32> to vector<4x32xf32>
    %237 = vector.extract_strided_slice %236 {offsets = [0, 0], sizes = [4, 16], strides = [1, 1]} : vector<4x32xf32> to vector<4x16xf32>
    %cst_276 = arith.constant dense<0.000000e+00> : vector<4x16xf32>
    %238 = tpu.matmul %237, %0, %cst_276 {dimension_numbers = #tpu.dot_dimension_numbers<[1], [0], [0], [1], [0, 0, 1, 1], [], []>} : vector<4x16xf32>, vector<16x16xf32>, vector<4x16xf32> -> vector<4x16xf32>
    %c0_277 = arith.constant 0 : index
    %c0_278 = arith.constant 0 : index
    %c0_279 = arith.constant 0 : index
    %c0_280 = arith.constant 0 : index
    %c0_281 = arith.constant 0 : index
    %239 = vector.load %arg4[%c0_277, %c0_278, %c0_279, %c0_280, %c0_281] : memref<2x2x2x8x4xf32, #tpu.memory_space<vmem>>, vector<1x1x1x8x4xf32>
    %240 = vector.shape_cast %239 : vector<1x1x1x8x4xf32> to vector<8x4xf32>
    %241 = vector.extract_strided_slice %238 {offsets = [0, 0], sizes = [4, 8], strides = [1, 1]} : vector<4x16xf32> to vector<4x8xf32>
    %cst_282 = arith.constant dense<0.000000e+00> : vector<8x8xf32>
    %242 = tpu.matmul %240, %241, %cst_282 {dimension_numbers = #tpu.dot_dimension_numbers<[1], [0], [0], [1], [0, 0, 1, 1], [], []>} : vector<8x4xf32>, vector<4x8xf32>, vector<8x8xf32> -> vector<8x8xf32>
    %243 = arith.addf %234, %242 : vector<8x8xf32>
    %c0_283 = arith.constant 0 : index
    %c0_284 = arith.constant 0 : index
    %c1_285 = arith.constant 1 : index
    %c0_286 = arith.constant 0 : index
    %c0_287 = arith.constant 0 : index
    %244 = vector.load %arg4[%c0_283, %c0_284, %c1_285, %c0_286, %c0_287] : memref<2x2x2x8x4xf32, #tpu.memory_space<vmem>>, vector<1x1x1x8x4xf32>
    %245 = vector.shape_cast %244 : vector<1x1x1x8x4xf32> to vector<8x4xf32>
    %246 = vector.extract_strided_slice %238 {offsets = [0, 8], sizes = [4, 8], strides = [1, 1]} : vector<4x16xf32> to vector<4x8xf32>
    %cst_288 = arith.constant dense<0.000000e+00> : vector<8x8xf32>
    %247 = tpu.matmul %245, %246, %cst_288 {dimension_numbers = #tpu.dot_dimension_numbers<[1], [0], [0], [1], [0, 0, 1, 1], [], []>} : vector<8x4xf32>, vector<4x8xf32>, vector<8x8xf32> -> vector<8x8xf32>
    %248 = arith.addf %243, %247 : vector<8x8xf32>
    %249 = vector.extract_strided_slice %236 {offsets = [0, 16], sizes = [4, 16], strides = [1, 1]} : vector<4x32xf32> to vector<4x16xf32>
    %cst_289 = arith.constant dense<0.000000e+00> : vector<4x16xf32>
    %250 = tpu.matmul %249, %0, %cst_289 {dimension_numbers = #tpu.dot_dimension_numbers<[1], [0], [0], [1], [0, 0, 1, 1], [], []>} : vector<4x16xf32>, vector<16x16xf32>, vector<4x16xf32> -> vector<4x16xf32>
    %c0_290 = arith.constant 0 : index
    %c1_291 = arith.constant 1 : index
    %c0_292 = arith.constant 0 : index
    %c0_293 = arith.constant 0 : index
    %c0_294 = arith.constant 0 : index
    %251 = vector.load %arg4[%c0_290, %c1_291, %c0_292, %c0_293, %c0_294] : memref<2x2x2x8x4xf32, #tpu.memory_space<vmem>>, vector<1x1x1x8x4xf32>
    %252 = vector.shape_cast %251 : vector<1x1x1x8x4xf32> to vector<8x4xf32>
    %253 = vector.extract_strided_slice %250 {offsets = [0, 0], sizes = [4, 8], strides = [1, 1]} : vector<4x16xf32> to vector<4x8xf32>
    %cst_295 = arith.constant dense<0.000000e+00> : vector<8x8xf32>
    %254 = tpu.matmul %252, %253, %cst_295 {dimension_numbers = #tpu.dot_dimension_numbers<[1], [0], [0], [1], [0, 0, 1, 1], [], []>} : vector<8x4xf32>, vector<4x8xf32>, vector<8x8xf32> -> vector<8x8xf32>
    %255 = arith.addf %248, %254 : vector<8x8xf32>
    %c0_296 = arith.constant 0 : index
    %c1_297 = arith.constant 1 : index
    %c1_298 = arith.constant 1 : index
    %c0_299 = arith.constant 0 : index
    %c0_300 = arith.constant 0 : index
    %256 = vector.load %arg4[%c0_296, %c1_297, %c1_298, %c0_299, %c0_300] : memref<2x2x2x8x4xf32, #tpu.memory_space<vmem>>, vector<1x1x1x8x4xf32>
    %257 = vector.shape_cast %256 : vector<1x1x1x8x4xf32> to vector<8x4xf32>
    %258 = vector.extract_strided_slice %250 {offsets = [0, 8], sizes = [4, 8], strides = [1, 1]} : vector<4x16xf32> to vector<4x8xf32>
    %cst_301 = arith.constant dense<0.000000e+00> : vector<8x8xf32>
    %259 = tpu.matmul %257, %258, %cst_301 {dimension_numbers = #tpu.dot_dimension_numbers<[1], [0], [0], [1], [0, 0, 1, 1], [], []>} : vector<8x4xf32>, vector<4x8xf32>, vector<8x8xf32> -> vector<8x8xf32>
    %260 = arith.addf %255, %259 : vector<8x8xf32>
    %c0_302 = arith.constant 0 : index
    %c0_303 = arith.constant 0 : index
    %c1_304 = arith.constant 1 : index
    %c4_305 = arith.constant 4 : index
    %c0_306 = arith.constant 0 : index
    %261 = vector.load %arg3[%c0_302, %c0_303, %c1_304, %c4_305, %c0_306] : memref<1x4x2x8x32xf32, #tpu.memory_space<vmem>>, vector<1x4x1x1x32xf32>
    %262 = vector.shape_cast %261 : vector<1x4x1x1x32xf32> to vector<4x32xf32>
    %263 = vector.extract_strided_slice %262 {offsets = [0, 0], sizes = [4, 16], strides = [1, 1]} : vector<4x32xf32> to vector<4x16xf32>
    %cst_307 = arith.constant dense<0.000000e+00> : vector<4x16xf32>
    %264 = tpu.matmul %263, %0, %cst_307 {dimension_numbers = #tpu.dot_dimension_numbers<[1], [0], [0], [1], [0, 0, 1, 1], [], []>} : vector<4x16xf32>, vector<16x16xf32>, vector<4x16xf32> -> vector<4x16xf32>
    %c1_308 = arith.constant 1 : index
    %c0_309 = arith.constant 0 : index
    %c0_310 = arith.constant 0 : index
    %c0_311 = arith.constant 0 : index
    %c0_312 = arith.constant 0 : index
    %265 = vector.load %arg4[%c1_308, %c0_309, %c0_310, %c0_311, %c0_312] : memref<2x2x2x8x4xf32, #tpu.memory_space<vmem>>, vector<1x1x1x8x4xf32>
    %266 = vector.shape_cast %265 : vector<1x1x1x8x4xf32> to vector<8x4xf32>
    %267 = vector.extract_strided_slice %264 {offsets = [0, 0], sizes = [4, 8], strides = [1, 1]} : vector<4x16xf32> to vector<4x8xf32>
    %cst_313 = arith.constant dense<0.000000e+00> : vector<8x8xf32>
    %268 = tpu.matmul %266, %267, %cst_313 {dimension_numbers = #tpu.dot_dimension_numbers<[1], [0], [0], [1], [0, 0, 1, 1], [], []>} : vector<8x4xf32>, vector<4x8xf32>, vector<8x8xf32> -> vector<8x8xf32>
    %269 = arith.addf %260, %268 : vector<8x8xf32>
    %c1_314 = arith.constant 1 : index
    %c0_315 = arith.constant 0 : index
    %c1_316 = arith.constant 1 : index
    %c0_317 = arith.constant 0 : index
    %c0_318 = arith.constant 0 : index
    %270 = vector.load %arg4[%c1_314, %c0_315, %c1_316, %c0_317, %c0_318] : memref<2x2x2x8x4xf32, #tpu.memory_space<vmem>>, vector<1x1x1x8x4xf32>
    %271 = vector.shape_cast %270 : vector<1x1x1x8x4xf32> to vector<8x4xf32>
    %272 = vector.extract_strided_slice %264 {offsets = [0, 8], sizes = [4, 8], strides = [1, 1]} : vector<4x16xf32> to vector<4x8xf32>
    %cst_319 = arith.constant dense<0.000000e+00> : vector<8x8xf32>
    %273 = tpu.matmul %271, %272, %cst_319 {dimension_numbers = #tpu.dot_dimension_numbers<[1], [0], [0], [1], [0, 0, 1, 1], [], []>} : vector<8x4xf32>, vector<4x8xf32>, vector<8x8xf32> -> vector<8x8xf32>
    %274 = arith.addf %269, %273 : vector<8x8xf32>
    %275 = vector.extract_strided_slice %262 {offsets = [0, 16], sizes = [4, 16], strides = [1, 1]} : vector<4x32xf32> to vector<4x16xf32>
    %cst_320 = arith.constant dense<0.000000e+00> : vector<4x16xf32>
    %276 = tpu.matmul %275, %0, %cst_320 {dimension_numbers = #tpu.dot_dimension_numbers<[1], [0], [0], [1], [0, 0, 1, 1], [], []>} : vector<4x16xf32>, vector<16x16xf32>, vector<4x16xf32> -> vector<4x16xf32>
    %c1_321 = arith.constant 1 : index
    %c1_322 = arith.constant 1 : index
    %c0_323 = arith.constant 0 : index
    %c0_324 = arith.constant 0 : index
    %c0_325 = arith.constant 0 : index
    %277 = vector.load %arg4[%c1_321, %c1_322, %c0_323, %c0_324, %c0_325] : memref<2x2x2x8x4xf32, #tpu.memory_space<vmem>>, vector<1x1x1x8x4xf32>
    %278 = vector.shape_cast %277 : vector<1x1x1x8x4xf32> to vector<8x4xf32>
    %279 = vector.extract_strided_slice %276 {offsets = [0, 0], sizes = [4, 8], strides = [1, 1]} : vector<4x16xf32> to vector<4x8xf32>
    %cst_326 = arith.constant dense<0.000000e+00> : vector<8x8xf32>
    %280 = tpu.matmul %278, %279, %cst_326 {dimension_numbers = #tpu.dot_dimension_numbers<[1], [0], [0], [1], [0, 0, 1, 1], [], []>} : vector<8x4xf32>, vector<4x8xf32>, vector<8x8xf32> -> vector<8x8xf32>
    %281 = arith.addf %274, %280 : vector<8x8xf32>
    %c1_327 = arith.constant 1 : index
    %c1_328 = arith.constant 1 : index
    %c1_329 = arith.constant 1 : index
    %c0_330 = arith.constant 0 : index
    %c0_331 = arith.constant 0 : index
    %282 = vector.load %arg4[%c1_327, %c1_328, %c1_329, %c0_330, %c0_331] : memref<2x2x2x8x4xf32, #tpu.memory_space<vmem>>, vector<1x1x1x8x4xf32>
    %283 = vector.shape_cast %282 : vector<1x1x1x8x4xf32> to vector<8x4xf32>
    %284 = vector.extract_strided_slice %276 {offsets = [0, 8], sizes = [4, 8], strides = [1, 1]} : vector<4x16xf32> to vector<4x8xf32>
    %cst_332 = arith.constant dense<0.000000e+00> : vector<8x8xf32>
    %285 = tpu.matmul %283, %284, %cst_332 {dimension_numbers = #tpu.dot_dimension_numbers<[1], [0], [0], [1], [0, 0, 1, 1], [], []>} : vector<8x4xf32>, vector<4x8xf32>, vector<8x8xf32> -> vector<8x8xf32>
    %286 = arith.addf %281, %285 : vector<8x8xf32>
    %287 = vector.broadcast %1 : vector<8x1xf32> to vector<8x8xf32>
    %288 = arith.addf %286, %287 : vector<8x8xf32>
    %c0_333 = arith.constant 0 : index
    %c0_334 = arith.constant 0 : index
    %c0_335 = arith.constant 0 : index
    %c4_336 = arith.constant 4 : index
    %c0_337 = arith.constant 0 : index
    %289 = vector.load %arg7[%c0_333, %c0_334, %c0_335, %c4_336, %c0_337] : memref<1x8x1x8x8xf32, #tpu.memory_space<vmem>>, vector<1x8x1x1x8xf32>
    %290 = vector.shape_cast %289 : vector<1x8x1x1x8xf32> to vector<8x8xf32>
    %291 = vector.shape_cast %288 : vector<8x8xf32> to vector<1x8x1x1x8xf32>
    tpu.vector_store %arg7[%c0_333, %c0_334, %c0_335, %c4_336, %c0_337], %291 {strides = array<i32>} : memref<1x8x1x8x8xf32, #tpu.memory_space<vmem>>, vector<1x8x1x1x8xf32>,
    %cst_338 = arith.constant 0.000000e+00 : f32
    %292 = vector.broadcast %cst_338 : f32 to vector<8x8xf32>
    %c0_339 = arith.constant 0 : index
    %c0_340 = arith.constant 0 : index
    %c0_341 = arith.constant 0 : index
    %c5 = arith.constant 5 : index
    %c0_342 = arith.constant 0 : index
    %293 = vector.load %arg3[%c0_339, %c0_340, %c0_341, %c5, %c0_342] : memref<1x4x2x8x32xf32, #tpu.memory_space<vmem>>, vector<1x4x1x1x32xf32>
    %294 = vector.shape_cast %293 : vector<1x4x1x1x32xf32> to vector<4x32xf32>
    %295 = vector.extract_strided_slice %294 {offsets = [0, 0], sizes = [4, 16], strides = [1, 1]} : vector<4x32xf32> to vector<4x16xf32>
    %cst_343 = arith.constant dense<0.000000e+00> : vector<4x16xf32>
    %296 = tpu.matmul %295, %0, %cst_343 {dimension_numbers = #tpu.dot_dimension_numbers<[1], [0], [0], [1], [0, 0, 1, 1], [], []>} : vector<4x16xf32>, vector<16x16xf32>, vector<4x16xf32> -> vector<4x16xf32>
    %c0_344 = arith.constant 0 : index
    %c0_345 = arith.constant 0 : index
    %c0_346 = arith.constant 0 : index
    %c0_347 = arith.constant 0 : index
    %c0_348 = arith.constant 0 : index
    %297 = vector.load %arg4[%c0_344, %c0_345, %c0_346, %c0_347, %c0_348] : memref<2x2x2x8x4xf32, #tpu.memory_space<vmem>>, vector<1x1x1x8x4xf32>
    %298 = vector.shape_cast %297 : vector<1x1x1x8x4xf32> to vector<8x4xf32>
    %299 = vector.extract_strided_slice %296 {offsets = [0, 0], sizes = [4, 8], strides = [1, 1]} : vector<4x16xf32> to vector<4x8xf32>
    %cst_349 = arith.constant dense<0.000000e+00> : vector<8x8xf32>
    %300 = tpu.matmul %298, %299, %cst_349 {dimension_numbers = #tpu.dot_dimension_numbers<[1], [0], [0], [1], [0, 0, 1, 1], [], []>} : vector<8x4xf32>, vector<4x8xf32>, vector<8x8xf32> -> vector<8x8xf32>
    %301 = arith.addf %292, %300 : vector<8x8xf32>
    %c0_350 = arith.constant 0 : index
    %c0_351 = arith.constant 0 : index
    %c1_352 = arith.constant 1 : index
    %c0_353 = arith.constant 0 : index
    %c0_354 = arith.constant 0 : index
    %302 = vector.load %arg4[%c0_350, %c0_351, %c1_352, %c0_353, %c0_354] : memref<2x2x2x8x4xf32, #tpu.memory_space<vmem>>, vector<1x1x1x8x4xf32>
    %303 = vector.shape_cast %302 : vector<1x1x1x8x4xf32> to vector<8x4xf32>
    %304 = vector.extract_strided_slice %296 {offsets = [0, 8], sizes = [4, 8], strides = [1, 1]} : vector<4x16xf32> to vector<4x8xf32>
    %cst_355 = arith.constant dense<0.000000e+00> : vector<8x8xf32>
    %305 = tpu.matmul %303, %304, %cst_355 {dimension_numbers = #tpu.dot_dimension_numbers<[1], [0], [0], [1], [0, 0, 1, 1], [], []>} : vector<8x4xf32>, vector<4x8xf32>, vector<8x8xf32> -> vector<8x8xf32>
    %306 = arith.addf %301, %305 : vector<8x8xf32>
    %307 = vector.extract_strided_slice %294 {offsets = [0, 16], sizes = [4, 16], strides = [1, 1]} : vector<4x32xf32> to vector<4x16xf32>
    %cst_356 = arith.constant dense<0.000000e+00> : vector<4x16xf32>
    %308 = tpu.matmul %307, %0, %cst_356 {dimension_numbers = #tpu.dot_dimension_numbers<[1], [0], [0], [1], [0, 0, 1, 1], [], []>} : vector<4x16xf32>, vector<16x16xf32>, vector<4x16xf32> -> vector<4x16xf32>
    %c0_357 = arith.constant 0 : index
    %c1_358 = arith.constant 1 : index
    %c0_359 = arith.constant 0 : index
    %c0_360 = arith.constant 0 : index
    %c0_361 = arith.constant 0 : index
    %309 = vector.load %arg4[%c0_357, %c1_358, %c0_359, %c0_360, %c0_361] : memref<2x2x2x8x4xf32, #tpu.memory_space<vmem>>, vector<1x1x1x8x4xf32>
    %310 = vector.shape_cast %309 : vector<1x1x1x8x4xf32> to vector<8x4xf32>
    %311 = vector.extract_strided_slice %308 {offsets = [0, 0], sizes = [4, 8], strides = [1, 1]} : vector<4x16xf32> to vector<4x8xf32>
    %cst_362 = arith.constant dense<0.000000e+00> : vector<8x8xf32>
    %312 = tpu.matmul %310, %311, %cst_362 {dimension_numbers = #tpu.dot_dimension_numbers<[1], [0], [0], [1], [0, 0, 1, 1], [], []>} : vector<8x4xf32>, vector<4x8xf32>, vector<8x8xf32> -> vector<8x8xf32>
    %313 = arith.addf %306, %312 : vector<8x8xf32>
    %c0_363 = arith.constant 0 : index
    %c1_364 = arith.constant 1 : index
    %c1_365 = arith.constant 1 : index
    %c0_366 = arith.constant 0 : index
    %c0_367 = arith.constant 0 : index
    %314 = vector.load %arg4[%c0_363, %c1_364, %c1_365, %c0_366, %c0_367] : memref<2x2x2x8x4xf32, #tpu.memory_space<vmem>>, vector<1x1x1x8x4xf32>
    %315 = vector.shape_cast %314 : vector<1x1x1x8x4xf32> to vector<8x4xf32>
    %316 = vector.extract_strided_slice %308 {offsets = [0, 8], sizes = [4, 8], strides = [1, 1]} : vector<4x16xf32> to vector<4x8xf32>
    %cst_368 = arith.constant dense<0.000000e+00> : vector<8x8xf32>
    %317 = tpu.matmul %315, %316, %cst_368 {dimension_numbers = #tpu.dot_dimension_numbers<[1], [0], [0], [1], [0, 0, 1, 1], [], []>} : vector<8x4xf32>, vector<4x8xf32>, vector<8x8xf32> -> vector<8x8xf32>
    %318 = arith.addf %313, %317 : vector<8x8xf32>
    %c0_369 = arith.constant 0 : index
    %c0_370 = arith.constant 0 : index
    %c1_371 = arith.constant 1 : index
    %c5_372 = arith.constant 5 : index
    %c0_373 = arith.constant 0 : index
    %319 = vector.load %arg3[%c0_369, %c0_370, %c1_371, %c5_372, %c0_373] : memref<1x4x2x8x32xf32, #tpu.memory_space<vmem>>, vector<1x4x1x1x32xf32>
    %320 = vector.shape_cast %319 : vector<1x4x1x1x32xf32> to vector<4x32xf32>
    %321 = vector.extract_strided_slice %320 {offsets = [0, 0], sizes = [4, 16], strides = [1, 1]} : vector<4x32xf32> to vector<4x16xf32>
    %cst_374 = arith.constant dense<0.000000e+00> : vector<4x16xf32>
    %322 = tpu.matmul %321, %0, %cst_374 {dimension_numbers = #tpu.dot_dimension_numbers<[1], [0], [0], [1], [0, 0, 1, 1], [], []>} : vector<4x16xf32>, vector<16x16xf32>, vector<4x16xf32> -> vector<4x16xf32>
    %c1_375 = arith.constant 1 : index
    %c0_376 = arith.constant 0 : index
    %c0_377 = arith.constant 0 : index
    %c0_378 = arith.constant 0 : index
    %c0_379 = arith.constant 0 : index
    %323 = vector.load %arg4[%c1_375, %c0_376, %c0_377, %c0_378, %c0_379] : memref<2x2x2x8x4xf32, #tpu.memory_space<vmem>>, vector<1x1x1x8x4xf32>
    %324 = vector.shape_cast %323 : vector<1x1x1x8x4xf32> to vector<8x4xf32>
    %325 = vector.extract_strided_slice %322 {offsets = [0, 0], sizes = [4, 8], strides = [1, 1]} : vector<4x16xf32> to vector<4x8xf32>
    %cst_380 = arith.constant dense<0.000000e+00> : vector<8x8xf32>
    %326 = tpu.matmul %324, %325, %cst_380 {dimension_numbers = #tpu.dot_dimension_numbers<[1], [0], [0], [1], [0, 0, 1, 1], [], []>} : vector<8x4xf32>, vector<4x8xf32>, vector<8x8xf32> -> vector<8x8xf32>
    %327 = arith.addf %318, %326 : vector<8x8xf32>
    %c1_381 = arith.constant 1 : index
    %c0_382 = arith.constant 0 : index
    %c1_383 = arith.constant 1 : index
    %c0_384 = arith.constant 0 : index
    %c0_385 = arith.constant 0 : index
    %328 = vector.load %arg4[%c1_381, %c0_382, %c1_383, %c0_384, %c0_385] : memref<2x2x2x8x4xf32, #tpu.memory_space<vmem>>, vector<1x1x1x8x4xf32>
    %329 = vector.shape_cast %328 : vector<1x1x1x8x4xf32> to vector<8x4xf32>
    %330 = vector.extract_strided_slice %322 {offsets = [0, 8], sizes = [4, 8], strides = [1, 1]} : vector<4x16xf32> to vector<4x8xf32>
    %cst_386 = arith.constant dense<0.000000e+00> : vector<8x8xf32>
    %331 = tpu.matmul %329, %330, %cst_386 {dimension_numbers = #tpu.dot_dimension_numbers<[1], [0], [0], [1], [0, 0, 1, 1], [], []>} : vector<8x4xf32>, vector<4x8xf32>, vector<8x8xf32> -> vector<8x8xf32>
    %332 = arith.addf %327, %331 : vector<8x8xf32>
    %333 = vector.extract_strided_slice %320 {offsets = [0, 16], sizes = [4, 16], strides = [1, 1]} : vector<4x32xf32> to vector<4x16xf32>
    %cst_387 = arith.constant dense<0.000000e+00> : vector<4x16xf32>
    %334 = tpu.matmul %333, %0, %cst_387 {dimension_numbers = #tpu.dot_dimension_numbers<[1], [0], [0], [1], [0, 0, 1, 1], [], []>} : vector<4x16xf32>, vector<16x16xf32>, vector<4x16xf32> -> vector<4x16xf32>
    %c1_388 = arith.constant 1 : index
    %c1_389 = arith.constant 1 : index
    %c0_390 = arith.constant 0 : index
    %c0_391 = arith.constant 0 : index
    %c0_392 = arith.constant 0 : index
    %335 = vector.load %arg4[%c1_388, %c1_389, %c0_390, %c0_391, %c0_392] : memref<2x2x2x8x4xf32, #tpu.memory_space<vmem>>, vector<1x1x1x8x4xf32>
    %336 = vector.shape_cast %335 : vector<1x1x1x8x4xf32> to vector<8x4xf32>
    %337 = vector.extract_strided_slice %334 {offsets = [0, 0], sizes = [4, 8], strides = [1, 1]} : vector<4x16xf32> to vector<4x8xf32>
    %cst_393 = arith.constant dense<0.000000e+00> : vector<8x8xf32>
    %338 = tpu.matmul %336, %337, %cst_393 {dimension_numbers = #tpu.dot_dimension_numbers<[1], [0], [0], [1], [0, 0, 1, 1], [], []>} : vector<8x4xf32>, vector<4x8xf32>, vector<8x8xf32> -> vector<8x8xf32>
    %339 = arith.addf %332, %338 : vector<8x8xf32>
    %c1_394 = arith.constant 1 : index
    %c1_395 = arith.constant 1 : index
    %c1_396 = arith.constant 1 : index
    %c0_397 = arith.constant 0 : index
    %c0_398 = arith.constant 0 : index
    %340 = vector.load %arg4[%c1_394, %c1_395, %c1_396, %c0_397, %c0_398] : memref<2x2x2x8x4xf32, #tpu.memory_space<vmem>>, vector<1x1x1x8x4xf32>
    %341 = vector.shape_cast %340 : vector<1x1x1x8x4xf32> to vector<8x4xf32>
    %342 = vector.extract_strided_slice %334 {offsets = [0, 8], sizes = [4, 8], strides = [1, 1]} : vector<4x16xf32> to vector<4x8xf32>
    %cst_399 = arith.constant dense<0.000000e+00> : vector<8x8xf32>
    %343 = tpu.matmul %341, %342, %cst_399 {dimension_numbers = #tpu.dot_dimension_numbers<[1], [0], [0], [1], [0, 0, 1, 1], [], []>} : vector<8x4xf32>, vector<4x8xf32>, vector<8x8xf32> -> vector<8x8xf32>
    %344 = arith.addf %339, %343 : vector<8x8xf32>
    %345 = vector.broadcast %1 : vector<8x1xf32> to vector<8x8xf32>
    %346 = arith.addf %344, %345 : vector<8x8xf32>
    %c0_400 = arith.constant 0 : index
    %c0_401 = arith.constant 0 : index
    %c0_402 = arith.constant 0 : index
    %c5_403 = arith.constant 5 : index
    %c0_404 = arith.constant 0 : index
    %347 = vector.load %arg7[%c0_400, %c0_401, %c0_402, %c5_403, %c0_404] : memref<1x8x1x8x8xf32, #tpu.memory_space<vmem>>, vector<1x8x1x1x8xf32>
    %348 = vector.shape_cast %347 : vector<1x8x1x1x8xf32> to vector<8x8xf32>
    %349 = vector.shape_cast %346 : vector<8x8xf32> to vector<1x8x1x1x8xf32>
    tpu.vector_store %arg7[%c0_400, %c0_401, %c0_402, %c5_403, %c0_404], %349 {strides = array<i32>} : memref<1x8x1x8x8xf32, #tpu.memory_space<vmem>>, vector<1x8x1x1x8xf32>,
    %cst_405 = arith.constant 0.000000e+00 : f32
    %350 = vector.broadcast %cst_405 : f32 to vector<8x8xf32>
    %c0_406 = arith.constant 0 : index
    %c0_407 = arith.constant 0 : index
    %c0_408 = arith.constant 0 : index
    %c6 = arith.constant 6 : index
    %c0_409 = arith.constant 0 : index
    %351 = vector.load %arg3[%c0_406, %c0_407, %c0_408, %c6, %c0_409] : memref<1x4x2x8x32xf32, #tpu.memory_space<vmem>>, vector<1x4x1x1x32xf32>
    %352 = vector.shape_cast %351 : vector<1x4x1x1x32xf32> to vector<4x32xf32>
    %353 = vector.extract_strided_slice %352 {offsets = [0, 0], sizes = [4, 16], strides = [1, 1]} : vector<4x32xf32> to vector<4x16xf32>
    %cst_410 = arith.constant dense<0.000000e+00> : vector<4x16xf32>
    %354 = tpu.matmul %353, %0, %cst_410 {dimension_numbers = #tpu.dot_dimension_numbers<[1], [0], [0], [1], [0, 0, 1, 1], [], []>} : vector<4x16xf32>, vector<16x16xf32>, vector<4x16xf32> -> vector<4x16xf32>
    %c0_411 = arith.constant 0 : index
    %c0_412 = arith.constant 0 : index
    %c0_413 = arith.constant 0 : index
    %c0_414 = arith.constant 0 : index
    %c0_415 = arith.constant 0 : index
    %355 = vector.load %arg4[%c0_411, %c0_412, %c0_413, %c0_414, %c0_415] : memref<2x2x2x8x4xf32, #tpu.memory_space<vmem>>, vector<1x1x1x8x4xf32>
    %356 = vector.shape_cast %355 : vector<1x1x1x8x4xf32> to vector<8x4xf32>
    %357 = vector.extract_strided_slice %354 {offsets = [0, 0], sizes = [4, 8], strides = [1, 1]} : vector<4x16xf32> to vector<4x8xf32>
    %cst_416 = arith.constant dense<0.000000e+00> : vector<8x8xf32>
    %358 = tpu.matmul %356, %357, %cst_416 {dimension_numbers = #tpu.dot_dimension_numbers<[1], [0], [0], [1], [0, 0, 1, 1], [], []>} : vector<8x4xf32>, vector<4x8xf32>, vector<8x8xf32> -> vector<8x8xf32>
    %359 = arith.addf %350, %358 : vector<8x8xf32>
    %c0_417 = arith.constant 0 : index
    %c0_418 = arith.constant 0 : index
    %c1_419 = arith.constant 1 : index
    %c0_420 = arith.constant 0 : index
    %c0_421 = arith.constant 0 : index
    %360 = vector.load %arg4[%c0_417, %c0_418, %c1_419, %c0_420, %c0_421] : memref<2x2x2x8x4xf32, #tpu.memory_space<vmem>>, vector<1x1x1x8x4xf32>
    %361 = vector.shape_cast %360 : vector<1x1x1x8x4xf32> to vector<8x4xf32>
    %362 = vector.extract_strided_slice %354 {offsets = [0, 8], sizes = [4, 8], strides = [1, 1]} : vector<4x16xf32> to vector<4x8xf32>
    %cst_422 = arith.constant dense<0.000000e+00> : vector<8x8xf32>
    %363 = tpu.matmul %361, %362, %cst_422 {dimension_numbers = #tpu.dot_dimension_numbers<[1], [0], [0], [1], [0, 0, 1, 1], [], []>} : vector<8x4xf32>, vector<4x8xf32>, vector<8x8xf32> -> vector<8x8xf32>
    %364 = arith.addf %359, %363 : vector<8x8xf32>
    %365 = vector.extract_strided_slice %352 {offsets = [0, 16], sizes = [4, 16], strides = [1, 1]} : vector<4x32xf32> to vector<4x16xf32>
    %cst_423 = arith.constant dense<0.000000e+00> : vector<4x16xf32>
    %366 = tpu.matmul %365, %0, %cst_423 {dimension_numbers = #tpu.dot_dimension_numbers<[1], [0], [0], [1], [0, 0, 1, 1], [], []>} : vector<4x16xf32>, vector<16x16xf32>, vector<4x16xf32> -> vector<4x16xf32>
    %c0_424 = arith.constant 0 : index
    %c1_425 = arith.constant 1 : index
    %c0_426 = arith.constant 0 : index
    %c0_427 = arith.constant 0 : index
    %c0_428 = arith.constant 0 : index
    %367 = vector.load %arg4[%c0_424, %c1_425, %c0_426, %c0_427, %c0_428] : memref<2x2x2x8x4xf32, #tpu.memory_space<vmem>>, vector<1x1x1x8x4xf32>
    %368 = vector.shape_cast %367 : vector<1x1x1x8x4xf32> to vector<8x4xf32>
    %369 = vector.extract_strided_slice %366 {offsets = [0, 0], sizes = [4, 8], strides = [1, 1]} : vector<4x16xf32> to vector<4x8xf32>
    %cst_429 = arith.constant dense<0.000000e+00> : vector<8x8xf32>
    %370 = tpu.matmul %368, %369, %cst_429 {dimension_numbers = #tpu.dot_dimension_numbers<[1], [0], [0], [1], [0, 0, 1, 1], [], []>} : vector<8x4xf32>, vector<4x8xf32>, vector<8x8xf32> -> vector<8x8xf32>
    %371 = arith.addf %364, %370 : vector<8x8xf32>
    %c0_430 = arith.constant 0 : index
    %c1_431 = arith.constant 1 : index
    %c1_432 = arith.constant 1 : index
    %c0_433 = arith.constant 0 : index
    %c0_434 = arith.constant 0 : index
    %372 = vector.load %arg4[%c0_430, %c1_431, %c1_432, %c0_433, %c0_434] : memref<2x2x2x8x4xf32, #tpu.memory_space<vmem>>, vector<1x1x1x8x4xf32>
    %373 = vector.shape_cast %372 : vector<1x1x1x8x4xf32> to vector<8x4xf32>
    %374 = vector.extract_strided_slice %366 {offsets = [0, 8], sizes = [4, 8], strides = [1, 1]} : vector<4x16xf32> to vector<4x8xf32>
    %cst_435 = arith.constant dense<0.000000e+00> : vector<8x8xf32>
    %375 = tpu.matmul %373, %374, %cst_435 {dimension_numbers = #tpu.dot_dimension_numbers<[1], [0], [0], [1], [0, 0, 1, 1], [], []>} : vector<8x4xf32>, vector<4x8xf32>, vector<8x8xf32> -> vector<8x8xf32>
    %376 = arith.addf %371, %375 : vector<8x8xf32>
    %c0_436 = arith.constant 0 : index
    %c0_437 = arith.constant 0 : index
    %c1_438 = arith.constant 1 : index
    %c6_439 = arith.constant 6 : index
    %c0_440 = arith.constant 0 : index
    %377 = vector.load %arg3[%c0_436, %c0_437, %c1_438, %c6_439, %c0_440] : memref<1x4x2x8x32xf32, #tpu.memory_space<vmem>>, vector<1x4x1x1x32xf32>
    %378 = vector.shape_cast %377 : vector<1x4x1x1x32xf32> to vector<4x32xf32>
    %379 = vector.extract_strided_slice %378 {offsets = [0, 0], sizes = [4, 16], strides = [1, 1]} : vector<4x32xf32> to vector<4x16xf32>
    %cst_441 = arith.constant dense<0.000000e+00> : vector<4x16xf32>
    %380 = tpu.matmul %379, %0, %cst_441 {dimension_numbers = #tpu.dot_dimension_numbers<[1], [0], [0], [1], [0, 0, 1, 1], [], []>} : vector<4x16xf32>, vector<16x16xf32>, vector<4x16xf32> -> vector<4x16xf32>
    %c1_442 = arith.constant 1 : index
    %c0_443 = arith.constant 0 : index
    %c0_444 = arith.constant 0 : index
    %c0_445 = arith.constant 0 : index
    %c0_446 = arith.constant 0 : index
    %381 = vector.load %arg4[%c1_442, %c0_443, %c0_444, %c0_445, %c0_446] : memref<2x2x2x8x4xf32, #tpu.memory_space<vmem>>, vector<1x1x1x8x4xf32>
    %382 = vector.shape_cast %381 : vector<1x1x1x8x4xf32> to vector<8x4xf32>
    %383 = vector.extract_strided_slice %380 {offsets = [0, 0], sizes = [4, 8], strides = [1, 1]} : vector<4x16xf32> to vector<4x8xf32>
    %cst_447 = arith.constant dense<0.000000e+00> : vector<8x8xf32>
    %384 = tpu.matmul %382, %383, %cst_447 {dimension_numbers = #tpu.dot_dimension_numbers<[1], [0], [0], [1], [0, 0, 1, 1], [], []>} : vector<8x4xf32>, vector<4x8xf32>, vector<8x8xf32> -> vector<8x8xf32>
    %385 = arith.addf %376, %384 : vector<8x8xf32>
    %c1_448 = arith.constant 1 : index
    %c0_449 = arith.constant 0 : index
    %c1_450 = arith.constant 1 : index
    %c0_451 = arith.constant 0 : index
    %c0_452 = arith.constant 0 : index
    %386 = vector.load %arg4[%c1_448, %c0_449, %c1_450, %c0_451, %c0_452] : memref<2x2x2x8x4xf32, #tpu.memory_space<vmem>>, vector<1x1x1x8x4xf32>
    %387 = vector.shape_cast %386 : vector<1x1x1x8x4xf32> to vector<8x4xf32>
    %388 = vector.extract_strided_slice %380 {offsets = [0, 8], sizes = [4, 8], strides = [1, 1]} : vector<4x16xf32> to vector<4x8xf32>
    %cst_453 = arith.constant dense<0.000000e+00> : vector<8x8xf32>
    %389 = tpu.matmul %387, %388, %cst_453 {dimension_numbers = #tpu.dot_dimension_numbers<[1], [0], [0], [1], [0, 0, 1, 1], [], []>} : vector<8x4xf32>, vector<4x8xf32>, vector<8x8xf32> -> vector<8x8xf32>
    %390 = arith.addf %385, %389 : vector<8x8xf32>
    %391 = vector.extract_strided_slice %378 {offsets = [0, 16], sizes = [4, 16], strides = [1, 1]} : vector<4x32xf32> to vector<4x16xf32>
    %cst_454 = arith.constant dense<0.000000e+00> : vector<4x16xf32>
    %392 = tpu.matmul %391, %0, %cst_454 {dimension_numbers = #tpu.dot_dimension_numbers<[1], [0], [0], [1], [0, 0, 1, 1], [], []>} : vector<4x16xf32>, vector<16x16xf32>, vector<4x16xf32> -> vector<4x16xf32>
    %c1_455 = arith.constant 1 : index
    %c1_456 = arith.constant 1 : index
    %c0_457 = arith.constant 0 : index
    %c0_458 = arith.constant 0 : index
    %c0_459 = arith.constant 0 : index
    %393 = vector.load %arg4[%c1_455, %c1_456, %c0_457, %c0_458, %c0_459] : memref<2x2x2x8x4xf32, #tpu.memory_space<vmem>>, vector<1x1x1x8x4xf32>
    %394 = vector.shape_cast %393 : vector<1x1x1x8x4xf32> to vector<8x4xf32>
    %395 = vector.extract_strided_slice %392 {offsets = [0, 0], sizes = [4, 8], strides = [1, 1]} : vector<4x16xf32> to vector<4x8xf32>
    %cst_460 = arith.constant dense<0.000000e+00> : vector<8x8xf32>
    %396 = tpu.matmul %394, %395, %cst_460 {dimension_numbers = #tpu.dot_dimension_numbers<[1], [0], [0], [1], [0, 0, 1, 1], [], []>} : vector<8x4xf32>, vector<4x8xf32>, vector<8x8xf32> -> vector<8x8xf32>
    %397 = arith.addf %390, %396 : vector<8x8xf32>
    %c1_461 = arith.constant 1 : index
    %c1_462 = arith.constant 1 : index
    %c1_463 = arith.constant 1 : index
    %c0_464 = arith.constant 0 : index
    %c0_465 = arith.constant 0 : index
    %398 = vector.load %arg4[%c1_461, %c1_462, %c1_463, %c0_464, %c0_465] : memref<2x2x2x8x4xf32, #tpu.memory_space<vmem>>, vector<1x1x1x8x4xf32>
    %399 = vector.shape_cast %398 : vector<1x1x1x8x4xf32> to vector<8x4xf32>
    %400 = vector.extract_strided_slice %392 {offsets = [0, 8], sizes = [4, 8], strides = [1, 1]} : vector<4x16xf32> to vector<4x8xf32>
    %cst_466 = arith.constant dense<0.000000e+00> : vector<8x8xf32>
    %401 = tpu.matmul %399, %400, %cst_466 {dimension_numbers = #tpu.dot_dimension_numbers<[1], [0], [0], [1], [0, 0, 1, 1], [], []>} : vector<8x4xf32>, vector<4x8xf32>, vector<8x8xf32> -> vector<8x8xf32>
    %402 = arith.addf %397, %401 : vector<8x8xf32>
    %403 = vector.broadcast %1 : vector<8x1xf32> to vector<8x8xf32>
    %404 = arith.addf %402, %403 : vector<8x8xf32>
    %c0_467 = arith.constant 0 : index
    %c0_468 = arith.constant 0 : index
    %c0_469 = arith.constant 0 : index
    %c6_470 = arith.constant 6 : index
    %c0_471 = arith.constant 0 : index
    %405 = vector.load %arg7[%c0_467, %c0_468, %c0_469, %c6_470, %c0_471] : memref<1x8x1x8x8xf32, #tpu.memory_space<vmem>>, vector<1x8x1x1x8xf32>
    %406 = vector.shape_cast %405 : vector<1x8x1x1x8xf32> to vector<8x8xf32>
    %407 = vector.shape_cast %404 : vector<8x8xf32> to vector<1x8x1x1x8xf32>
    tpu.vector_store %arg7[%c0_467, %c0_468, %c0_469, %c6_470, %c0_471], %407 {strides = array<i32>} : memref<1x8x1x8x8xf32, #tpu.memory_space<vmem>>, vector<1x8x1x1x8xf32>,
    %cst_472 = arith.constant 0.000000e+00 : f32
    %408 = vector.broadcast %cst_472 : f32 to vector<8x8xf32>
    %c0_473 = arith.constant 0 : index
    %c0_474 = arith.constant 0 : index
    %c0_475 = arith.constant 0 : index
    %c7 = arith.constant 7 : index
    %c0_476 = arith.constant 0 : index
    %409 = vector.load %arg3[%c0_473, %c0_474, %c0_475, %c7, %c0_476] : memref<1x4x2x8x32xf32, #tpu.memory_space<vmem>>, vector<1x4x1x1x32xf32>
    %410 = vector.shape_cast %409 : vector<1x4x1x1x32xf32> to vector<4x32xf32>
    %411 = vector.extract_strided_slice %410 {offsets = [0, 0], sizes = [4, 16], strides = [1, 1]} : vector<4x32xf32> to vector<4x16xf32>
    %cst_477 = arith.constant dense<0.000000e+00> : vector<4x16xf32>
    %412 = tpu.matmul %411, %0, %cst_477 {dimension_numbers = #tpu.dot_dimension_numbers<[1], [0], [0], [1], [0, 0, 1, 1], [], []>} : vector<4x16xf32>, vector<16x16xf32>, vector<4x16xf32> -> vector<4x16xf32>
    %c0_478 = arith.constant 0 : index
    %c0_479 = arith.constant 0 : index
    %c0_480 = arith.constant 0 : index
    %c0_481 = arith.constant 0 : index
    %c0_482 = arith.constant 0 : index
    %413 = vector.load %arg4[%c0_478, %c0_479, %c0_480, %c0_481, %c0_482] : memref<2x2x2x8x4xf32, #tpu.memory_space<vmem>>, vector<1x1x1x8x4xf32>
    %414 = vector.shape_cast %413 : vector<1x1x1x8x4xf32> to vector<8x4xf32>
    %415 = vector.extract_strided_slice %412 {offsets = [0, 0], sizes = [4, 8], strides = [1, 1]} : vector<4x16xf32> to vector<4x8xf32>
    %cst_483 = arith.constant dense<0.000000e+00> : vector<8x8xf32>
    %416 = tpu.matmul %414, %415, %cst_483 {dimension_numbers = #tpu.dot_dimension_numbers<[1], [0], [0], [1], [0, 0, 1, 1], [], []>} : vector<8x4xf32>, vector<4x8xf32>, vector<8x8xf32> -> vector<8x8xf32>
    %417 = arith.addf %408, %416 : vector<8x8xf32>
    %c0_484 = arith.constant 0 : index
    %c0_485 = arith.constant 0 : index
    %c1_486 = arith.constant 1 : index
    %c0_487 = arith.constant 0 : index
    %c0_488 = arith.constant 0 : index
    %418 = vector.load %arg4[%c0_484, %c0_485, %c1_486, %c0_487, %c0_488] : memref<2x2x2x8x4xf32, #tpu.memory_space<vmem>>, vector<1x1x1x8x4xf32>
    %419 = vector.shape_cast %418 : vector<1x1x1x8x4xf32> to vector<8x4xf32>
    %420 = vector.extract_strided_slice %412 {offsets = [0, 8], sizes = [4, 8], strides = [1, 1]} : vector<4x16xf32> to vector<4x8xf32>
    %cst_489 = arith.constant dense<0.000000e+00> : vector<8x8xf32>
    %421 = tpu.matmul %419, %420, %cst_489 {dimension_numbers = #tpu.dot_dimension_numbers<[1], [0], [0], [1], [0, 0, 1, 1], [], []>} : vector<8x4xf32>, vector<4x8xf32>, vector<8x8xf32> -> vector<8x8xf32>
    %422 = arith.addf %417, %421 : vector<8x8xf32>
    %423 = vector.extract_strided_slice %410 {offsets = [0, 16], sizes = [4, 16], strides = [1, 1]} : vector<4x32xf32> to vector<4x16xf32>
    %cst_490 = arith.constant dense<0.000000e+00> : vector<4x16xf32>
    %424 = tpu.matmul %423, %0, %cst_490 {dimension_numbers = #tpu.dot_dimension_numbers<[1], [0], [0], [1], [0, 0, 1, 1], [], []>} : vector<4x16xf32>, vector<16x16xf32>, vector<4x16xf32> -> vector<4x16xf32>
    %c0_491 = arith.constant 0 : index
    %c1_492 = arith.constant 1 : index
    %c0_493 = arith.constant 0 : index
    %c0_494 = arith.constant 0 : index
    %c0_495 = arith.constant 0 : index
    %425 = vector.load %arg4[%c0_491, %c1_492, %c0_493, %c0_494, %c0_495] : memref<2x2x2x8x4xf32, #tpu.memory_space<vmem>>, vector<1x1x1x8x4xf32>
    %426 = vector.shape_cast %425 : vector<1x1x1x8x4xf32> to vector<8x4xf32>
    %427 = vector.extract_strided_slice %424 {offsets = [0, 0], sizes = [4, 8], strides = [1, 1]} : vector<4x16xf32> to vector<4x8xf32>
    %cst_496 = arith.constant dense<0.000000e+00> : vector<8x8xf32>
    %428 = tpu.matmul %426, %427, %cst_496 {dimension_numbers = #tpu.dot_dimension_numbers<[1], [0], [0], [1], [0, 0, 1, 1], [], []>} : vector<8x4xf32>, vector<4x8xf32>, vector<8x8xf32> -> vector<8x8xf32>
    %429 = arith.addf %422, %428 : vector<8x8xf32>
    %c0_497 = arith.constant 0 : index
    %c1_498 = arith.constant 1 : index
    %c1_499 = arith.constant 1 : index
    %c0_500 = arith.constant 0 : index
    %c0_501 = arith.constant 0 : index
    %430 = vector.load %arg4[%c0_497, %c1_498, %c1_499, %c0_500, %c0_501] : memref<2x2x2x8x4xf32, #tpu.memory_space<vmem>>, vector<1x1x1x8x4xf32>
    %431 = vector.shape_cast %430 : vector<1x1x1x8x4xf32> to vector<8x4xf32>
    %432 = vector.extract_strided_slice %424 {offsets = [0, 8], sizes = [4, 8], strides = [1, 1]} : vector<4x16xf32> to vector<4x8xf32>
    %cst_502 = arith.constant dense<0.000000e+00> : vector<8x8xf32>
    %433 = tpu.matmul %431, %432, %cst_502 {dimension_numbers = #tpu.dot_dimension_numbers<[1], [0], [0], [1], [0, 0, 1, 1], [], []>} : vector<8x4xf32>, vector<4x8xf32>, vector<8x8xf32> -> vector<8x8xf32>
    %434 = arith.addf %429, %433 : vector<8x8xf32>
    %c0_503 = arith.constant 0 : index
    %c0_504 = arith.constant 0 : index
    %c1_505 = arith.constant 1 : index
    %c7_506 = arith.constant 7 : index
    %c0_507 = arith.constant 0 : index
    %435 = vector.load %arg3[%c0_503, %c0_504, %c1_505, %c7_506, %c0_507] : memref<1x4x2x8x32xf32, #tpu.memory_space<vmem>>, vector<1x4x1x1x32xf32>
    %436 = vector.shape_cast %435 : vector<1x4x1x1x32xf32> to vector<4x32xf32>
    %437 = vector.extract_strided_slice %436 {offsets = [0, 0], sizes = [4, 16], strides = [1, 1]} : vector<4x32xf32> to vector<4x16xf32>
    %cst_508 = arith.constant dense<0.000000e+00> : vector<4x16xf32>
    %438 = tpu.matmul %437, %0, %cst_508 {dimension_numbers = #tpu.dot_dimension_numbers<[1], [0], [0], [1], [0, 0, 1, 1], [], []>} : vector<4x16xf32>, vector<16x16xf32>, vector<4x16xf32> -> vector<4x16xf32>
    %c1_509 = arith.constant 1 : index
    %c0_510 = arith.constant 0 : index
    %c0_511 = arith.constant 0 : index
    %c0_512 = arith.constant 0 : index
    %c0_513 = arith.constant 0 : index
    %439 = vector.load %arg4[%c1_509, %c0_510, %c0_511, %c0_512, %c0_513] : memref<2x2x2x8x4xf32, #tpu.memory_space<vmem>>, vector<1x1x1x8x4xf32>
    %440 = vector.shape_cast %439 : vector<1x1x1x8x4xf32> to vector<8x4xf32>
    %441 = vector.extract_strided_slice %438 {offsets = [0, 0], sizes = [4, 8], strides = [1, 1]} : vector<4x16xf32> to vector<4x8xf32>
    %cst_514 = arith.constant dense<0.000000e+00> : vector<8x8xf32>
    %442 = tpu.matmul %440, %441, %cst_514 {dimension_numbers = #tpu.dot_dimension_numbers<[1], [0], [0], [1], [0, 0, 1, 1], [], []>} : vector<8x4xf32>, vector<4x8xf32>, vector<8x8xf32> -> vector<8x8xf32>
    %443 = arith.addf %434, %442 : vector<8x8xf32>
    %c1_515 = arith.constant 1 : index
    %c0_516 = arith.constant 0 : index
    %c1_517 = arith.constant 1 : index
    %c0_518 = arith.constant 0 : index
    %c0_519 = arith.constant 0 : index
    %444 = vector.load %arg4[%c1_515, %c0_516, %c1_517, %c0_518, %c0_519] : memref<2x2x2x8x4xf32, #tpu.memory_space<vmem>>, vector<1x1x1x8x4xf32>
    %445 = vector.shape_cast %444 : vector<1x1x1x8x4xf32> to vector<8x4xf32>
    %446 = vector.extract_strided_slice %438 {offsets = [0, 8], sizes = [4, 8], strides = [1, 1]} : vector<4x16xf32> to vector<4x8xf32>
    %cst_520 = arith.constant dense<0.000000e+00> : vector<8x8xf32>
    %447 = tpu.matmul %445, %446, %cst_520 {dimension_numbers = #tpu.dot_dimension_numbers<[1], [0], [0], [1], [0, 0, 1, 1], [], []>} : vector<8x4xf32>, vector<4x8xf32>, vector<8x8xf32> -> vector<8x8xf32>
    %448 = arith.addf %443, %447 : vector<8x8xf32>
    %449 = vector.extract_strided_slice %436 {offsets = [0, 16], sizes = [4, 16], strides = [1, 1]} : vector<4x32xf32> to vector<4x16xf32>
    %cst_521 = arith.constant dense<0.000000e+00> : vector<4x16xf32>
    %450 = tpu.matmul %449, %0, %cst_521 {dimension_numbers = #tpu.dot_dimension_numbers<[1], [0], [0], [1], [0, 0, 1, 1], [], []>} : vector<4x16xf32>, vector<16x16xf32>, vector<4x16xf32> -> vector<4x16xf32>
    %c1_522 = arith.constant 1 : index
    %c1_523 = arith.constant 1 : index
    %c0_524 = arith.constant 0 : index
    %c0_525 = arith.constant 0 : index
    %c0_526 = arith.constant 0 : index
    %451 = vector.load %arg4[%c1_522, %c1_523, %c0_524, %c0_525, %c0_526] : memref<2x2x2x8x4xf32, #tpu.memory_space<vmem>>, vector<1x1x1x8x4xf32>
    %452 = vector.shape_cast %451 : vector<1x1x1x8x4xf32> to vector<8x4xf32>
    %453 = vector.extract_strided_slice %450 {offsets = [0, 0], sizes = [4, 8], strides = [1, 1]} : vector<4x16xf32> to vector<4x8xf32>
    %cst_527 = arith.constant dense<0.000000e+00> : vector<8x8xf32>
    %454 = tpu.matmul %452, %453, %cst_527 {dimension_numbers = #tpu.dot_dimension_numbers<[1], [0], [0], [1], [0, 0, 1, 1], [], []>} : vector<8x4xf32>, vector<4x8xf32>, vector<8x8xf32> -> vector<8x8xf32>
    %455 = arith.addf %448, %454 : vector<8x8xf32>
    %c1_528 = arith.constant 1 : index
    %c1_529 = arith.constant 1 : index
    %c1_530 = arith.constant 1 : index
    %c0_531 = arith.constant 0 : index
    %c0_532 = arith.constant 0 : index
    %456 = vector.load %arg4[%c1_528, %c1_529, %c1_530, %c0_531, %c0_532] : memref<2x2x2x8x4xf32, #tpu.memory_space<vmem>>, vector<1x1x1x8x4xf32>
    %457 = vector.shape_cast %456 : vector<1x1x1x8x4xf32> to vector<8x4xf32>
    %458 = vector.extract_strided_slice %450 {offsets = [0, 8], sizes = [4, 8], strides = [1, 1]} : vector<4x16xf32> to vector<4x8xf32>
    %cst_533 = arith.constant dense<0.000000e+00> : vector<8x8xf32>
    %459 = tpu.matmul %457, %458, %cst_533 {dimension_numbers = #tpu.dot_dimension_numbers<[1], [0], [0], [1], [0, 0, 1, 1], [], []>} : vector<8x4xf32>, vector<4x8xf32>, vector<8x8xf32> -> vector<8x8xf32>
    %460 = arith.addf %455, %459 : vector<8x8xf32>
    %461 = vector.broadcast %1 : vector<8x1xf32> to vector<8x8xf32>
    %462 = arith.addf %460, %461 : vector<8x8xf32>
    %c0_534 = arith.constant 0 : index
    %c0_535 = arith.constant 0 : index
    %c0_536 = arith.constant 0 : index
    %c7_537 = arith.constant 7 : index
    %c0_538 = arith.constant 0 : index
    %463 = vector.load %arg7[%c0_534, %c0_535, %c0_536, %c7_537, %c0_538] : memref<1x8x1x8x8xf32, #tpu.memory_space<vmem>>, vector<1x8x1x1x8xf32>
    %464 = vector.shape_cast %463 : vector<1x8x1x1x8xf32> to vector<8x8xf32>
    %465 = vector.shape_cast %462 : vector<8x8xf32> to vector<1x8x1x1x8xf32>
    tpu.vector_store %arg7[%c0_534, %c0_535, %c0_536, %c7_537, %c0_538], %465 {strides = array<i32>} : memref<1x8x1x8x8xf32, #tpu.memory_space<vmem>>, vector<1x8x1x1x8xf32>,
    return
  }
  func.func @transform_0(%arg0: i32, %arg1: i32, %arg2: i32) -> (i32, i32, i32, i32, i32) {
    %c0_i32 = arith.constant 0 : i32
    %c0_i32_0 = arith.constant 0 : i32
    %c0_i32_1 = arith.constant 0 : i32
    return %arg0, %c0_i32, %arg1, %arg2, %c0_i32_0 : i32, i32, i32, i32, i32
  }
  func.func @transform_1(%arg0: i32, %arg1: i32, %arg2: i32) -> (i32, i32, i32, i32, i32) {
    %c0_i32 = arith.constant 0 : i32
    %c0_i32_0 = arith.constant 0 : i32
    %c0_i32_1 = arith.constant 0 : i32
    %c0_i32_2 = arith.constant 0 : i32
    %c0_i32_3 = arith.constant 0 : i32
    %c0_i32_4 = arith.constant 0 : i32
    return %c0_i32, %c0_i32_0, %c0_i32_1, %c0_i32_2, %c0_i32_3 : i32, i32, i32, i32, i32
  }
  func.func @transform_2(%arg0: i32, %arg1: i32, %arg2: i32) -> (i32, i32) {
    %c0_i32 = arith.constant 0 : i32
    %c0_i32_0 = arith.constant 0 : i32
    %c0_i32_1 = arith.constant 0 : i32
    return %c0_i32, %c0_i32_0 : i32, i32
  }
  func.func @transform_3(%arg0: i32, %arg1: i32, %arg2: i32) -> (i32, i32) {
    %c0_i32 = arith.constant 0 : i32
    %c0_i32_0 = arith.constant 0 : i32
    %c0_i32_1 = arith.constant 0 : i32
    return %c0_i32, %c0_i32_0 : i32, i32
  }
  func.func @transform_4(%arg0: i32, %arg1: i32, %arg2: i32) -> (i32, i32, i32, i32, i32) {
    %c0_i32 = arith.constant 0 : i32
    %c0_i32_0 = arith.constant 0 : i32
    %c0_i32_1 = arith.constant 0 : i32
    return %arg0, %c0_i32, %arg1, %arg2, %c0_i32_0 : i32, i32, i32, i32, i32
  }
}

</mosaic_0001>

<bundles_post_ra>
// kernel: downsample_forward.1
= control target key start
LH: loop header
LB: loop body
LE: loop exit
PB: predicated region body
PF: predicated region fallthrough
CT: control target
= control target key end

     0   :  { %9 = vsyncpa [#allocation4], 0  ;;  %s11046_s0 = inlined_call_operand.vmem [shape: f32[2,4,8,8,32], index: 0, kind: input, shape index: {}]   ;;  %s11047_s1 = inlined_call_operand.vmem [shape: f32[2,2,2,8,4], index: 1, kind: input, shape index: {}]   ;;  %s11048_s2 = inlined_call_operand.vmem [shape: f32[16,16], index: 2, kind: input, shape index: {}]   ;;  %s11049_s3 = inlined_call_operand.vmem [shape: f32[8,1], index: 3, kind: input, shape index: {}]   ;;  %s11050_s4 = inlined_call_operand.hbm [shape: f32[2,8,4,8,8], index: 4, kind: output, shape index: {}]  }
   0x1   :  { %11 = vsyncpa [#allocation4 + $0x1], 0  ;;  %s9864_s15 = smov 0   ;;  %s9866_s16 = smov 0  }
   0x2   :  { %s9868_s17 = smov 0   ;;  %s9870_s18 = smov 0  }
   0x3   :  { %s9872_s19 = smov 0   ;;  %s9874_s20 = smov 0  }
   0x4   :  { %s9876_s21 = smov 0   ;;  %s9878_s22 = smov 0  }
   0x5 LB: > { %s8522_s23 = sadd.s32 4294967295, %s9826_s22   ;;  %s8523_s24 = sadd.s32 4294967294, %s9826_s22   ;;  %s9826_s22 = sphi %s9878_s22, %s17_s22   ;;  %s9822_s21 = sphi %s9876_s21, %s11060_s21   ;;  %s9818_s20 = sphi %s9874_s20, %s11059_s20   ;;  %s9814_s19 = sphi %s9872_s19, %s11058_s19   ;;  %s9810_s18 = sphi %s9870_s18, %s11057_s18   ;;  %s9806_s17 = sphi %s9868_s17, %s11056_s17   ;;  %s9802_s16 = sphi %s9866_s16, %s11055_s16   ;;  %s9798_s15 = sphi %s9864_s15, %s11054_s15  }
   0x6   : > { %s32_s25 = sadd.s32 1, %s9818_s20  ;;  %s36_s26 = sadd.s32 1, %s9822_s21 }
   0x7   : > { %p34_p0 = scmp.ge.s32.totalorder %s32_s25, 4  ;;  %p54_p1 = scmp.ne.s32.totalorder %s9806_s17, %s9802_s16 }
   0x8   : > { %p55_p2 = scmp.eq.s32.totalorder %s9826_s22, 0  ;;  %p151_p5 = scmp.eq.s32.totalorder %s8522_s23, 7 }
   0x9   : > { %s11062_s25 = smov (%p34_p0, %s32_s25), 0  ;;  %s11064_s26 = smov (!%p34_p0, %s36_s26), %s9822_s21 }
   0xa   : > { %s41_s27 = ssub.s32 %s9818_s20, %s11062_s25  ;;  %p9916_p3 = por %p55_p2, %p54_p1 }
   0xb   : > { %p38_p4 = scmp.ge.s32.totalorder %s11064_s26, 2  ;;  %p156_p6 = scmp.ne.s32.totalorder %s9802_s16, %s9798_s15 }
   0xc   : > { %p157_p7 = scmp.eq.s32.totalorder %s8523_s24, 7  ;;  %p9924_p8 = por %p151_p5, %p54_p1 }
   0xd   : > { %s11066_s26 = smov (%p38_p4, %s11064_s26), 0  ;;  %s47_s7 = sadd.s32 1, %s9806_s17 }
   0xe   : > { %p9928_p9 = por %p157_p7, %p156_p6  ;;  %s40_s5 = ssub.s32 %s9822_s21, %s11066_s26 }
   0xf   : > { %s42_s6 = sor.u32 %s41_s27, %s40_s5  ;;  %p8525_p11 = scmp.ge.s32.totalorder %s9826_s22, 8 }
  0x10   : > { %p45_p10 = scmp.eq.s32.totalorder %s42_s6, 0 }
  0x11   : > { %182 = sbr.rel (%p8525_p11) target bundleno = 35 (0x23), region = 28 }
  0x12   : > { %s9936_s8 = scalar_select %p45_p10, %s9806_s17, %s47_s7  }
  0x18   : > { %185 = sbr.rel (!%p9916_p3) target bundleno = 35 (0x23), region = 32  ;;  %s187_s9 = sand.u32 (%p9916_p3), 1, %s9806_s17  }
  0x19   : > { %s8527_s10 = sshll.u32 (%p9916_p3), %s9818_s20, 1  ;;  %s8526_s11 = sshll.u32 (%p9916_p3), %s187_s9, 6 }
  0x1a   : > { %s8528_s12 = sshll.u32 (%p9916_p3), %s9822_s21, 5  ;;  %s189_s5 = scalar_lea.vmem (%p9916_p3), [#allocation2], %s8526_s11 }
  0x1b   : > { %s193_s13 = sadd.s32 (%p9916_p3), %s8528_s12, %s8527_s10 }
  0x1c   : > { %s8529_s14 = sshll.u32 (%p9916_p3), %s193_s13, 3 }
  0x1d   : > { %s195_s27 = scalar_lea.vmem (%p9916_p3), %s11046_s0, %s8529_s14 }
  0x1e   : > { %v237_v0 = vld [vmem:[%s195_s27] sm:$0xff] (%p9916_p3)  ;;  %v239_v1 = vld [vmem:[%s195_s27 + $0x8] sm:$0xff] (%p9916_p3) }
  0x1f   : > { %v241_v2 = vld [vmem:[%s195_s27 + $0x40] sm:$0xff]  ;;  %238 = vst [vmem:[%s189_s5] sm:$0xff] %v237_v0  ;;  %240 = vst [vmem:[%s189_s5 + $0x8] sm:$0xff] %v239_v1  ;;  %v243_v3 = vld [vmem:[%s195_s27 + $0x48] sm:$0xff] }
  0x20   : > { %242 = vst [vmem:[%s189_s5 + $0x10] sm:$0xff] %v241_v2  ;;  %v245_v4 = vld [vmem:[%s195_s27 + $0x80] sm:$0xff]  ;;  %v247_v5 = vld [vmem:[%s195_s27 + $0x88] sm:$0xff]  ;;  %244 = vst [vmem:[%s189_s5 + $0x18] sm:$0xff] %v243_v3 }
  0x21   : > { %246 = vst [vmem:[%s189_s5 + $0x20] sm:$0xff] %v245_v4  ;;  %248 = vst [vmem:[%s189_s5 + $0x28] sm:$0xff] %v247_v5  ;;  %v249_v6 = vld [vmem:[%s195_s27 + $0xc0] sm:$0xff]  ;;  %v251_v7 = vld [vmem:[%s195_s27 + $0xc8] sm:$0xff] }
  0x22   : > { %250 = vst [vmem:[%s189_s5 + $0x30] sm:$0xff] %v249_v6  ;;  %252 = vst [vmem:[%s189_s5 + $0x38] sm:$0xff] %v251_v7 }
  0x23 PF: > { %p8530_p12 = scmp.ge.s32.totalorder %s9826_s22, 1  ;;  %p257_p13 = scmp.lt.s32.totalorder %s9826_s22, 9 }
  0x25   : > { %p258_p0 = pnand %p8530_p12, %p257_p13 }
  0x26   : > { %v290_v8 = vld [vmem:[%s11048_s2] sm:$0xff] (!%p258_p0)  ;;  %v291_v9 = vld [vmem:[%s11048_s2 + $0x8] sm:$0xff] (!%p258_p0)  ;;  %s264_s10 = sand.u32 (!%p258_p0), 1, %s9802_s16   ;;  %v9828_v10 = vmov (!%p258_p0), 0.0|0.0   ;;  %vm9829_vm0 = vmmov (!%p258_p0), 0   ;;  %v9830_v12 = vmov (!%p258_p0), 0.0  }
  0x27   : > { %261 = sbr.rel (%p258_p0) target bundleno = 8055 (0x1f77), region = 70  ;;  %9554 = vmatprep.subr.bf16.mxu0 (!%p258_p0), %v9828_v10  ;;  %v9957_v11 = vpack.c.bf16 (!%p258_p0), %v291_v9, %v290_v8  ;;  %9014 = vmatprep.mubr.msk.f32.mxu0 (!%p258_p0), %vm9829_vm0, %v9830_v12  ;;  %s9963_s11 = sshll.u32 (!%p258_p0), %s264_s10, 6  ;;  %vm302_vm1 = vcmask (!%p258_p0), 1041409   ;;  %vm305_vm2 = vcmask (!%p258_p0), 1042434   ;;  %vm308_vm3 = vcmask (!%p258_p0), 1043459   ;;  %v9998_v33 = vld [vmem:[%s11047_s1 + $0x8] sm:$0xff] (!%p258_p0) }
  0x28   : > { %9017 = vmatprep.subr.mxu1 (!%p258_p0), %v9830_v12  ;;  %9019 = vmatprep.mubr.msk.f32.mxu1 (!%p258_p0), %vm9829_vm0, %v9830_v12  ;;  %s9970_s12 = scalar_lea.vmem (!%p258_p0), [#allocation2], %s9963_s11  ;;  %vm310_vm4 = vcmask (!%p258_p0), 130048   ;;  %s9831_s13 = smov (!%p258_p0), 112   ;;  %vm393_vm5 = vcmask (!%p258_p0), 1043456   ;;  %vm389_vm6 = vcmask (!%p258_p0), 31744   ;;  %v10012_v39 = vld [vmem:[%s11047_s1] sm:$0xff] (!%p258_p0) }
  0x29   : > { %9556 = vmatpush3.bf16.msra.mxu0 (!%p258_p0), %v9957_v11  ;;  %v293_v13 = vld [vmem:[%s9970_s12] sm:$0x1] (!%p258_p0)  ;;  %v294_v14 = vld [vmem:[%s9970_s12 + $0x10] sm:$0x1] (!%p258_p0)  ;;  %s9832_s14 = smov (!%p258_p0), 120   ;;  %v10040_v42 = vld [vmem:[%s11047_s1 + $0x18] sm:$0xff] (!%p258_p0) }
  0x2a   : > { %v295_v15 = vld [vmem:[%s9970_s12 + $0x20] sm:$0x1] (!%p258_p0)  ;;  %v296_v16 = vld [vmem:[%s9970_s12 + $0x30] sm:$0x1] (!%p258_p0)  ;;  %v301_v17 = vrot.slane (!%p258_p0), %v294_v14, 7  ;;  %9557 = vmatprep.subr.bf16.mxu0 (!%p258_p0), %v9828_v10  ;;  %v10068_v59 = vld [vmem:[%s11047_s1 + $0x28] sm:$0xff] (!%p258_p0) }
  0x2b   : > { %v304_v18 = vrot.slane (!%p258_p0), %v295_v15, 6  ;;  %v307_v19 = vrot.slane (!%p258_p0), %v296_v16, 5  ;;  %v8547_v26 = vld [vmem:[%s9970_s12 + $0x18] sm:$0x1] (!%p258_p0)  ;;  %v8548_v27 = vld [vmem:[%s9970_s12 + $0x28] sm:$0x1] (!%p258_p0) }
  0x2c   : > { %v303_v20 = vsel (!%p258_p0), %vm302_vm1, %v301_v17, %v293_v13  ;;  %v783_v28 = vrot.slane (!%p258_p0), %v8547_v26, 7  ;;  %v8546_v29 = vld [vmem:[%s9970_s12 + $0x8] sm:$0x1] (!%p258_p0)  ;;  %v8549_v30 = vld [vmem:[%s9970_s12 + $0x38] sm:$0x1] (!%p258_p0)  ;;  %v785_v31 = vrot.slane (!%p258_p0), %v8548_v27, 6 }
  0x2d   : > { %v306_v21 = vsel (!%p258_p0), %vm305_vm2, %v304_v18, %v303_v20  ;;  %v787_v36 = vrot.slane (!%p258_p0), %v8549_v30, 5  ;;  %v10025_v41 = vld [vmem:[%s11047_s1 + $0x10] sm:$0xff] (!%p258_p0)  ;;  %v10051_v52 = vld [vmem:[%s11047_s1 + $0x20] sm:$0xff] (!%p258_p0)  ;;  %vm1317_vm7 = vcmask (!%p258_p0), 57344   ;;  %s10797_s23 = scalar_lea.vmem (!%p258_p0), [#allocation3], %s9963_s11  ;;  %s8782_s11 = sshll.u32 (!%p258_p0), %s9814_s19, 5 }
  0x2e   : > { %v309_v22 = vsel %vm308_vm3, %v307_v19, %v306_v21  ;;  %v784_v32 = vsel %vm302_vm1, %v783_v28, %v8546_v29  ;;  %v1327_v61 = vld [vmem:[%s9970_s12 + $0x11] sm:$0x1]  ;;  %v1328_v62 = vld [vmem:[%s9970_s12 + $0x21] sm:$0x1]  ;;  %v10104_v19 = vld [vmem:[%s11047_s1 + $0x38] sm:$0xff]  ;;  %s8433_s24 = sshll.u32 %s10797_s23, 4  ;;  %s10977_s24 = int_to_ptr.vmem [resolvable:$true] %s8433_s24 }
  0x2f   : > { %541 = vrot.lane.b32.xlu0 %v309_v22, %s9831_s13  ;;  %9015 = vmatmul.mubr.msk.f32.vlgmr.msra.gmra.mrb[0].mxu0 %vm310_vm4, %v309_v22  ;;  %v786_v38 = vsel %vm305_vm2, %v785_v31, %v784_v32  ;;  %v1334_v63 = vrot.slane %v1327_v61, 7  ;;  %v1326_v0 = vld [vmem:[%s9970_s12 + $0x1] sm:$0x1]  ;;  %v1329_v2 = vld [vmem:[%s9970_s12 + $0x31] sm:$0x1]  ;;  %v1336_v3 = vrot.slane %v1328_v62, 6 }
  0x30   : > { %9559 = vmatpush3.bf16.msra.mxu0 %v9957_v11  ;;  %9031 = vmatprep.mubr.msk.f32.mxu0 %vm9829_vm0, %v9830_v12  ;;  %v788_v40 = vsel %vm308_vm3, %v787_v36, %v786_v38  ;;  %v10084_v7 = vld [vmem:[%s11047_s1 + $0x30] sm:$0xff]  ;;  %v1338_v8 = vrot.slane %v1329_v2, 5  ;;  %v8578_v31 = vld [vmem:[%s9970_s12 + $0x19] sm:$0x1]  ;;  %v8579_v32 = vld [vmem:[%s9970_s12 + $0x29] sm:$0x1] }
  0x31   : > { %9039 = vmatprep.subr.mxu0 %v9830_v12  ;;  %v1335_v6 = vsel %vm302_vm1, %v1334_v63, %v1326_v0  ;;  %v8580_v36 = vld [vmem:[%s9970_s12 + $0x39] sm:$0x1]  ;;  %v2341_v2 = vld [vmem:[%s9970_s12 + $0x22] sm:$0x1]  ;;  %s10994_s28 = scalar_lea.sflag [#allocation4], %s264_s10  ;;  %s9732_s6 = scalar_lea.vmem %s10977_s24, 1024 }
  0x32   : > { %v1337_v13 = vsel %vm305_vm2, %v1336_v3, %v1335_v6  ;;  %v2342_v6 = vld [vmem:[%s9970_s12 + $0x32] sm:$0x1]  ;;  %p9733_p1 = scmp.ne.s32.totalorder %s10977_s24, %s9732_s6  ;;  %s9835_s7 = smov [#allocation3]  }
  0x33   : > { %v1339_v15 = vsel %vm308_vm3, %v1338_v8, %v1337_v13  ;;  %v2349_v8 = vrot.slane %v2341_v2, 6  ;;  %s9736_s9 = sshll.u32 %s9835_s7, 4  ;;  %s9737_s9 = int_to_ptr.vmem [resolvable:$false] %s9736_s9 }
  0x34   : > { %p9734_p2 = pnand %p9733_p1, %p9924_p8  ;;  %p9739_p4 = scmp.lt.s32.totalorder %s10977_s24, %s9737_s9 }
  0x36   : > { %p9735_p3 = pneg %p9734_p2 }
  0xa1   : > { %v542_v23 = vpop.permute.xlu0 %541 }
  0xa2   : > { %9032 = vmatmul.mubr.msk.f32.vlgmr.msra.gmra.mrb[2].mxu0 %vm310_vm4, %v542_v23 }
  0xa3   : > { %9041 = vmatprep.mubr.msk.f32.mxu0 %vm9829_vm0, %v9830_v12 }
 0x102   : > { %v379_v24 = vpop.f32.mrb[0].mxu0 }
 0x103   : > { %387 = vrot.lane.b32.xlu0 %v379_v24, %s9832_s14  ;;  %v9016_v25 = vpop.f32.mrb[1].mxu0 }
 0x175   : > { %v388_v34 = vpop.permute.xlu0 %387  ;;  %v611_v35 = vpop.f32.mrb[2].mxu0 }
 0x176   : > { %9018 = vmatpush3.msk.msra.mxu1 %vm393_vm5, %v388_v34  ;;  %696 = vrot.lane.b32.xlu1 %v611_v35, %s9832_s14  ;;  %v9033_v37 = vpop.f32.mrb[3].mxu0  ;;  %v1806_v34 = vrot.slane %v8578_v31, 7 }
 0x177   : > { %9020 = vmatmul.mubr.msk.f32.vlgmr.msra.gmra.mrb[0].mxu1 %vm389_vm6, %v9998_v33  ;;  %9022 = vmatprep.subr.mxu1 %v9830_v12  ;;  %v1808_v37 = vrot.slane %v8579_v32, 6 }
 0x178   : > { %9023 = vmatpush3.msk.msra.mxu1 %vm393_vm5, %v379_v24  ;;  %9024 = vmatprep.mubr.msk.f32.mxu1 %vm9829_vm0, %v9830_v12 }
 0x179   : > { %9034 = vmatprep.subr.mxu1 %v9830_v12 }
 0x17a   : > { %1020 = vrot.lane.b32.xlu1 %v788_v40, %s9831_s13 }
 0x17b   : > { %9025 = vmatmul.mubr.msk.f32.vlgmr.msra.gmra.mrb[2].mxu1 %vm389_vm6, %v10012_v39 }
 0x17c   : > { %9035 = vmatpush3.msk.msra.mxu1 %vm393_vm5, %v611_v35  ;;  %9036 = vmatprep.mubr.msk.f32.mxu1 %vm9829_vm0, %v9830_v12  ;;  %v8577_v35 = vld [vmem:[%s9970_s12 + $0x9] sm:$0x1] }
 0x17d   : > { %9560 = vmatprep.subr.bf16.mxu1 %v9828_v10  ;;  %v1807_v38 = vsel %vm302_vm1, %v1806_v34, %v8577_v35 }
 0x17f   : > { %9037 = vmatmul.mubr.msk.f32.vlgmr.msra.gmra.mrb[4].mxu1 %vm389_vm6, %v10025_v41 }
 0x180   : > { %9562 = vmatpush3.bf16.msra.mxu1 %v9957_v11  ;;  %9048 = vmatprep.mubr.msk.f32.mxu1 %vm9829_vm0, %v9830_v12 }
 0x181   : > { %9056 = vmatprep.subr.mxu1 %v9830_v12 }
 0x183   : > { %9049 = vmatmul.mubr.msk.f32.vlgmr.msra.gmra.mrb[6].mxu1 %vm310_vm4, %v788_v40  ;;  %v1810_v40 = vrot.slane %v8580_v36, 5 }
 0x184   : > { %9058 = vmatprep.mubr.msk.f32.mxu1 %vm9829_vm0, %v9830_v12 }
 0x1e8   : > { %v697_v43 = vpop.permute.xlu1 %696 }
 0x1e9   : > { %9040 = vmatpush3.msk.msra.mxu0 %vm393_vm5, %v697_v43  ;;  %v1809_v43 = vsel %vm305_vm2, %v1808_v37, %v1807_v38  ;;  %v8609_v37 = vld [vmem:[%s9970_s12 + $0x1a] sm:$0x1]  ;;  %v8610_v38 = vld [vmem:[%s9970_s12 + $0x2a] sm:$0x1] }
 0x1ea   : > { %9042 = vmatmul.mubr.msk.f32.vlgmr.msra.gmra.mrb[4].mxu0 %vm389_vm6, %v10040_v42  ;;  %9051 = vmatprep.subr.mxu0 %v9830_v12 }
 0x1eb   : > { %9053 = vmatprep.mubr.msk.f32.mxu0 %vm9829_vm0, %v9830_v12 }
 0x1ec   : > { %v1021_v55 = vpop.permute.xlu1 %1020 }
 0x24a   : > { %v462_v44 = vpop.f32.mrb[0].mxu1 }
 0x24b   : > { %v9021_v45 = vpop.f32.mrb[1].mxu1 }
 0x24e   : > { %v537_v46 = vpop.f32.mrb[2].mxu1 }
 0x24f   : > { %v538_v47 = vadd.f32 %v537_v46, %v462_v44  ;;  %v9026_v48 = vpop.f32.mrb[3].mxu1  ;;  %v1811_v44 = vsel %vm308_vm3, %v1810_v40, %v1809_v43  ;;  %v2819_v40 = vrot.slane %v8609_v37, 7  ;;  %v8608_v43 = vld [vmem:[%s9970_s12 + $0xa] sm:$0x1] }
 0x252   : > { %v689_v49 = vpop.f32.mrb[4].mxu1 }
 0x253   : > { %v693_v50 = vadd.f32 %v689_v49, %v538_v47  ;;  %v9038_v51 = vpop.f32.mrb[5].mxu1 }
 0x256   : > { %v857_v53 = vpop.f32.mrb[6].mxu1 }
 0x257   : > { %942 = vrot.lane.b32.xlu0 %v857_v53, %s9832_s14  ;;  %v9050_v54 = vpop.f32.mrb[7].mxu1  ;;  %9052 = vmatpush3.msk.msra.mxu0 %vm393_vm5, %v857_v53 }
 0x258   : > { %9054 = vmatmul.mubr.msk.f32.vlgmr.msra.gmra.mrb[6].mxu0 %vm389_vm6, %v10051_v52  ;;  %9563 = vmatprep.subr.bf16.mxu0 %v9828_v10 }
 0x259   : > { %9565 = vmatpush3.bf16.msra.mxu0 %v9957_v11  ;;  %9065 = vmatprep.mubr.msk.f32.mxu0 %vm9829_vm0, %v9830_v12 }
 0x25a   : > { %9073 = vmatprep.subr.mxu0 %v9830_v12 }
 0x25c   : > { %9066 = vmatmul.mubr.msk.f32.vlgmr.msra.gmra.mrb[8].mxu0 %vm310_vm4, %v1021_v55 }
 0x25d   : > { %9075 = vmatprep.mubr.msk.f32.mxu0 %vm9829_vm0, %v9830_v12 }
 0x2bd   : > { %v769_v56 = vpop.f32.mrb[4].mxu0 }
 0x2be   : > { %v773_v57 = vadd.f32 %v769_v56, %v693_v50  ;;  %v9043_v58 = vpop.f32.mrb[5].mxu0 }
 0x2c9   : > { %v943_v60 = vpop.permute.xlu0 %942 }
 0x2ca   : > { %9057 = vmatpush3.msk.msra.mxu1 %vm393_vm5, %v943_v60 }
 0x2cb   : > { %9059 = vmatmul.mubr.msk.f32.vlgmr.msra.gmra.mrb[8].mxu1 %vm389_vm6, %v10068_v59  ;;  %9068 = vmatprep.subr.mxu1 %v9830_v12 }
 0x2cc   : > { %9070 = vmatprep.mubr.msk.f32.mxu1 %vm9829_vm0, %v9830_v12 }
 0x32b   : > { %v935_v1 = vpop.f32.mrb[6].mxu0 }
 0x32c   : > { %v939_v4 = vadd.f32 %v935_v1, %v773_v57  ;;  %v9055_v5 = vpop.f32.mrb[7].mxu0  ;;  %v2340_v1 = vld [vmem:[%s9970_s12 + $0x12] sm:$0x1] }
 0x32d   : > { %v2347_v3 = vrot.slane %v2340_v1, 7 }
 0x32f   : > { %v1090_v9 = vpop.f32.mrb[8].mxu0 }
 0x330   : > { %1175 = vrot.lane.b32.xlu1 %v1090_v9, %s9832_s14  ;;  %v9067_v14 = vpop.f32.mrb[9].mxu0  ;;  %9069 = vmatpush3.msk.msra.mxu1 %vm393_vm5, %v1090_v9 }
 0x331   : > { %9071 = vmatmul.mubr.msk.f32.vlgmr.msra.gmra.mrb[10].mxu1 %vm389_vm6, %v10084_v7  ;;  %9566 = vmatprep.subr.bf16.mxu1 %v9828_v10 }
 0x332   : > { %9568 = vmatpush3.bf16.msra.mxu1 %v9957_v11  ;;  %9082 = vmatprep.mubr.msk.f32.mxu1 %vm9829_vm0, %v9830_v12 }
 0x333   : > { %9090 = vmatprep.subr.mxu1 %v9830_v12 }
 0x334   : > { %1567 = vrot.lane.b32.xlu1 %v1339_v15, %s9831_s13 }
 0x335   : > { %9083 = vmatmul.mubr.msk.f32.vlgmr.msra.gmra.mrb[12].mxu1 %vm310_vm4, %v1339_v15  ;;  %v2351_v15 = vrot.slane %v2342_v6, 5  ;;  %v3353_v6 = vld [vmem:[%s9970_s12 + $0x13] sm:$0x1] }
 0x336   : > { %9092 = vmatprep.mubr.msk.f32.mxu1 %vm9829_vm0, %v9830_v12 }
 0x338   : > { %2041 = vrot.lane.b32.xlu1 %v1811_v44, %s9831_s13 }
 0x39e   : > { %v1015_v16 = vpop.f32.mrb[8].mxu1 }
 0x39f   : > { %v1019_v17 = vadd.f32 %v1015_v16, %v939_v4  ;;  %v9060_v18 = vpop.f32.mrb[9].mxu1  ;;  %v2339_v4 = vld [vmem:[%s9970_s12 + $0x2] sm:$0x1] }
 0x3a0   : > { %v2348_v14 = vsel %vm302_vm1, %v2347_v3, %v2339_v4 }
 0x3a2   : > { %v1176_v20 = vpop.permute.xlu1 %1175 }
 0x3a3   : > { %9074 = vmatpush3.msk.msra.mxu0 %vm393_vm5, %v1176_v20 }
 0x3a4   : > { %9076 = vmatmul.mubr.msk.f32.vlgmr.msra.gmra.mrb[10].mxu0 %vm389_vm6, %v10104_v19  ;;  %9085 = vmatprep.subr.mxu0 %v9830_v12 }
 0x3a5   : > { %9087 = vmatprep.mubr.msk.f32.mxu0 %vm9829_vm0, %v9830_v12 }
 0x3a6   : > { %v1568_v30 = vpop.permute.xlu1 %1567 }
 0x3aa   : > { %v2042_v60 = vpop.permute.xlu1 %2041 }
 0x404   : > { %v1168_v21 = vpop.f32.mrb[10].mxu1 }
 0x405   : > { %v1172_v22 = vadd.f32 %v1168_v21, %v1019_v17  ;;  %v9072_v23 = vpop.f32.mrb[11].mxu1  ;;  %v2350_v17 = vsel %vm305_vm2, %v2349_v8, %v2348_v14  ;;  %v3354_v8 = vld [vmem:[%s9970_s12 + $0x23] sm:$0x1] }
 0x406   : > { %v2352_v20 = vsel %vm308_vm3, %v2351_v15, %v2350_v17  ;;  %v3355_v15 = vld [vmem:[%s9970_s12 + $0x33] sm:$0x1] }
 0x408   : > { %v1408_v24 = vpop.f32.mrb[12].mxu1 }
 0x409   : > { %1415 = vrot.lane.b32.xlu0 %v1408_v24, %s9832_s14  ;;  %v9084_v25 = vpop.f32.mrb[13].mxu1  ;;  %9091 = vmatpush3.msk.msra.mxu1 %vm393_vm5, %v1408_v24 }
 0x40a   : > { %9093 = vmatmul.mubr.msk.f32.vlgmr.msra.gmra.mrb[14].mxu1 %vm389_vm6, %v10012_v39  ;;  %9102 = vmatprep.subr.mxu1 %v9830_v12 }
 0x40b   : > { %9104 = vmatprep.mubr.msk.f32.mxu1 %vm9829_vm0, %v9830_v12 }
 0x477   : > { %v1248_v26 = vpop.f32.mrb[10].mxu0 }
 0x478   : > { %v10119_v27 = vadd.f32 %v1248_v26, %v1172_v22  ;;  %v9077_v28 = vpop.f32.mrb[11].mxu0 }
 0x47b   : > { %v1416_v29 = vpop.permute.xlu0 %1415 }
 0x47c   : > { %9086 = vmatpush3.msk.msra.mxu0 %vm393_vm5, %v1416_v29 }
 0x47d   : > { %9088 = vmatmul.mubr.msk.f32.vlgmr.msra.gmra.mrb[12].mxu0 %vm389_vm6, %v9998_v33  ;;  %9569 = vmatprep.subr.bf16.mxu0 %v9828_v10 }
 0x47e   : > { %9571 = vmatpush3.bf16.msra.mxu0 %v9957_v11  ;;  %9099 = vmatprep.mubr.msk.f32.mxu0 %vm9829_vm0, %v9830_v12 }
 0x47f   : > { %9107 = vmatprep.subr.mxu0 %v9830_v12 }
 0x481   : > { %9100 = vmatmul.mubr.msk.f32.vlgmr.msra.gmra.mrb[14].mxu0 %vm310_vm4, %v1568_v30 }
 0x482   : > { %9109 = vmatprep.mubr.msk.f32.mxu0 %vm9829_vm0, %v9830_v12 }
 0x4dd   : > { %v1563_v45 = vpop.f32.mrb[14].mxu1 }
 0x4de   : > { %v9094_v46 = vpop.f32.mrb[15].mxu1 }
 0x4df   : > { %v2820_v46 = vsel %vm302_vm1, %v2819_v40, %v8608_v43 }
 0x550   : > { %v1488_v47 = vpop.f32.mrb[12].mxu0 }
 0x551   : > { %v1564_v48 = vadd.f32 %v1563_v45, %v1488_v47  ;;  %v9089_v49 = vpop.f32.mrb[13].mxu0  ;;  %v2821_v45 = vrot.slane %v8610_v38, 6 }
 0x554   : > { %v1637_v50 = vpop.f32.mrb[14].mxu0 }
 0x555   : > { %1720 = vrot.lane.b32.xlu0 %v1637_v50, %s9832_s14  ;;  %v9101_v51 = vpop.f32.mrb[15].mxu0  ;;  %9103 = vmatpush3.msk.msra.mxu1 %vm393_vm5, %v1637_v50 }
 0x556   : > { %9105 = vmatmul.mubr.msk.f32.vlgmr.msra.gmra.mrb[16].mxu1 %vm389_vm6, %v10025_v41  ;;  %9572 = vmatprep.subr.bf16.mxu1 %v9828_v10 }
 0x557   : > { %9574 = vmatpush3.bf16.msra.mxu1 %v9957_v11  ;;  %9116 = vmatprep.mubr.msk.f32.mxu1 %vm9829_vm0, %v9830_v12 }
 0x558   : > { %9124 = vmatprep.subr.mxu1 %v9830_v12 }
 0x55a   : > { %9117 = vmatmul.mubr.msk.f32.vlgmr.msra.gmra.mrb[18].mxu1 %vm310_vm4, %v1811_v44  ;;  %v8611_v44 = vld [vmem:[%s9970_s12 + $0x3a] sm:$0x1] }
 0x55b   : > { %9126 = vmatprep.mubr.msk.f32.mxu1 %vm9829_vm0, %v9830_v12  ;;  %v2823_v47 = vrot.slane %v8611_v44, 5 }
 0x5c7   : > { %v1721_v53 = vpop.permute.xlu0 %1720 }
 0x5c8   : > { %9108 = vmatpush3.msk.msra.mxu0 %vm393_vm5, %v1721_v53 }
 0x5c9   : > { %9110 = vmatmul.mubr.msk.f32.vlgmr.msra.gmra.mrb[16].mxu0 %vm389_vm6, %v10040_v42  ;;  %9119 = vmatprep.subr.mxu0 %v9830_v12 }
 0x5ca   : > { %9121 = vmatprep.mubr.msk.f32.mxu0 %vm9829_vm0, %v9830_v12 }
 0x629   : > { %v1714_v54 = vpop.f32.mrb[16].mxu1 }
 0x62a   : > { %v1718_v55 = vadd.f32 %v1714_v54, %v1564_v48  ;;  %v9106_v56 = vpop.f32.mrb[17].mxu1  ;;  %v2822_v48 = vsel %vm305_vm2, %v2821_v45, %v2820_v46  ;;  %v8640_v46 = vld [vmem:[%s9970_s12 + $0x1b] sm:$0x1] }
 0x62b   : > { %v2824_v49 = vsel %vm308_vm3, %v2823_v47, %v2822_v48  ;;  %v8641_v47 = vld [vmem:[%s9970_s12 + $0x2b] sm:$0x1]  ;;  %v3832_v48 = vrot.slane %v8640_v46, 7 }
 0x62d   : > { %v1880_v57 = vpop.f32.mrb[18].mxu1 }
 0x62e   : > { %1963 = vrot.lane.b32.xlu0 %v1880_v57, %s9832_s14  ;;  %v9118_v58 = vpop.f32.mrb[19].mxu1  ;;  %9120 = vmatpush3.msk.msra.mxu0 %vm393_vm5, %v1880_v57 }
 0x62f   : > { %9122 = vmatmul.mubr.msk.f32.vlgmr.msra.gmra.mrb[18].mxu0 %vm389_vm6, %v10051_v52  ;;  %9575 = vmatprep.subr.bf16.mxu0 %v9828_v10 }
 0x630   : > { %9577 = vmatpush3.bf16.msra.mxu0 %v9957_v11  ;;  %9133 = vmatprep.mubr.msk.f32.mxu0 %vm9829_vm0, %v9830_v12 }
 0x631   : > { %9141 = vmatprep.subr.mxu0 %v9830_v12 }
 0x633   : > { %9134 = vmatmul.mubr.msk.f32.vlgmr.msra.gmra.mrb[20].mxu0 %vm310_vm4, %v2042_v60 }
 0x634   : > { %9143 = vmatprep.mubr.msk.f32.mxu0 %vm9829_vm0, %v9830_v12 }
 0x69c   : > { %v1793_v61 = vpop.f32.mrb[16].mxu0 }
 0x69d   : > { %v1797_v62 = vadd.f32 %v1793_v61, %v1718_v55  ;;  %v9111_v63 = vpop.f32.mrb[17].mxu0 }
 0x6a0   : > { %v1964_v0 = vpop.permute.xlu0 %1963 }
 0x6a1   : > { %9125 = vmatpush3.msk.msra.mxu1 %vm393_vm5, %v1964_v0 }
 0x6a2   : > { %9127 = vmatmul.mubr.msk.f32.vlgmr.msra.gmra.mrb[20].mxu1 %vm389_vm6, %v10068_v59  ;;  %9136 = vmatprep.subr.mxu1 %v9830_v12 }
 0x6a3   : > { %9138 = vmatprep.mubr.msk.f32.mxu1 %vm9829_vm0, %v9830_v12 }
 0x702   : > { %v1957_v5 = vpop.f32.mrb[18].mxu0 }
 0x703   : > { %v1961_v9 = vadd.f32 %v1957_v5, %v1797_v62  ;;  %v9123_v13 = vpop.f32.mrb[19].mxu0 }
 0x704   : > { %v3352_v13 = vld [vmem:[%s9970_s12 + $0x3] sm:$0x1] }
 0x706   : > { %v2111_v16 = vpop.f32.mrb[20].mxu0 }
 0x707   : > { %2194 = vrot.lane.b32.xlu1 %v2111_v16, %s9832_s14  ;;  %v9135_v18 = vpop.f32.mrb[21].mxu0  ;;  %9137 = vmatpush3.msk.msra.mxu1 %vm393_vm5, %v2111_v16  ;;  %v3362_v16 = vrot.slane %v3354_v8, 6 }
 0x708   : > { %9139 = vmatmul.mubr.msk.f32.vlgmr.msra.gmra.mrb[22].mxu1 %vm389_vm6, %v10084_v7  ;;  %9578 = vmatprep.subr.bf16.mxu1 %v9828_v10 }
 0x709   : > { %9580 = vmatpush3.bf16.msra.mxu1 %v9957_v11  ;;  %9150 = vmatprep.mubr.msk.f32.mxu1 %vm9829_vm0, %v9830_v12 }
 0x70a   : > { %9158 = vmatprep.subr.mxu1 %v9830_v12 }
 0x70b   : > { %2580 = vrot.lane.b32.xlu1 %v2352_v20, %s9831_s13 }
 0x70c   : > { %9151 = vmatmul.mubr.msk.f32.vlgmr.msra.gmra.mrb[24].mxu1 %vm310_vm4, %v2352_v20 }
 0x70d   : > { %9160 = vmatprep.mubr.msk.f32.mxu1 %vm9829_vm0, %v9830_v12 }
 0x70f   : > { %3054 = vrot.lane.b32.xlu1 %v2824_v49, %s9831_s13 }
 0x775   : > { %v2036_v21 = vpop.f32.mrb[20].mxu1 }
 0x776   : > { %v2040_v22 = vadd.f32 %v2036_v21, %v1961_v9  ;;  %v9128_v23 = vpop.f32.mrb[21].mxu1  ;;  %v3360_v9 = vrot.slane %v3353_v6, 7  ;;  %v3364_v21 = vrot.slane %v3355_v15, 5 }
 0x778   : > { %v3361_v20 = vsel %vm302_vm1, %v3360_v9, %v3352_v13 }
 0x779   : > { %v2195_v24 = vpop.permute.xlu1 %2194  ;;  %v3363_v23 = vsel %vm305_vm2, %v3362_v16, %v3361_v20  ;;  %v4366_v16 = vld [vmem:[%s9970_s12 + $0x14] sm:$0x1]  ;;  %v4365_v20 = vld [vmem:[%s9970_s12 + $0x4] sm:$0x1] }
 0x77a   : > { %9142 = vmatpush3.msk.msra.mxu0 %vm393_vm5, %v2195_v24 }
 0x77b   : > { %9144 = vmatmul.mubr.msk.f32.vlgmr.msra.gmra.mrb[22].mxu0 %vm389_vm6, %v10104_v19  ;;  %9153 = vmatprep.subr.mxu0 %v9830_v12 }
 0x77c   : > { %9155 = vmatprep.mubr.msk.f32.mxu0 %vm9829_vm0, %v9830_v12 }
 0x77d   : > { %v2581_v36 = vpop.permute.xlu1 %2580 }
 0x781   : > { %v3055_v1 = vpop.permute.xlu1 %3054 }
 0x7db   : > { %v2188_v25 = vpop.f32.mrb[22].mxu1 }
 0x7dc   : > { %v2192_v26 = vadd.f32 %v2188_v25, %v2040_v22  ;;  %v9140_v28 = vpop.f32.mrb[23].mxu1  ;;  %v3365_v25 = vsel %vm308_vm3, %v3364_v21, %v3363_v23 }
 0x7df   : > { %v2421_v29 = vpop.f32.mrb[24].mxu1 }
 0x7e0   : > { %2428 = vrot.lane.b32.xlu0 %v2421_v29, %s9832_s14  ;;  %v9152_v30 = vpop.f32.mrb[25].mxu1  ;;  %9159 = vmatpush3.msk.msra.mxu1 %vm393_vm5, %v2421_v29 }
 0x7e1   : > { %9161 = vmatmul.mubr.msk.f32.vlgmr.msra.gmra.mrb[26].mxu1 %vm389_vm6, %v10012_v39  ;;  %9170 = vmatprep.subr.mxu1 %v9830_v12 }
 0x7e2   : > { %9172 = vmatprep.mubr.msk.f32.mxu1 %vm9829_vm0, %v9830_v12 }
 0x84e   : > { %v2267_v31 = vpop.f32.mrb[22].mxu0 }
 0x84f   : > { %v10209_v32 = vadd.f32 %v2267_v31, %v2192_v26  ;;  %v9145_v34 = vpop.f32.mrb[23].mxu0 }
 0x852   : > { %v2429_v35 = vpop.permute.xlu0 %2428 }
 0x853   : > { %9154 = vmatpush3.msk.msra.mxu0 %vm393_vm5, %v2429_v35 }
 0x854   : > { %9156 = vmatmul.mubr.msk.f32.vlgmr.msra.gmra.mrb[24].mxu0 %vm389_vm6, %v9998_v33  ;;  %9581 = vmatprep.subr.bf16.mxu0 %v9828_v10 }
 0x855   : > { %9583 = vmatpush3.bf16.msra.mxu0 %v9957_v11  ;;  %9167 = vmatprep.mubr.msk.f32.mxu0 %vm9829_vm0, %v9830_v12 }
 0x856   : > { %9175 = vmatprep.subr.mxu0 %v9830_v12 }
 0x858   : > { %9168 = vmatmul.mubr.msk.f32.vlgmr.msra.gmra.mrb[26].mxu0 %vm310_vm4, %v2581_v36 }
 0x859   : > { %9177 = vmatprep.mubr.msk.f32.mxu0 %vm9829_vm0, %v9830_v12 }
 0x8b4   : > { %v2576_v50 = vpop.f32.mrb[26].mxu1 }
 0x8b5   : > { %v9162_v51 = vpop.f32.mrb[27].mxu1 }
 0x8b6   : > { %v3834_v51 = vrot.slane %v8641_v47, 6 }
 0x927   : > { %v2501_v53 = vpop.f32.mrb[24].mxu0 }
 0x928   : > { %v2577_v54 = vadd.f32 %v2576_v50, %v2501_v53  ;;  %v9157_v55 = vpop.f32.mrb[25].mxu0  ;;  %v8642_v50 = vld [vmem:[%s9970_s12 + $0x3b] sm:$0x1] }
 0x92b   : > { %v2650_v56 = vpop.f32.mrb[26].mxu0 }
 0x92c   : > { %2733 = vrot.lane.b32.xlu0 %v2650_v56, %s9832_s14  ;;  %v9169_v57 = vpop.f32.mrb[27].mxu0  ;;  %9171 = vmatpush3.msk.msra.mxu1 %vm393_vm5, %v2650_v56 }
 0x92d   : > { %9173 = vmatmul.mubr.msk.f32.vlgmr.msra.gmra.mrb[28].mxu1 %vm389_vm6, %v10025_v41  ;;  %9584 = vmatprep.subr.bf16.mxu1 %v9828_v10 }
 0x92e   : > { %9586 = vmatpush3.bf16.msra.mxu1 %v9957_v11  ;;  %9184 = vmatprep.mubr.msk.f32.mxu1 %vm9829_vm0, %v9830_v12 }
 0x92f   : > { %9192 = vmatprep.subr.mxu1 %v9830_v12 }
 0x931   : > { %9185 = vmatmul.mubr.msk.f32.vlgmr.msra.gmra.mrb[30].mxu1 %vm310_vm4, %v2824_v49  ;;  %v8639_v49 = vld [vmem:[%s9970_s12 + $0xb] sm:$0x1] }
 0x932   : > { %9194 = vmatprep.mubr.msk.f32.mxu1 %vm9829_vm0, %v9830_v12  ;;  %v3833_v53 = vsel %vm302_vm1, %v3832_v48, %v8639_v49 }
 0x933   : > { %v3835_v55 = vsel %vm305_vm2, %v3834_v51, %v3833_v53  ;;  %v8671_v53 = vld [vmem:[%s9970_s12 + $0x1c] sm:$0x1] }
 0x99e   : > { %v2734_v58 = vpop.permute.xlu0 %2733 }
 0x99f   : > { %9176 = vmatpush3.msk.msra.mxu0 %vm393_vm5, %v2734_v58 }
 0x9a0   : > { %9178 = vmatmul.mubr.msk.f32.vlgmr.msra.gmra.mrb[28].mxu0 %vm389_vm6, %v10040_v42  ;;  %9187 = vmatprep.subr.mxu0 %v9830_v12 }
 0x9a1   : > { %9189 = vmatprep.mubr.msk.f32.mxu0 %vm9829_vm0, %v9830_v12 }
 0xa00   : > { %v2727_v60 = vpop.f32.mrb[28].mxu1 }
 0xa01   : > { %v2731_v61 = vadd.f32 %v2727_v60, %v2577_v54  ;;  %v9174_v62 = vpop.f32.mrb[29].mxu1  ;;  %v3836_v54 = vrot.slane %v8642_v50, 5 }
 0xa03   : > { %v3837_v56 = vsel %vm308_vm3, %v3836_v54, %v3835_v55  ;;  %v8672_v54 = vld [vmem:[%s9970_s12 + $0x2c] sm:$0x1]  ;;  %v4845_v55 = vrot.slane %v8671_v53, 7 }
 0xa04   : > { %v2893_v63 = vpop.f32.mrb[30].mxu1 }
 0xa05   : > { %2976 = vrot.lane.b32.xlu0 %v2893_v63, %s9832_s14  ;;  %v9186_v0 = vpop.f32.mrb[31].mxu1  ;;  %9188 = vmatpush3.msk.msra.mxu0 %vm393_vm5, %v2893_v63 }
 0xa06   : > { %9190 = vmatmul.mubr.msk.f32.vlgmr.msra.gmra.mrb[30].mxu0 %vm389_vm6, %v10051_v52  ;;  %9587 = vmatprep.subr.bf16.mxu0 %v9828_v10 }
 0xa07   : > { %9589 = vmatpush3.bf16.msra.mxu0 %v9957_v11  ;;  %9201 = vmatprep.mubr.msk.f32.mxu0 %vm9829_vm0, %v9830_v12 }
 0xa08   : > { %9209 = vmatprep.subr.mxu0 %v9830_v12 }
 0xa0a   : > { %9202 = vmatmul.mubr.msk.f32.vlgmr.msra.gmra.mrb[32].mxu0 %vm310_vm4, %v3055_v1 }
 0xa0b   : > { %9211 = vmatprep.mubr.msk.f32.mxu0 %vm9829_vm0, %v9830_v12 }
 0xa73   : > { %v2806_v2 = vpop.f32.mrb[28].mxu0 }
 0xa74   : > { %v2810_v3 = vadd.f32 %v2806_v2, %v2731_v61  ;;  %v9179_v4 = vpop.f32.mrb[29].mxu0 }
 0xa77   : > { %v2977_v5 = vpop.permute.xlu0 %2976 }
 0xa78   : > { %9193 = vmatpush3.msk.msra.mxu1 %vm393_vm5, %v2977_v5 }
 0xa79   : > { %9195 = vmatmul.mubr.msk.f32.vlgmr.msra.gmra.mrb[32].mxu1 %vm389_vm6, %v10068_v59  ;;  %9204 = vmatprep.subr.mxu1 %v9830_v12 }
 0xa7a   : > { %9206 = vmatprep.mubr.msk.f32.mxu1 %vm9829_vm0, %v9830_v12 }
 0xad9   : > { %v2970_v14 = vpop.f32.mrb[30].mxu0 }
 0xada   : > { %v2974_v17 = vadd.f32 %v2970_v14, %v2810_v3  ;;  %v9191_v18 = vpop.f32.mrb[31].mxu0 }
 0xadb   : > { %v4373_v18 = vrot.slane %v4366_v16, 7 }
 0xadd   : > { %v3124_v22 = vpop.f32.mrb[32].mxu0 }
 0xade   : > { %3207 = vrot.lane.b32.xlu1 %v3124_v22, %s9832_s14  ;;  %v9203_v24 = vpop.f32.mrb[33].mxu0  ;;  %9205 = vmatpush3.msk.msra.mxu1 %vm393_vm5, %v3124_v22  ;;  %v4368_v22 = vld [vmem:[%s9970_s12 + $0x34] sm:$0x1] }
 0xadf   : > { %9207 = vmatmul.mubr.msk.f32.vlgmr.msra.gmra.mrb[34].mxu1 %vm389_vm6, %v10084_v7  ;;  %9590 = vmatprep.subr.bf16.mxu1 %v9828_v10 }
 0xae0   : > { %9592 = vmatpush3.bf16.msra.mxu1 %v9957_v11  ;;  %9218 = vmatprep.mubr.msk.f32.mxu1 %vm9829_vm0, %v9830_v12 }
 0xae1   : > { %9226 = vmatprep.subr.mxu1 %v9830_v12 }
 0xae2   : > { %3593 = vrot.lane.b32.xlu1 %v3365_v25, %s9831_s13 }
 0xae3   : > { %9219 = vmatmul.mubr.msk.f32.vlgmr.msra.gmra.mrb[36].mxu1 %vm310_vm4, %v3365_v25 }
 0xae4   : > { %9228 = vmatprep.mubr.msk.f32.mxu1 %vm9829_vm0, %v9830_v12 }
 0xae6   : > { %4067 = vrot.lane.b32.xlu1 %v3837_v56, %s9831_s13 }
 0xb4c   : > { %v3049_v26 = vpop.f32.mrb[32].mxu1 }
 0xb4d   : > { %v3053_v28 = vadd.f32 %v3049_v26, %v2974_v17  ;;  %v9196_v29 = vpop.f32.mrb[33].mxu1  ;;  %v4367_v17 = vld [vmem:[%s9970_s12 + $0x24] sm:$0x1]  ;;  %v4374_v26 = vsel %vm302_vm1, %v4373_v18, %v4365_v20  ;;  %v5379_v18 = vld [vmem:[%s9970_s12 + $0x15] sm:$0x1] }
 0xb4e   : > { %v4375_v23 = vrot.slane %v4367_v17, 6  ;;  %v5380_v20 = vld [vmem:[%s9970_s12 + $0x25] sm:$0x1] }
 0xb50   : > { %v3208_v30 = vpop.permute.xlu1 %3207 }
 0xb51   : > { %9210 = vmatpush3.msk.msra.mxu0 %vm393_vm5, %v3208_v30  ;;  %v4376_v30 = vsel %vm305_vm2, %v4375_v23, %v4374_v26 }
 0xb52   : > { %9212 = vmatmul.mubr.msk.f32.vlgmr.msra.gmra.mrb[34].mxu0 %vm389_vm6, %v10104_v19  ;;  %9221 = vmatprep.subr.mxu0 %v9830_v12 }
 0xb53   : > { %9223 = vmatprep.mubr.msk.f32.mxu0 %vm9829_vm0, %v9830_v12 }
 0xb54   : > { %v3594_v45 = vpop.permute.xlu1 %3593 }
 0xb58   : > { %v4068_v8 = vpop.permute.xlu1 %4067 }
 0xbb2   : > { %v3201_v31 = vpop.f32.mrb[34].mxu1 }
 0xbb3   : > { %v3205_v34 = vadd.f32 %v3201_v31, %v3053_v28  ;;  %v9208_v35 = vpop.f32.mrb[35].mxu1  ;;  %v4377_v28 = vrot.slane %v4368_v22, 5  ;;  %v5378_v22 = vld [vmem:[%s9970_s12 + $0x5] sm:$0x1] }
 0xbb6   : > { %v3434_v36 = vpop.f32.mrb[36].mxu1 }
 0xbb7   : > { %3441 = vrot.lane.b32.xlu0 %v3434_v36, %s9832_s14  ;;  %v9220_v37 = vpop.f32.mrb[37].mxu1  ;;  %9227 = vmatpush3.msk.msra.mxu1 %vm393_vm5, %v3434_v36 }
 0xbb8   : > { %9229 = vmatmul.mubr.msk.f32.vlgmr.msra.gmra.mrb[38].mxu1 %vm389_vm6, %v10012_v39  ;;  %9238 = vmatprep.subr.mxu1 %v9830_v12 }
 0xbb9   : > { %9240 = vmatprep.mubr.msk.f32.mxu1 %vm9829_vm0, %v9830_v12 }
 0xc25   : > { %v3280_v38 = vpop.f32.mrb[34].mxu0 }
 0xc26   : > { %v10299_v40 = vadd.f32 %v3280_v38, %v3205_v34  ;;  %v9213_v43 = vpop.f32.mrb[35].mxu0  ;;  %v4378_v34 = vsel %vm308_vm3, %v4377_v28, %v4376_v30 }
 0xc29   : > { %v3442_v44 = vpop.permute.xlu0 %3441 }
 0xc2a   : > { %9222 = vmatpush3.msk.msra.mxu0 %vm393_vm5, %v3442_v44 }
 0xc2b   : > { %9224 = vmatmul.mubr.msk.f32.vlgmr.msra.gmra.mrb[36].mxu0 %vm389_vm6, %v9998_v33  ;;  %9593 = vmatprep.subr.bf16.mxu0 %v9828_v10 }
 0xc2c   : > { %9595 = vmatpush3.bf16.msra.mxu0 %v9957_v11  ;;  %9235 = vmatprep.mubr.msk.f32.mxu0 %vm9829_vm0, %v9830_v12 }
 0xc2d   : > { %9243 = vmatprep.subr.mxu0 %v9830_v12 }
 0xc2f   : > { %9236 = vmatmul.mubr.msk.f32.vlgmr.msra.gmra.mrb[38].mxu0 %vm310_vm4, %v3594_v45 }
 0xc30   : > { %9245 = vmatprep.mubr.msk.f32.mxu0 %vm9829_vm0, %v9830_v12 }
 0xc8b   : > { %v3589_v57 = vpop.f32.mrb[38].mxu1 }
 0xc8c   : > { %v9230_v58 = vpop.f32.mrb[39].mxu1 }
 0xcfe   : > { %v3514_v60 = vpop.f32.mrb[36].mxu0 }
 0xcff   : > { %v3590_v61 = vadd.f32 %v3589_v57, %v3514_v60  ;;  %v9225_v62 = vpop.f32.mrb[37].mxu0  ;;  %v4847_v57 = vrot.slane %v8672_v54, 6 }
 0xd02   : > { %v3663_v63 = vpop.f32.mrb[38].mxu0 }
 0xd03   : > { %3746 = vrot.lane.b32.xlu0 %v3663_v63, %s9832_s14  ;;  %v9237_v0 = vpop.f32.mrb[39].mxu0  ;;  %9239 = vmatpush3.msk.msra.mxu1 %vm393_vm5, %v3663_v63 }
 0xd04   : > { %9241 = vmatmul.mubr.msk.f32.vlgmr.msra.gmra.mrb[40].mxu1 %vm389_vm6, %v10025_v41  ;;  %9596 = vmatprep.subr.bf16.mxu1 %v9828_v10 }
 0xd05   : > { %9598 = vmatpush3.bf16.msra.mxu1 %v9957_v11  ;;  %9252 = vmatprep.mubr.msk.f32.mxu1 %vm9829_vm0, %v9830_v12 }
 0xd06   : > { %9260 = vmatprep.subr.mxu1 %v9830_v12 }
 0xd08   : > { %9253 = vmatmul.mubr.msk.f32.vlgmr.msra.gmra.mrb[42].mxu1 %vm310_vm4, %v3837_v56  ;;  %v8670_v56 = vld [vmem:[%s9970_s12 + $0xc] sm:$0x1] }
 0xd09   : > { %9262 = vmatprep.mubr.msk.f32.mxu1 %vm9829_vm0, %v9830_v12  ;;  %v4846_v58 = vsel %vm302_vm1, %v4845_v55, %v8670_v56  ;;  %v8702_v55 = vld [vmem:[%s9970_s12 + $0x1d] sm:$0x1]  ;;  %v8703_v56 = vld [vmem:[%s9970_s12 + $0x2d] sm:$0x1] }
 0xd75   : > { %v3747_v1 = vpop.permute.xlu0 %3746 }
 0xd76   : > { %9244 = vmatpush3.msk.msra.mxu0 %vm393_vm5, %v3747_v1 }
 0xd77   : > { %9246 = vmatmul.mubr.msk.f32.vlgmr.msra.gmra.mrb[40].mxu0 %vm389_vm6, %v10040_v42  ;;  %9255 = vmatprep.subr.mxu0 %v9830_v12 }
 0xd78   : > { %9257 = vmatprep.mubr.msk.f32.mxu0 %vm9829_vm0, %v9830_v12 }
 0xdd7   : > { %v3740_v2 = vpop.f32.mrb[40].mxu1 }
 0xdd8   : > { %v3744_v3 = vadd.f32 %v3740_v2, %v3590_v61  ;;  %v9242_v4 = vpop.f32.mrb[41].mxu1  ;;  %v4848_v61 = vsel %vm305_vm2, %v4847_v57, %v4846_v58  ;;  %v8701_v57 = vld [vmem:[%s9970_s12 + $0xd] sm:$0x1]  ;;  %v8704_v58 = vld [vmem:[%s9970_s12 + $0x3d] sm:$0x1] }
 0xddb   : > { %v3906_v5 = vpop.f32.mrb[42].mxu1 }
 0xddc   : > { %3989 = vrot.lane.b32.xlu0 %v3906_v5, %s9832_s14  ;;  %v9254_v6 = vpop.f32.mrb[43].mxu1  ;;  %9256 = vmatpush3.msk.msra.mxu0 %vm393_vm5, %v3906_v5 }
 0xddd   : > { %9258 = vmatmul.mubr.msk.f32.vlgmr.msra.gmra.mrb[42].mxu0 %vm389_vm6, %v10051_v52  ;;  %9599 = vmatprep.subr.bf16.mxu0 %v9828_v10 }
 0xdde   : > { %9601 = vmatpush3.bf16.msra.mxu0 %v9957_v11  ;;  %9269 = vmatprep.mubr.msk.f32.mxu0 %vm9829_vm0, %v9830_v12 }
 0xddf   : > { %9277 = vmatprep.subr.mxu0 %v9830_v12 }
 0xde1   : > { %9270 = vmatmul.mubr.msk.f32.vlgmr.msra.gmra.mrb[44].mxu0 %vm310_vm4, %v4068_v8 }
 0xde2   : > { %9279 = vmatprep.mubr.msk.f32.mxu0 %vm9829_vm0, %v9830_v12 }
 0xe4a   : > { %v3819_v9 = vpop.f32.mrb[40].mxu0 }
 0xe4b   : > { %v3823_v13 = vadd.f32 %v3819_v9, %v3744_v3  ;;  %v9247_v14 = vpop.f32.mrb[41].mxu0 }
 0xe4e   : > { %v3990_v15 = vpop.permute.xlu0 %3989 }
 0xe4f   : > { %9261 = vmatpush3.msk.msra.mxu1 %vm393_vm5, %v3990_v15 }
 0xe50   : > { %9263 = vmatmul.mubr.msk.f32.vlgmr.msra.gmra.mrb[44].mxu1 %vm389_vm6, %v10068_v59  ;;  %9272 = vmatprep.subr.mxu1 %v9830_v12 }
 0xe51   : > { %9274 = vmatprep.mubr.msk.f32.mxu1 %vm9829_vm0, %v9830_v12 }
 0xeb0   : > { %v3983_v21 = vpop.f32.mrb[42].mxu0 }
 0xeb1   : > { %v3987_v24 = vadd.f32 %v3983_v21, %v3823_v13  ;;  %v9259_v25 = vpop.f32.mrb[43].mxu0  ;;  %v5386_v21 = vrot.slane %v5379_v18, 7 }
 0xeb2   : > { %v5388_v25 = vrot.slane %v5380_v20, 6 }
 0xeb4   : > { %v4137_v29 = vpop.f32.mrb[44].mxu0 }
 0xeb5   : > { %4220 = vrot.lane.b32.xlu1 %v4137_v29, %s9832_s14  ;;  %v9271_v31 = vpop.f32.mrb[45].mxu0  ;;  %9273 = vmatpush3.msk.msra.mxu1 %vm393_vm5, %v4137_v29  ;;  %v5387_v29 = vsel %vm302_vm1, %v5386_v21, %v5378_v22 }
 0xeb6   : > { %9275 = vmatmul.mubr.msk.f32.vlgmr.msra.gmra.mrb[46].mxu1 %vm389_vm6, %v10084_v7  ;;  %9602 = vmatprep.subr.bf16.mxu1 %v9828_v10 }
 0xeb7   : > { %9604 = vmatpush3.bf16.msra.mxu1 %v9957_v11  ;;  %9286 = vmatprep.mubr.msk.f32.mxu1 %vm9829_vm0, %v9830_v12 }
 0xeb8   : > { %9294 = vmatprep.subr.mxu1 %v9830_v12 }
 0xeb9   : > { %4606 = vrot.lane.b32.xlu1 %v4378_v34, %s9831_s13 }
 0xeba   : > { %9287 = vmatmul.mubr.msk.f32.vlgmr.msra.gmra.mrb[48].mxu1 %vm310_vm4, %v4378_v34 }
 0xebb   : > { %9296 = vmatprep.mubr.msk.f32.mxu1 %vm9829_vm0, %v9830_v12 }
 0xf23   : > { %v4062_v35 = vpop.f32.mrb[44].mxu1 }
 0xf24   : > { %v4066_v36 = vadd.f32 %v4062_v35, %v3987_v24  ;;  %v9264_v37 = vpop.f32.mrb[45].mxu1  ;;  %v5381_v24 = vld [vmem:[%s9970_s12 + $0x35] sm:$0x1] }
 0xf25   : > { %v5390_v30 = vrot.slane %v5381_v24, 5 }
 0xf27   : > { %v4221_v38 = vpop.permute.xlu1 %4220 }
 0xf28   : > { %9278 = vmatpush3.msk.msra.mxu0 %vm393_vm5, %v4221_v38 }
 0xf29   : > { %9280 = vmatmul.mubr.msk.f32.vlgmr.msra.gmra.mrb[46].mxu0 %vm389_vm6, %v10104_v19  ;;  %9289 = vmatprep.subr.mxu0 %v9830_v12 }
 0xf2a   : > { %9291 = vmatprep.mubr.msk.f32.mxu0 %vm9829_vm0, %v9830_v12 }
 0xf89   : > { %v4214_v43 = vpop.f32.mrb[46].mxu1 }
 0xf8a   : > { %v4218_v44 = vadd.f32 %v4214_v43, %v4066_v36  ;;  %v9276_v45 = vpop.f32.mrb[47].mxu1 }
 0xf8d   : > { %v4447_v46 = vpop.f32.mrb[48].mxu1 }
 0xf8e   : > { %4454 = vrot.lane.b32.xlu0 %v4447_v46, %s9832_s14  ;;  %v9288_v47 = vpop.f32.mrb[49].mxu1  ;;  %9295 = vmatpush3.msk.msra.mxu1 %vm393_vm5, %v4447_v46  ;;  %v10475_v46 = vld [vmem:[%s11047_s1] sm:$0xff] }
 0xf8f   : > { %9297 = vmatmul.mubr.msk.f32.vlgmr.msra.gmra.mrb[50].mxu1 %vm389_vm6, %v10012_v39  ;;  %9306 = vmatprep.subr.mxu1 %v9830_v12  ;;  %v4607_v39 = vpop.permute.xlu1 %4606 }
 0xf90   : > { %9308 = vmatprep.mubr.msk.f32.mxu1 %vm9829_vm0, %v9830_v12 }
 0xffc   : > { %v4293_v48 = vpop.f32.mrb[46].mxu0 }
 0xffd   : > { %v10389_v49 = vadd.f32 %v4293_v48, %v4218_v44  ;;  %v9281_v50 = vpop.f32.mrb[47].mxu0 }
0x1000   : > { %v4455_v51 = vpop.permute.xlu0 %4454 }
0x1001   : > { %9290 = vmatpush3.msk.msra.mxu0 %vm393_vm5, %v4455_v51 }
0x1002   : > { %9292 = vmatmul.mubr.msk.f32.vlgmr.msra.gmra.mrb[48].mxu0 %vm389_vm6, %v9998_v33  ;;  %9605 = vmatprep.subr.bf16.mxu0 %v9828_v10  ;;  %v8673_v33 = vld [vmem:[%s9970_s12 + $0x3c] sm:$0x1] }
0x1003   : > { %9607 = vmatpush3.bf16.msra.mxu0 %v9957_v11  ;;  %9303 = vmatprep.mubr.msk.f32.mxu0 %vm9829_vm0, %v9830_v12  ;;  %v4849_v60 = vrot.slane %v8673_v33, 5  ;;  %v5858_v33 = vrot.slane %v8702_v55, 7 }
0x1004   : > { %9311 = vmatprep.subr.mxu0 %v9830_v12 }
0x1005   : > { %v4850_v62 = vsel %vm308_vm3, %v4849_v60, %v4848_v61  ;;  %v5860_v60 = vrot.slane %v8703_v56, 6  ;;  %v5859_v61 = vsel %vm302_vm1, %v5858_v33, %v8701_v57 }
0x1006   : > { %9304 = vmatmul.mubr.msk.f32.vlgmr.msra.gmra.mrb[50].mxu0 %vm310_vm4, %v4607_v39  ;;  %5080 = vrot.lane.b32.xlu1 %v4850_v62, %s9831_s13  ;;  %v10489_v39 = vld [vmem:[%s11047_s1 + $0x8] sm:$0xff] }
0x1007   : > { %9313 = vmatprep.mubr.msk.f32.mxu0 %vm9829_vm0, %v9830_v12 }
0x1062   : > { %v4602_v63 = vpop.f32.mrb[50].mxu1 }
0x1063   : > { %v9298_v0 = vpop.f32.mrb[51].mxu1 }
0x10d5   : > { %v4527_v1 = vpop.f32.mrb[48].mxu0 }
0x10d6   : > { %v4603_v2 = vadd.f32 %v4602_v63, %v4527_v1  ;;  %v9293_v3 = vpop.f32.mrb[49].mxu0  ;;  %v5861_v63 = vsel %vm305_vm2, %v5860_v60, %v5859_v61 }
0x10d9   : > { %v4676_v4 = vpop.f32.mrb[50].mxu0 }
0x10da   : > { %4759 = vrot.lane.b32.xlu0 %v4676_v4, %s9832_s14  ;;  %v9305_v5 = vpop.f32.mrb[51].mxu0  ;;  %9307 = vmatpush3.msk.msra.mxu1 %vm393_vm5, %v4676_v4 }
0x10db   : > { %9309 = vmatmul.mubr.msk.f32.vlgmr.msra.gmra.mrb[52].mxu1 %vm389_vm6, %v10025_v41  ;;  %9608 = vmatprep.subr.bf16.mxu1 %v9828_v10 }
0x10dc   : > { %9610 = vmatpush3.bf16.msra.mxu1 %v9957_v11  ;;  %9320 = vmatprep.mubr.msk.f32.mxu1 %vm9829_vm0, %v9830_v12 }
0x10dd   : > { %9328 = vmatprep.subr.mxu1 %v9830_v12 }
0x10df   : > { %9321 = vmatmul.mubr.msk.f32.vlgmr.msra.gmra.mrb[54].mxu1 %vm310_vm4, %v4850_v62  ;;  %v5862_v62 = vrot.slane %v8704_v58, 5 }
0x10e0   : > { %9330 = vmatprep.mubr.msk.f32.mxu1 %vm9829_vm0, %v9830_v12 }
0x10e1   : > { %v5863_v0 = vsel %vm308_vm3, %v5862_v62, %v5861_v63 }
0x114c   : > { %v4760_v6 = vpop.permute.xlu0 %4759 }
0x114d   : > { %9312 = vmatpush3.msk.msra.mxu0 %vm393_vm5, %v4760_v6  ;;  %v10513_v6 = vld [vmem:[%s11047_s1 + $0x10] sm:$0xff] }
0x114e   : > { %9314 = vmatmul.mubr.msk.f32.vlgmr.msra.gmra.mrb[52].mxu0 %vm389_vm6, %v10040_v42  ;;  %9323 = vmatprep.subr.mxu0 %v9830_v12  ;;  %v5081_v42 = vpop.permute.xlu1 %5080 }
0x114f   : > { %9325 = vmatprep.mubr.msk.f32.mxu0 %vm9829_vm0, %v9830_v12 }
0x11ae   : > { %v4753_v41 = vpop.f32.mrb[52].mxu1 }
0x11af   : > { %v4757_v8 = vadd.f32 %v4753_v41, %v4603_v2  ;;  %v9310_v9 = vpop.f32.mrb[53].mxu1 }
0x11b0   : > { %v10530_v9 = vld [vmem:[%s11047_s1 + $0x18] sm:$0xff] }
0x11b2   : > { %v4919_v13 = vpop.f32.mrb[54].mxu1 }
0x11b3   : > { %5002 = vrot.lane.b32.xlu0 %v4919_v13, %s9832_s14  ;;  %v9322_v14 = vpop.f32.mrb[55].mxu1  ;;  %9324 = vmatpush3.msk.msra.mxu0 %vm393_vm5, %v4919_v13 }
0x11b4   : > { %9326 = vmatmul.mubr.msk.f32.vlgmr.msra.gmra.mrb[54].mxu0 %vm389_vm6, %v10051_v52  ;;  %9611 = vmatprep.subr.bf16.mxu0 %v9828_v10 }
0x11b5   : > { %9613 = vmatpush3.bf16.msra.mxu0 %v9957_v11  ;;  %9337 = vmatprep.mubr.msk.f32.mxu0 %vm9829_vm0, %v9830_v12 }
0x11b6   : > { %9345 = vmatprep.subr.mxu0 %v9830_v12 }
0x11b8   : > { %9338 = vmatmul.mubr.msk.f32.vlgmr.msra.gmra.mrb[56].mxu0 %vm310_vm4, %v5081_v42 }
0x11b9   : > { %9347 = vmatprep.mubr.msk.f32.mxu0 %vm9829_vm0, %v9830_v12 }
0x1221   : > { %v4832_v52 = vpop.f32.mrb[52].mxu0 }
0x1222   : > { %v4836_v15 = vadd.f32 %v4832_v52, %v4757_v8  ;;  %v9315_v16 = vpop.f32.mrb[53].mxu0 }
0x1225   : > { %v5003_v17 = vpop.permute.xlu0 %5002 }
0x1226   : > { %9329 = vmatpush3.msk.msra.mxu1 %vm393_vm5, %v5003_v17 }
0x1227   : > { %9331 = vmatmul.mubr.msk.f32.vlgmr.msra.gmra.mrb[56].mxu1 %vm389_vm6, %v10068_v59  ;;  %9340 = vmatprep.subr.mxu1 %v9830_v12  ;;  %v5389_v59 = vsel %vm305_vm2, %v5388_v25, %v5387_v29  ;;  %v6392_v25 = vld [vmem:[%s9970_s12 + $0x16] sm:$0x1]  ;;  %v6391_v29 = vld [vmem:[%s9970_s12 + $0x6] sm:$0x1] }
0x1228   : > { %9342 = vmatprep.mubr.msk.f32.mxu1 %vm9829_vm0, %v9830_v12  ;;  %v5391_v35 = vsel %vm308_vm3, %v5390_v30, %v5389_v59 }
0x1287   : > { %v4996_v23 = vpop.f32.mrb[54].mxu0 }
0x1288   : > { %v5000_v26 = vadd.f32 %v4996_v23, %v4836_v15  ;;  %v9327_v28 = vpop.f32.mrb[55].mxu0  ;;  %v10541_v15 = vld [vmem:[%s11047_s1 + $0x20] sm:$0xff]  ;;  %v10558_v23 = vld [vmem:[%s11047_s1 + $0x28] sm:$0xff] }
0x1289   : > { %v6399_v28 = vrot.slane %v6392_v25, 7 }
0x128b   : > { %v5150_v31 = vpop.f32.mrb[56].mxu0 }
0x128c   : > { %5233 = vrot.lane.b32.xlu1 %v5150_v31, %s9832_s14  ;;  %v9339_v34 = vpop.f32.mrb[57].mxu0  ;;  %9341 = vmatpush3.msk.msra.mxu1 %vm393_vm5, %v5150_v31  ;;  %v6394_v31 = vld [vmem:[%s9970_s12 + $0x36] sm:$0x1] }
0x128d   : > { %9343 = vmatmul.mubr.msk.f32.vlgmr.msra.gmra.mrb[58].mxu1 %vm389_vm6, %v10084_v7  ;;  %9614 = vmatprep.subr.bf16.mxu1 %v9828_v10 }
0x128e   : > { %9616 = vmatpush3.bf16.msra.mxu1 %v9957_v11  ;;  %9354 = vmatprep.mubr.msk.f32.mxu1 %vm9829_vm0, %v9830_v12 }
0x128f   : > { %9362 = vmatprep.subr.mxu1 %v9830_v12 }
0x1290   : > { %5619 = vrot.lane.b32.xlu1 %v5391_v35, %s9831_s13 }
0x1291   : > { %9355 = vmatmul.mubr.msk.f32.vlgmr.msra.gmra.mrb[60].mxu1 %vm310_vm4, %v5391_v35 }
0x1292   : > { %9364 = vmatprep.mubr.msk.f32.mxu1 %vm9829_vm0, %v9830_v12 }
0x1294   : > { %6093 = vrot.lane.b32.xlu1 %v5863_v0, %s9831_s13 }
0x12fa   : > { %v5075_v36 = vpop.f32.mrb[56].mxu1 }
0x12fb   : > { %v5079_v7 = vadd.f32 %v5075_v36, %v5000_v26  ;;  %v9332_v37 = vpop.f32.mrb[57].mxu1  ;;  %v6393_v26 = vld [vmem:[%s9970_s12 + $0x26] sm:$0x1]  ;;  %v6400_v36 = vsel %vm302_vm1, %v6399_v28, %v6391_v29 }
0x12fc   : > { %v6401_v59 = vrot.slane %v6393_v26, 6  ;;  %v6403_v37 = vrot.slane %v6394_v31, 5 }
0x12fe   : > { %v5234_v38 = vpop.permute.xlu1 %5233 }
0x12ff   : > { %9346 = vmatpush3.msk.msra.mxu0 %vm393_vm5, %v5234_v38 }
0x1300   : > { %9348 = vmatmul.mubr.msk.f32.vlgmr.msra.gmra.mrb[58].mxu0 %vm389_vm6, %v10104_v19  ;;  %9357 = vmatprep.subr.mxu0 %v9830_v12 }
0x1301   : > { %9359 = vmatprep.mubr.msk.f32.mxu0 %vm9829_vm0, %v9830_v12 }
0x1302   : > { %v5620_v54 = vpop.permute.xlu1 %5619 }
0x1306   : > { %v6094_v18 = vpop.permute.xlu1 %6093 }
0x1360   : > { %v5227_v43 = vpop.f32.mrb[58].mxu1 }
0x1361   : > { %v5231_v44 = vadd.f32 %v5227_v43, %v5079_v7  ;;  %v9344_v45 = vpop.f32.mrb[59].mxu1  ;;  %v10574_v7 = vld [vmem:[%s11047_s1 + $0x30] sm:$0xff]  ;;  %v6402_v43 = vsel %vm305_vm2, %v6401_v59, %v6400_v36 }
0x1362   : > { %v6404_v45 = vsel %vm308_vm3, %v6403_v37, %v6402_v43  ;;  %v7405_v36 = vld [vmem:[%s9970_s12 + $0x17] sm:$0x1]  ;;  %v7406_v37 = vld [vmem:[%s9970_s12 + $0x27] sm:$0x1] }
0x1363   : > { %v7404_v43 = vld [vmem:[%s9970_s12 + $0x7] sm:$0x1] }
0x1364   : > { %v5460_v47 = vpop.f32.mrb[60].mxu1 }
0x1365   : > { %5467 = vrot.lane.b32.xlu0 %v5460_v47, %s9832_s14  ;;  %v9356_v48 = vpop.f32.mrb[61].mxu1  ;;  %9363 = vmatpush3.msk.msra.mxu1 %vm393_vm5, %v5460_v47 }
0x1366   : > { %9365 = vmatmul.mubr.msk.f32.vlgmr.msra.gmra.mrb[62].mxu1 %vm389_vm6, %v10475_v46  ;;  %9374 = vmatprep.subr.mxu1 %v9830_v12 }
0x1367   : > { %9376 = vmatprep.mubr.msk.f32.mxu1 %vm9829_vm0, %v9830_v12 }
0x13d3   : > { %v5306_v19 = vpop.f32.mrb[58].mxu0 }
0x13d4   : > { %v10484_v50 = vadd.f32 %v5306_v19, %v5231_v44  ;;  %v9349_v51 = vpop.f32.mrb[59].mxu0 }
0x13d5   : > { %v10594_v51 = vld [vmem:[%s11047_s1 + $0x38] sm:$0xff] }
0x13d7   : > { %v5468_v53 = vpop.permute.xlu0 %5467 }
0x13d8   : > { %9358 = vmatpush3.msk.msra.mxu0 %vm393_vm5, %v5468_v53 }
0x13d9   : > { %9360 = vmatmul.mubr.msk.f32.vlgmr.msra.gmra.mrb[60].mxu0 %vm389_vm6, %v10489_v39  ;;  %9617 = vmatprep.subr.bf16.mxu0 %v9828_v10 }
0x13da   : > { %9619 = vmatpush3.bf16.msra.mxu0 %v9957_v11  ;;  %9371 = vmatprep.mubr.msk.f32.mxu0 %vm9829_vm0, %v9830_v12 }
0x13db   : > { %9379 = vmatprep.subr.mxu0 %v9830_v12 }
0x13dd   : > { %9372 = vmatmul.mubr.msk.f32.vlgmr.msra.gmra.mrb[62].mxu0 %vm310_vm4, %v5620_v54 }
0x13de   : > { %9381 = vmatprep.mubr.msk.f32.mxu0 %vm9829_vm0, %v9830_v12 }
0x1439   : > { %v5615_v1 = vpop.f32.mrb[62].mxu1 }
0x143a   : > { %v9366_v2 = vpop.f32.mrb[63].mxu1 }
0x14ac   : > { %v5540_v3 = vpop.f32.mrb[60].mxu0 }
0x14ad   : > { %v5616_v4 = vadd.f32 %v5615_v1, %v5540_v3  ;;  %v9361_v5 = vpop.f32.mrb[61].mxu0  ;;  %v8734_v1 = vld [vmem:[%s9970_s12 + $0x2e] sm:$0x1] }
0x14ae   : > { %v8732_v3 = vld [vmem:[%s9970_s12 + $0xe] sm:$0x1]  ;;  %v6873_v5 = vrot.slane %v8734_v1, 6 }
0x14b0   : > { %v5689_v41 = vpop.f32.mrb[62].mxu0 }
0x14b1   : > { %5772 = vrot.lane.b32.xlu0 %v5689_v41, %s9832_s14  ;;  %v9373_v8 = vpop.f32.mrb[63].mxu0  ;;  %9375 = vmatpush3.msk.msra.mxu1 %vm393_vm5, %v5689_v41 }
0x14b2   : > { %9377 = vmatmul.mubr.msk.f32.vlgmr.msra.gmra.mrb[64].mxu1 %vm389_vm6, %v10513_v6  ;;  %9620 = vmatprep.subr.bf16.mxu1 %v9828_v10 }
0x14b3   : > { %9622 = vmatpush3.bf16.msra.mxu1 %v9957_v11  ;;  %9388 = vmatprep.mubr.msk.f32.mxu1 %vm9829_vm0, %v9830_v12 }
0x14b4   : > { %9396 = vmatprep.subr.mxu1 %v9830_v12 }
0x14b6   : > { %9389 = vmatmul.mubr.msk.f32.vlgmr.msra.gmra.mrb[66].mxu1 %vm310_vm4, %v5863_v0  ;;  %v8733_v0 = vld [vmem:[%s9970_s12 + $0x1e] sm:$0x1] }
0x14b7   : > { %9398 = vmatprep.mubr.msk.f32.mxu1 %vm9829_vm0, %v9830_v12  ;;  %v6871_v2 = vrot.slane %v8733_v0, 7 }
0x14b9   : > { %v6872_v41 = vsel %vm302_vm1, %v6871_v2, %v8732_v3 }
0x1523   : > { %v5773_v13 = vpop.permute.xlu0 %5772 }
0x1524   : > { %9380 = vmatpush3.msk.msra.mxu0 %vm393_vm5, %v5773_v13  ;;  %v6874_v13 = vsel %vm305_vm2, %v6873_v5, %v6872_v41 }
0x1525   : > { %9382 = vmatmul.mubr.msk.f32.vlgmr.msra.gmra.mrb[64].mxu0 %vm389_vm6, %v10530_v9  ;;  %9391 = vmatprep.subr.mxu0 %v9830_v12 }
0x1526   : > { %9393 = vmatprep.mubr.msk.f32.mxu0 %vm9829_vm0, %v9830_v12 }
0x1585   : > { %v5766_v14 = vpop.f32.mrb[64].mxu1 }
0x1586   : > { %v5770_v42 = vadd.f32 %v5766_v14, %v5616_v4  ;;  %v9378_v52 = vpop.f32.mrb[65].mxu1  ;;  %v8735_v4 = vld [vmem:[%s9970_s12 + $0x3e] sm:$0x1] }
0x1587   : > { %v6875_v8 = vrot.slane %v8735_v4, 5 }
0x1589   : > { %v5932_v16 = vpop.f32.mrb[66].mxu1  ;;  %v6876_v14 = vsel %vm308_vm3, %v6875_v8, %v6874_v13 }
0x158a   : > { %6015 = vrot.lane.b32.xlu0 %v5932_v16, %s9832_s14  ;;  %v9390_v17 = vpop.f32.mrb[67].mxu1  ;;  %9392 = vmatpush3.msk.msra.mxu0 %vm393_vm5, %v5932_v16 }
0x158b   : > { %9394 = vmatmul.mubr.msk.f32.vlgmr.msra.gmra.mrb[66].mxu0 %vm389_vm6, %v10541_v15  ;;  %9623 = vmatprep.subr.bf16.mxu0 %v9828_v10 }
0x158c   : > { %9625 = vmatpush3.bf16.msra.mxu0 %v9957_v11  ;;  %9405 = vmatprep.mubr.msk.f32.mxu0 %vm9829_vm0, %v9830_v12 }
0x158d   : > { %9413 = vmatprep.subr.mxu0 %v9830_v12 }
0x158f   : > { %9406 = vmatmul.mubr.msk.f32.vlgmr.msra.gmra.mrb[68].mxu0 %vm310_vm4, %v6094_v18 }
0x1590   : > { %9415 = vmatprep.mubr.msk.f32.mxu0 %vm9829_vm0, %v9830_v12 }
0x15f8   : > { %v5845_v20 = vpop.f32.mrb[64].mxu0 }
0x15f9   : > { %v5849_v21 = vadd.f32 %v5845_v20, %v5770_v42  ;;  %v9383_v22 = vpop.f32.mrb[65].mxu0 }
0x15fc   : > { %v6016_v24 = vpop.permute.xlu0 %6015 }
0x15fd   : > { %9397 = vmatpush3.msk.msra.mxu1 %vm393_vm5, %v6016_v24 }
0x15fe   : > { %9399 = vmatmul.mubr.msk.f32.vlgmr.msra.gmra.mrb[68].mxu1 %vm389_vm6, %v10558_v23  ;;  %9408 = vmatprep.subr.mxu1 %v9830_v12 }
0x15ff   : > { %9410 = vmatprep.mubr.msk.f32.mxu1 %vm9829_vm0, %v9830_v12 }
0x165e   : > { %v6009_v30 = vpop.f32.mrb[66].mxu0 }
0x165f   : > { %v6013_v34 = vadd.f32 %v6009_v30, %v5849_v21  ;;  %v9395_v35 = vpop.f32.mrb[67].mxu0 }
0x1662   : > { %v6163_v38 = vpop.f32.mrb[68].mxu0 }
0x1663   : > { %6246 = vrot.lane.b32.xlu1 %v6163_v38, %s9832_s14  ;;  %v9407_v44 = vpop.f32.mrb[69].mxu0  ;;  %9409 = vmatpush3.msk.msra.mxu1 %vm393_vm5, %v6163_v38  ;;  %v7412_v38 = vrot.slane %v7405_v36, 7 }
0x1664   : > { %9411 = vmatmul.mubr.msk.f32.vlgmr.msra.gmra.mrb[70].mxu1 %vm389_vm6, %v10574_v7  ;;  %9626 = vmatprep.subr.bf16.mxu1 %v9828_v10 }
0x1665   : > { %9628 = vmatpush3.bf16.msra.mxu1 %v9957_v11  ;;  %9422 = vmatprep.mubr.msk.f32.mxu1 %vm9829_vm0, %v9830_v12 }
0x1666   : > { %9430 = vmatprep.subr.mxu1 %v9830_v12 }
0x1667   : > { %6632 = vrot.lane.b32.xlu1 %v6404_v45, %s9831_s13 }
0x1668   : > { %9423 = vmatmul.mubr.msk.f32.vlgmr.msra.gmra.mrb[72].mxu1 %vm310_vm4, %v6404_v45  ;;  %v7407_v45 = vld [vmem:[%s9970_s12 + $0x37] sm:$0x1] }
0x1669   : > { %9432 = vmatprep.mubr.msk.f32.mxu1 %vm9829_vm0, %v9830_v12 }
0x166b   : > { %7106 = vrot.lane.b32.xlu1 %v6876_v14, %s9831_s13 }
0x16d1   : > { %v6088_v47 = vpop.f32.mrb[68].mxu1 }
0x16d2   : > { %v6092_v48 = vadd.f32 %v6088_v47, %v6013_v34  ;;  %v9400_v19 = vpop.f32.mrb[69].mxu1  ;;  %v7414_v47 = vrot.slane %v7406_v37, 6 }
0x16d5   : > { %v6247_v53 = vpop.permute.xlu1 %6246 }
0x16d6   : > { %9414 = vmatpush3.msk.msra.mxu0 %vm393_vm5, %v6247_v53  ;;  %v7413_v53 = vsel %vm302_vm1, %v7412_v38, %v7404_v43 }
0x16d7   : > { %9416 = vmatmul.mubr.msk.f32.vlgmr.msra.gmra.mrb[70].mxu0 %vm389_vm6, %v10594_v51  ;;  %9425 = vmatprep.subr.mxu0 %v9830_v12 }
0x16d8   : > { %9427 = vmatprep.mubr.msk.f32.mxu0 %vm9829_vm0, %v9830_v12 }
0x16d9   : > { %v6633_v63 = vpop.permute.xlu1 %6632 }
0x16dd   : > { %v7107_v30 = vpop.permute.xlu1 %7106 }
0x1737   : > { %v6240_v54 = vpop.f32.mrb[70].mxu1 }
0x1738   : > { %v6244_v55 = vadd.f32 %v6240_v54, %v6092_v48  ;;  %v9412_v56 = vpop.f32.mrb[71].mxu1  ;;  %v7416_v54 = vrot.slane %v7407_v45, 5 }
0x1739   : > { %v7415_v56 = vsel %vm305_vm2, %v7414_v47, %v7413_v53 }
0x173b   : > { %v6473_v33 = vpop.f32.mrb[72].mxu1 }
0x173c   : > { %6480 = vrot.lane.b32.xlu0 %v6473_v33, %s9832_s14  ;;  %v9424_v57 = vpop.f32.mrb[73].mxu1  ;;  %9431 = vmatpush3.msk.msra.mxu1 %vm393_vm5, %v6473_v33 }
0x173d   : > { %9433 = vmatmul.mubr.msk.f32.vlgmr.msra.gmra.mrb[74].mxu1 %vm389_vm6, %v10475_v46  ;;  %9442 = vmatprep.subr.mxu1 %v9830_v12  ;;  %v7417_v57 = vsel %vm308_vm3, %v7416_v54, %v7415_v56 }
0x173e   : > { %9444 = vmatprep.mubr.msk.f32.mxu1 %vm9829_vm0, %v9830_v12 }
0x17aa   : > { %v6319_v58 = vpop.f32.mrb[70].mxu0 }
0x17ab   : > { %v10609_v60 = vadd.f32 %v6319_v58, %v6244_v55  ;;  %v9417_v61 = vpop.f32.mrb[71].mxu0 }
0x17ae   : > { %v6481_v62 = vpop.permute.xlu0 %6480 }
0x17af   : > { %9426 = vmatpush3.msk.msra.mxu0 %vm393_vm5, %v6481_v62 }
0x17b0   : > { %9428 = vmatmul.mubr.msk.f32.vlgmr.msra.gmra.mrb[72].mxu0 %vm389_vm6, %v10489_v39  ;;  %9629 = vmatprep.subr.bf16.mxu0 %v9828_v10 }
0x17b1   : > { %9631 = vmatpush3.bf16.msra.mxu0 %v9957_v11  ;;  %9439 = vmatprep.mubr.msk.f32.mxu0 %vm9829_vm0, %v9830_v12 }
0x17b2   : > { %9447 = vmatprep.subr.mxu0 %v9830_v12 }
0x17b4   : > { %9440 = vmatmul.mubr.msk.f32.vlgmr.msra.gmra.mrb[74].mxu0 %vm310_vm4, %v6633_v63 }
0x17b5   : > { %9449 = vmatprep.mubr.msk.f32.mxu0 %vm9829_vm0, %v9830_v12 }
0x1810   : > { %v6628_v42 = vpop.f32.mrb[74].mxu1 }
0x1811   : > { %v9434_v52 = vpop.f32.mrb[75].mxu1 }
0x1883   : > { %v6553_v16 = vpop.f32.mrb[72].mxu0 }
0x1884   : > { %v6629_v17 = vadd.f32 %v6628_v42, %v6553_v16  ;;  %v9429_v18 = vpop.f32.mrb[73].mxu0  ;;  %v8765_v42 = vld [vmem:[%s9970_s12 + $0x2f] sm:$0x1] }
0x1885   : > { %v8763_v16 = vld [vmem:[%s9970_s12 + $0xf] sm:$0x1] }
0x1887   : > { %v6702_v20 = vpop.f32.mrb[74].mxu0 }
0x1888   : > { %6785 = vrot.lane.b32.xlu0 %v6702_v20, %s9832_s14  ;;  %v9441_v21 = vpop.f32.mrb[75].mxu0  ;;  %9443 = vmatpush3.msk.msra.mxu1 %vm393_vm5, %v6702_v20 }
0x1889   : > { %9445 = vmatmul.mubr.msk.f32.vlgmr.msra.gmra.mrb[76].mxu1 %vm389_vm6, %v10513_v6  ;;  %9632 = vmatprep.subr.bf16.mxu1 %v9828_v10 }
0x188a   : > { %9634 = vmatpush3.bf16.msra.mxu1 %v9957_v11  ;;  %9456 = vmatprep.mubr.msk.f32.mxu1 %vm9829_vm0, %v9830_v12 }
0x188b   : > { %9464 = vmatprep.subr.mxu1 %v9830_v12 }
0x188d   : > { %9457 = vmatmul.mubr.msk.f32.vlgmr.msra.gmra.mrb[78].mxu1 %vm310_vm4, %v6876_v14  ;;  %v8764_v14 = vld [vmem:[%s9970_s12 + $0x1f] sm:$0x1] }
0x188e   : > { %9466 = vmatprep.mubr.msk.f32.mxu1 %vm9829_vm0, %v9830_v12  ;;  %v7884_v52 = vrot.slane %v8764_v14, 7 }
0x1890   : > { %v7885_v18 = vsel %vm302_vm1, %v7884_v52, %v8763_v16 }
0x18fa   : > { %v6786_v22 = vpop.permute.xlu0 %6785 }
0x18fb   : > { %9448 = vmatpush3.msk.msra.mxu0 %vm393_vm5, %v6786_v22 }
0x18fc   : > { %9450 = vmatmul.mubr.msk.f32.vlgmr.msra.gmra.mrb[76].mxu0 %vm389_vm6, %v10530_v9  ;;  %9459 = vmatprep.subr.mxu0 %v9830_v12 }
0x18fd   : > { %9461 = vmatprep.mubr.msk.f32.mxu0 %vm9829_vm0, %v9830_v12 }
0x195c   : > { %v6779_v24 = vpop.f32.mrb[76].mxu1 }
0x195d   : > { %v6783_v25 = vadd.f32 %v6779_v24, %v6629_v17  ;;  %v9446_v26 = vpop.f32.mrb[77].mxu1  ;;  %v7886_v17 = vrot.slane %v8765_v42, 6 }
0x195f   : > { %v7887_v21 = vsel %vm305_vm2, %v7886_v17, %v7885_v18 }
0x1960   : > { %v6945_v28 = vpop.f32.mrb[78].mxu1 }
0x1961   : > { %7028 = vrot.lane.b32.xlu0 %v6945_v28, %s9832_s14  ;;  %v9458_v29 = vpop.f32.mrb[79].mxu1  ;;  %9460 = vmatpush3.msk.msra.mxu0 %vm393_vm5, %v6945_v28 }
0x1962   : > { %9462 = vmatmul.mubr.msk.f32.vlgmr.msra.gmra.mrb[78].mxu0 %vm389_vm6, %v10541_v15  ;;  %9635 = vmatprep.subr.bf16.mxu0 %v9828_v10 }
0x1963   : > { %9637 = vmatpush3.bf16.msra.mxu0 %v9957_v11  ;;  %9473 = vmatprep.mubr.msk.f32.mxu0 %vm9829_vm0, %v9830_v12 }
0x1964   : > { %9481 = vmatprep.subr.mxu0 %v9830_v12 }
0x1966   : > { %9474 = vmatmul.mubr.msk.f32.vlgmr.msra.gmra.mrb[80].mxu0 %vm310_vm4, %v7107_v30 }
0x1967   : > { %9483 = vmatprep.mubr.msk.f32.mxu0 %vm9829_vm0, %v9830_v12 }
0x19cf   : > { %v6858_v31 = vpop.f32.mrb[76].mxu0 }
0x19d0   : > { %v6862_v59 = vadd.f32 %v6858_v31, %v6783_v25  ;;  %v9451_v34 = vpop.f32.mrb[77].mxu0 }
0x19d3   : > { %v7029_v35 = vpop.permute.xlu0 %7028 }
0x19d4   : > { %9465 = vmatpush3.msk.msra.mxu1 %vm393_vm5, %v7029_v35 }
0x19d5   : > { %9467 = vmatmul.mubr.msk.f32.vlgmr.msra.gmra.mrb[80].mxu1 %vm389_vm6, %v10558_v23  ;;  %9476 = vmatprep.subr.mxu1 %v9830_v12 }
0x19d6   : > { %9478 = vmatprep.mubr.msk.f32.mxu1 %vm9829_vm0, %v9830_v12 }
0x1a35   : > { %v7022_v44 = vpop.f32.mrb[78].mxu0 }
0x1a36   : > { %v7026_v48 = vadd.f32 %v7022_v44, %v6862_v59  ;;  %v9463_v19 = vpop.f32.mrb[79].mxu0  ;;  %v9833_v59 = vmov 0  }
0x1a37   : > { %9731 = vset.pattern.permute.xlu0 %v9833_v59 }
0x1a39   : > { %v7176_v55 = vpop.f32.mrb[80].mxu0 }
0x1a3a   : > { %7259 = vrot.lane.b32.xlu1 %v7176_v55, %s9832_s14  ;;  %v9475_v33 = vpop.f32.mrb[81].mxu0  ;;  %9477 = vmatpush3.msk.msra.mxu1 %vm393_vm5, %v7176_v55 }
0x1a3b   : > { %9479 = vmatmul.mubr.msk.f32.vlgmr.msra.gmra.mrb[82].mxu1 %vm389_vm6, %v10574_v7  ;;  %9638 = vmatprep.subr.bf16.mxu1 %v9828_v10 }
0x1a3c   : > { %9640 = vmatpush3.bf16.msra.mxu1 %v9957_v11  ;;  %9490 = vmatprep.mubr.msk.f32.mxu1 %vm9829_vm0, %v9830_v12 }
0x1a3d   : > { %9498 = vmatprep.subr.mxu1 %v9830_v12 }
0x1a3e   : > { %7645 = vrot.lane.b32.xlu1 %v7417_v57, %s9831_s13 }
0x1a3f   : > { %9491 = vmatmul.mubr.msk.f32.vlgmr.msra.gmra.mrb[84].mxu1 %vm310_vm4, %v7417_v57 }
0x1a40   : > { %9500 = vmatprep.mubr.msk.f32.mxu1 %vm9829_vm0, %v9830_v12 }
0x1aa8   : > { %v7101_v58 = vpop.f32.mrb[80].mxu1 }
0x1aa9   : > { %v7105_v61 = vadd.f32 %v7101_v58, %v7026_v48  ;;  %v9468_v62 = vpop.f32.mrb[81].mxu1  ;;  %v1264_v48 = vlaneseq }
0x1aab   : > { %v1265_v53 = vshrl.u32 %v1264_v48, 7 }
0x1aac   : > { %v7260_v63 = vpop.permute.xlu1 %7259 }
0x1aad   : > { %9482 = vmatpush3.msk.msra.mxu0 %vm393_vm5, %v7260_v63 }
0x1aae   : > { %9484 = vmatmul.mubr.msk.f32.vlgmr.msra.gmra.mrb[82].mxu0 %vm389_vm6, %v10594_v51  ;;  %9493 = vmatprep.subr.mxu0 %v9830_v12 }
0x1aaf   : > { %9495 = vmatprep.mubr.msk.f32.mxu0 %vm9829_vm0, %v9830_v12 }
0x1b0e   : > { %v7253_v0 = vpop.f32.mrb[82].mxu1 }
0x1b0f   : > { %v7257_v1 = vadd.f32 %v7253_v0, %v7105_v61  ;;  %v9480_v2 = vpop.f32.mrb[83].mxu1 }
0x1b12   : > { %v7486_v3 = vpop.f32.mrb[84].mxu1 }
0x1b13   : > { %7493 = vrot.lane.b32.xlu0 %v7486_v3, %s9832_s14  ;;  %v9492_v4 = vpop.f32.mrb[85].mxu1  ;;  %9499 = vmatpush3.msk.msra.mxu1 %vm393_vm5, %v7486_v3 }
0x1b14   : > { %9501 = vmatmul.mubr.msk.f32.vlgmr.msra.gmra.mrb[86].mxu1 %vm389_vm6, %v10475_v46  ;;  %9510 = vmatprep.subr.mxu1 %v9830_v12  ;;  %v7646_v46 = vpop.permute.xlu1 %7645 }
0x1b15   : > { %9512 = vmatprep.mubr.msk.f32.mxu1 %vm9829_vm0, %v9830_v12 }
0x1b81   : > { %v7332_v5 = vpop.f32.mrb[82].mxu0 }
0x1b82   : > { %v10699_v41 = vadd.f32 %v7332_v5, %v7257_v1  ;;  %v9485_v8 = vpop.f32.mrb[83].mxu0 }
0x1b85   : > { %v7494_v13 = vpop.permute.xlu0 %7493 }
0x1b86   : > { %9494 = vmatpush3.msk.msra.mxu0 %vm393_vm5, %v7494_v13 }
0x1b87   : > { %9496 = vmatmul.mubr.msk.f32.vlgmr.msra.gmra.mrb[84].mxu0 %vm389_vm6, %v10489_v39  ;;  %9641 = vmatprep.subr.bf16.mxu0 %v9828_v10  ;;  %v8766_v39 = vld [vmem:[%s9970_s12 + $0x3f] sm:$0x1]  ;;  %s9738_s12 = scalar_lea.vmem %s9737_s9, 2048 }
0x1b88   : > { %9643 = vmatpush3.bf16.msra.mxu0 %v9957_v11  ;;  %9507 = vmatprep.mubr.msk.f32.mxu0 %vm9829_vm0, %v9830_v12  ;;  %v7888_v20 = vrot.slane %v8766_v39, 5  ;;  %p9740_p5 = scmp.lt.s32.totalorder %s9738_s12, %s9732_s6 }
0x1b89   : > { %9515 = vmatprep.subr.mxu0 %v9830_v12 }
0x1b8a   : > { %v7889_v22 = vsel %vm308_vm3, %v7888_v20, %v7887_v21  ;;  %p9741_p6 = por %p9740_p5, %p9739_p4 }
0x1b8b   : > { %9508 = vmatmul.mubr.msk.f32.vlgmr.msra.gmra.mrb[86].mxu0 %vm310_vm4, %v7646_v46  ;;  %8119 = vrot.lane.b32.xlu1 %v7889_v22, %s9831_s13 }
0x1b8c   : > { %9517 = vmatprep.mubr.msk.f32.mxu0 %vm9829_vm0, %v9830_v12  ;;  %p9742_p7 = pnand %p9741_p6, %p9735_p3 }
0x1be7   : > { %v7641_v24 = vpop.f32.mrb[86].mxu1 }
0x1be8   : > { %v9502_v25 = vpop.f32.mrb[87].mxu1 }
0x1bfd   : > { %v8120_v43 = vpop.permute.xlu1 %8119 }
0x1c5a   : > { %v7566_v26 = vpop.f32.mrb[84].mxu0 }
0x1c5b   : > { %v7642_v28 = vadd.f32 %v7641_v24, %v7566_v26  ;;  %v9497_v29 = vpop.f32.mrb[85].mxu0 }
0x1c5e   : > { %v7715_v30 = vpop.f32.mrb[86].mxu0 }
0x1c5f   : > { %7798 = vrot.lane.b32.xlu0 %v7715_v30, %s9832_s14  ;;  %v9509_v31 = vpop.f32.mrb[87].mxu0  ;;  %9511 = vmatpush3.msk.msra.mxu1 %vm393_vm5, %v7715_v30 }
0x1c60   : > { %9513 = vmatmul.mubr.msk.f32.vlgmr.msra.gmra.mrb[88].mxu1 %vm389_vm6, %v10513_v6  ;;  %9644 = vmatprep.subr.bf16.mxu1 %v9828_v10 }
0x1c61   : > { %9646 = vmatpush3.bf16.msra.mxu1 %v9957_v11  ;;  %9524 = vmatprep.mubr.msk.f32.mxu1 %vm9829_vm0, %v9830_v12 }
0x1c62   : > { %9532 = vmatprep.subr.mxu1 %v9830_v12 }
0x1c64   : > { %9525 = vmatmul.mubr.msk.f32.vlgmr.msra.gmra.mrb[90].mxu1 %vm310_vm4, %v7889_v22 }
0x1c65   : > { %9534 = vmatprep.mubr.msk.f32.mxu1 %vm9829_vm0, %v9830_v12 }
0x1cd1   : > { %v7799_v34 = vpop.permute.xlu0 %7798 }
0x1cd2   : > { %9516 = vmatpush3.msk.msra.mxu0 %vm393_vm5, %v7799_v34 }
0x1cd3   : > { %9518 = vmatmul.mubr.msk.f32.vlgmr.msra.gmra.mrb[88].mxu0 %vm389_vm6, %v10530_v9  ;;  %9527 = vmatprep.subr.mxu0 %v9830_v12  ;;  %v292_v9 = vld [vmem:[%s11049_s3] sm:$0xff] }
0x1cd4   : > { %9529 = vmatprep.mubr.msk.f32.mxu0 %vm9829_vm0, %v9830_v12 }
0x1d33   : > { %v7792_v6 = vpop.f32.mrb[88].mxu1 }
0x1d34   : > { %v7796_v35 = vadd.f32 %v7792_v6, %v7642_v28  ;;  %v9514_v36 = vpop.f32.mrb[89].mxu1 }
0x1d37   : > { %v7958_v37 = vpop.f32.mrb[90].mxu1 }
0x1d38   : > { %8041 = vrot.lane.b32.xlu0 %v7958_v37, %s9832_s14  ;;  %v9526_v38 = vpop.f32.mrb[91].mxu1  ;;  %9528 = vmatpush3.msk.msra.mxu0 %vm393_vm5, %v7958_v37 }
0x1d39   : > { %9530 = vmatmul.mubr.msk.f32.vlgmr.msra.gmra.mrb[90].mxu0 %vm389_vm6, %v10541_v15  ;;  %9647 = vmatprep.subr.bf16.mxu0 %v9828_v10 }
0x1d3a   : > { %9649 = vmatpush3.bf16.msra.mxu0 %v9957_v11  ;;  %9541 = vmatprep.mubr.msk.f32.mxu0 %vm9829_vm0, %v9830_v12  ;;  %v9834_v11 = vmov 1966171168  }
0x1d3b   : > { %9549 = vmatprep.subr.mxu0 %v9830_v12  ;;  %v1262_v47 = vunpack.c.l.s4 %v9834_v11 }
0x1d3c   : > { %1255 = vperm.xlu0 %9731, %v292_v9  }
0x1d3d   : > { %9542 = vmatmul.mubr.msk.f32.vlgmr.msra.gmra.mrb[92].mxu0 %vm310_vm4, %v8120_v43  ;;  %v1263_v19 = vunpack.c.0.s8 %v1262_v47 }
0x1d3e   : > { %9551 = vmatprep.mubr.msk.f32.mxu0 %vm9829_vm0, %v9830_v12 }
0x1d3f   : > { %v10761_v54 = vsub.s32 %v1263_v19, %v1265_v53 }
0x1da6   : > { %v7871_v15 = vpop.f32.mrb[88].mxu0 }
0x1da7   : > { %v10753_v10 = vadd.f32 %v7871_v15, %v7796_v35  ;;  %v9519_v44 = vpop.f32.mrb[89].mxu0 }
0x1daa   : > { %v8042_v45 = vpop.permute.xlu0 %8041 }
0x1dab   : > { %9533 = vmatpush3.msk.msra.mxu1 %vm393_vm5, %v8042_v45 }
0x1dac   : > { %9535 = vmatmul.mubr.msk.f32.vlgmr.msra.gmra.mrb[92].mxu1 %vm389_vm6, %v10558_v23  ;;  %9544 = vmatprep.subr.mxu1 %v9830_v12 }
0x1dad   : > { %9546 = vmatprep.mubr.msk.f32.mxu1 %vm9829_vm0, %v9830_v12 }
0x1dbb   : > { %v10763_v55 = vpop.permute.xlu0 %1255 }
0x1dbc   : > { %v1258_v56 = vadd.f32 %v10763_v55, %v10119_v27  ;;  %v2272_v23 = vadd.f32 %v10209_v32, %v10763_v55  ;;  %v3285_v33 = vadd.f32 %v10299_v40, %v10763_v55  ;;  %v4298_v12 = vadd.f32 %v10389_v49, %v10763_v55 }
0x1dbd   : > { %v10775_v57 = vadd.f32 %v10484_v50, %v10763_v55  ;;  %v10779_v58 = vadd.f32 %v10609_v60, %v10763_v55  ;;  %v10783_v27 = vadd.f32 %v10699_v41, %v10763_v55 }
0x1dbe   : > { %v1260_v32 = vcombine.high %v1258_v56, %v1258_v56  ;;  %v1267_v61 = vrot.slane %v1258_v56, %v10761_v54  ;;  %v2274_v40 = vcombine.high %v2272_v23, %v2272_v23  ;;  %v2281_v62 = vrot.slane %v2272_v23, %v10761_v54 }
0x1dbf   : > { %v3287_v49 = vcombine.high %v3285_v33, %v3285_v33  ;;  %v3294_v63 = vrot.slane %v3285_v33, %v10761_v54  ;;  %v4300_v50 = vcombine.high %v4298_v12, %v4298_v12  ;;  %v4307_v0 = vrot.slane %v4298_v12, %v10761_v54 }
0x1dc0   : > { %v1274_v60 = vrot.slane %v1260_v32, %v10761_v54  ;;  %v1275_v1 = vcombine.high %v1267_v61, %v1267_v61  ;;  %v1283_v2 = vrot.slane %v1267_v61, %v10761_v54  ;;  %v2288_v3 = vrot.slane %v2274_v40, %v10761_v54 }
0x1dc1   : > { %v2289_v4 = vcombine.high %v2281_v62, %v2281_v62  ;;  %v2297_v5 = vrot.slane %v2281_v62, %v10761_v54  ;;  %v3301_v41 = vrot.slane %v3287_v49, %v10761_v54  ;;  %v3302_v8 = vcombine.high %v3294_v63, %v3294_v63 }
0x1dc2   : > { %v1276_v13 = vcombine.high %v1274_v60, %v1274_v60  ;;  %v1290_v46 = vrot.slane %v1274_v60, %v10761_v54  ;;  %v1297_v14 = vrot.slane %v1275_v1, %v10761_v54  ;;  %v1305_v42 = vcombine.high %v1283_v2, %v1283_v2  ;;  %1318 = vst.msk [vmem:[%s10797_s23] sm:$0x1] %vm1317_vm7, %v1283_v2 }
0x1dc3   : > { %v2290_v52 = vcombine.high %v2288_v3, %v2288_v3  ;;  %v2304_v16 = vrot.slane %v2288_v3, %v10761_v54  ;;  %v2311_v39 = vrot.slane %v2289_v4, %v10761_v54  ;;  %v2319_v17 = vcombine.high %v2297_v5, %v2297_v5  ;;  %2331 = vst.msk [vmem:[%s10797_s23 + $0x1] sm:$0x1] %vm1317_vm7, %v2297_v5 }
0x1dc4   : > { %v1304_v18 = vrot.slane %v1276_v13, %v10761_v54  ;;  %v1306_v20 = vcombine.high %v1290_v46, %v1290_v46  ;;  %v1307_v21 = vcombine.high %v1297_v14, %v1297_v14  ;;  %1319 = vst.msk [vmem:[%s10797_s23 + $0x8] sm:$0x1] %vm1317_vm7, %v1297_v14  ;;  %1320 = vst.msk [vmem:[%s10797_s23 + $0x10] sm:$0x1] %vm1317_vm7, %v1305_v42 }
0x1dc5   : > { %1322 = vst.msk [vmem:[%s10797_s23 + $0x20] sm:$0x1] %vm1317_vm7, %v1290_v46  ;;  %v3303_v22 = vcombine.high %v3301_v41, %v3301_v41  ;;  %v2318_v24 = vrot.slane %v2290_v52, %v10761_v54  ;;  %v2320_v25 = vcombine.high %v2304_v16, %v2304_v16  ;;  %v2321_v26 = vcombine.high %v2311_v39, %v2311_v39 }
0x1dc6   : > { %2332 = vst.msk [vmem:[%s10797_s23 + $0x9] sm:$0x1] %vm1317_vm7, %v2311_v39  ;;  %2333 = vst.msk [vmem:[%s10797_s23 + $0x11] sm:$0x1] %vm1317_vm7, %v2319_v17  ;;  %v3310_v28 = vrot.slane %v3294_v63, %v10761_v54  ;;  %v1308_v29 = vcombine.high %v1304_v18, %v1304_v18  ;;  %v3317_v30 = vrot.slane %v3301_v41, %v10761_v54 }
0x1dc7   : > { %2335 = vst.msk [vmem:[%s10797_s23 + $0x21] sm:$0x1] %vm1317_vm7, %v2304_v16  ;;  %1321 = vst.msk [vmem:[%s10797_s23 + $0x18] sm:$0x1] %vm1317_vm7, %v1307_v21  ;;  %v3324_v31 = vrot.slane %v3302_v8, %v10761_v54  ;;  %v3331_v59 = vrot.slane %v3303_v22, %v10761_v54  ;;  %v2322_v34 = vcombine.high %v2318_v24, %v2318_v24 }
0x1dc8   : > { %1323 = vst.msk [vmem:[%s10797_s23 + $0x28] sm:$0x1] %vm1317_vm7, %v1304_v18  ;;  %1324 = vst.msk [vmem:[%s10797_s23 + $0x30] sm:$0x1] %vm1317_vm7, %v1306_v20  ;;  %v3332_v6 = vcombine.high %v3310_v28, %v3310_v28  ;;  %v4314_v35 = vrot.slane %v4300_v50, %v10761_v54  ;;  %v4315_v36 = vcombine.high %v4307_v0, %v4307_v0 }
0x1dc9   : > { %2334 = vst.msk [vmem:[%s10797_s23 + $0x19] sm:$0x1] %vm1317_vm7, %v2321_v26  ;;  %2336 = vst.msk [vmem:[%s10797_s23 + $0x29] sm:$0x1] %vm1317_vm7, %v2318_v24  ;;  %v3333_v37 = vcombine.high %v3317_v30, %v3317_v30  ;;  %v3334_v38 = vcombine.high %v3324_v31, %v3324_v31  ;;  %v3335_v9 = vcombine.high %v3331_v59, %v3331_v59 }
0x1dca   : > { %2337 = vst.msk [vmem:[%s10797_s23 + $0x31] sm:$0x1] %vm1317_vm7, %v2320_v25  ;;  %3344 = vst.msk [vmem:[%s10797_s23 + $0x2] sm:$0x1] %vm1317_vm7, %v3310_v28  ;;  %v4323_v43 = vrot.slane %v4307_v0, %v10761_v54  ;;  %v4316_v15 = vcombine.high %v4314_v35, %v4314_v35  ;;  %v4330_v44 = vrot.slane %v4314_v35, %v10761_v54 }
0x1dcb   : > { %1325 = vst.msk [vmem:[%s10797_s23 + $0x38] sm:$0x1] %vm1317_vm7, %v1308_v29  ;;  %3345 = vst.msk [vmem:[%s10797_s23 + $0xa] sm:$0x1] %vm1317_vm7, %v3324_v31  ;;  %v4337_v45 = vrot.slane %v4315_v36, %v10761_v54  ;;  %v5313_v11 = vcombine.high %v10775_v57, %v10775_v57  ;;  %v5320_v48 = vrot.slane %v10775_v57, %v10761_v54 }
0x1dcc   : > { %3348 = vst.msk [vmem:[%s10797_s23 + $0x22] sm:$0x1] %vm1317_vm7, %v3317_v30  ;;  %3349 = vst.msk [vmem:[%s10797_s23 + $0x2a] sm:$0x1] %vm1317_vm7, %v3331_v59  ;;  %v4345_v47 = vcombine.high %v4323_v43, %v4323_v43  ;;  %v6326_v19 = vcombine.high %v10779_v58, %v10779_v58  ;;  %v6333_v53 = vrot.slane %v10779_v58, %v10761_v54 }
0x1dcd   : > { %2338 = vst.msk [vmem:[%s10797_s23 + $0x39] sm:$0x1] %vm1317_vm7, %v2322_v34  ;;  %3346 = vst.msk [vmem:[%s10797_s23 + $0x12] sm:$0x1] %vm1317_vm7, %v3332_v6  ;;  %v4344_v56 = vrot.slane %v4316_v15, %v10761_v54  ;;  %v4346_v23 = vcombine.high %v4330_v44, %v4330_v44  ;;  %v4347_v33 = vcombine.high %v4337_v45, %v4337_v45 }
0x1dce   : > { %3347 = vst.msk [vmem:[%s10797_s23 + $0x1a] sm:$0x1] %vm1317_vm7, %v3334_v38  ;;  %3350 = vst.msk [vmem:[%s10797_s23 + $0x32] sm:$0x1] %vm1317_vm7, %v3333_v37  ;;  %v5327_v12 = vrot.slane %v5313_v11, %v10761_v54  ;;  %v5328_v57 = vcombine.high %v5320_v48, %v5320_v48  ;;  %v5336_v32 = vrot.slane %v5320_v48, %v10761_v54 }
0x1dcf   : > { %3351 = vst.msk [vmem:[%s10797_s23 + $0x3a] sm:$0x1] %vm1317_vm7, %v3335_v9  ;;  %4357 = vst.msk [vmem:[%s10797_s23 + $0x3] sm:$0x1] %vm1317_vm7, %v4323_v43  ;;  %v6340_v61 = vrot.slane %v6326_v19, %v10761_v54  ;;  %v6341_v58 = vcombine.high %v6333_v53, %v6333_v53  ;;  %v4348_v40 = vcombine.high %v4344_v56, %v4344_v56 }
0x1dd0   : > { %4358 = vst.msk [vmem:[%s10797_s23 + $0xb] sm:$0x1] %vm1317_vm7, %v4337_v45  ;;  %4361 = vst.msk [vmem:[%s10797_s23 + $0x23] sm:$0x1] %vm1317_vm7, %v4330_v44  ;;  %v5329_v62 = vcombine.high %v5327_v12, %v5327_v12  ;;  %v5343_v49 = vrot.slane %v5327_v12, %v10761_v54  ;;  %v6349_v63 = vrot.slane %v6333_v53, %v10761_v54 }
0x1dd1   : > { %4359 = vst.msk [vmem:[%s10797_s23 + $0x13] sm:$0x1] %vm1317_vm7, %v4345_v47  ;;  %4360 = vst.msk [vmem:[%s10797_s23 + $0x1b] sm:$0x1] %vm1317_vm7, %v4347_v33  ;;  %v5350_v50 = vrot.slane %v5328_v57, %v10761_v54  ;;  %v5358_v0 = vcombine.high %v5336_v32, %v5336_v32  ;;  %v6342_v60 = vcombine.high %v6340_v61, %v6340_v61 }
0x1dd2   : > { %4362 = vst.msk [vmem:[%s10797_s23 + $0x2b] sm:$0x1] %vm1317_vm7, %v4344_v56  ;;  %4363 = vst.msk [vmem:[%s10797_s23 + $0x33] sm:$0x1] %vm1317_vm7, %v4346_v23  ;;  %v6356_v1 = vrot.slane %v6340_v61, %v10761_v54  ;;  %v5357_v2 = vrot.slane %v5329_v62, %v10761_v54  ;;  %v5359_v3 = vcombine.high %v5343_v49, %v5343_v49 }
0x1dd3   : > { %5370 = vst.msk [vmem:[%s10797_s23 + $0x4] sm:$0x1] %vm1317_vm7, %v5336_v32  ;;  %4364 = vst.msk [vmem:[%s10797_s23 + $0x3b] sm:$0x1] %vm1317_vm7, %v4348_v40  ;;  %v6363_v4 = vrot.slane %v6341_v58, %v10761_v54  ;;  %v6371_v5 = vcombine.high %v6349_v63, %v6349_v63  ;;  %v5360_v41 = vcombine.high %v5350_v50, %v5350_v50 }
0x1dd4   : > { %5374 = vst.msk [vmem:[%s10797_s23 + $0x24] sm:$0x1] %vm1317_vm7, %v5343_v49  ;;  %6383 = vst.msk [vmem:[%s10797_s23 + $0x5] sm:$0x1] %vm1317_vm7, %v6349_v63  ;;  %v6370_v8 = vrot.slane %v6342_v60, %v10761_v54  ;;  %v6372_v13 = vcombine.high %v6356_v1, %v6356_v1  ;;  %v7339_v46 = vcombine.high %v10783_v27, %v10783_v27 }
0x1dd5   : > { %5371 = vst.msk [vmem:[%s10797_s23 + $0xc] sm:$0x1] %vm1317_vm7, %v5350_v50  ;;  %5372 = vst.msk [vmem:[%s10797_s23 + $0x14] sm:$0x1] %vm1317_vm7, %v5358_v0  ;;  %v5361_v14 = vcombine.high %v5357_v2, %v5357_v2  ;;  %v6373_v42 = vcombine.high %v6363_v4, %v6363_v4  ;;  %v7346_v52 = vrot.slane %v10783_v27, %v10761_v54 }
0x1dd6   : > { %6387 = vst.msk [vmem:[%s10797_s23 + $0x25] sm:$0x1] %vm1317_vm7, %v6356_v1  ;;  %5375 = vst.msk [vmem:[%s10797_s23 + $0x2c] sm:$0x1] %vm1317_vm7, %v5357_v2  ;;  %v6374_v16 = vcombine.high %v6370_v8, %v6370_v8  ;;  %v7353_v39 = vrot.slane %v7339_v46, %v10761_v54 }
0x1dd7   : > { %5376 = vst.msk [vmem:[%s10797_s23 + $0x34] sm:$0x1] %vm1317_vm7, %v5359_v3  ;;  %6384 = vst.msk [vmem:[%s10797_s23 + $0xd] sm:$0x1] %vm1317_vm7, %v6363_v4  ;;  %v7354_v17 = vcombine.high %v7346_v52, %v7346_v52  ;;  %v7362_v27 = vrot.slane %v7346_v52, %v10761_v54 }
0x1dd8   : > { %6385 = vst.msk [vmem:[%s10797_s23 + $0x15] sm:$0x1] %vm1317_vm7, %v6371_v5  ;;  %5373 = vst.msk [vmem:[%s10797_s23 + $0x1c] sm:$0x1] %vm1317_vm7, %v5360_v41  ;;  %v7355_v18 = vcombine.high %v7353_v39, %v7353_v39  ;;  %v7369_v20 = vrot.slane %v7353_v39, %v10761_v54 }
0x1dd9   : > { %6388 = vst.msk [vmem:[%s10797_s23 + $0x2d] sm:$0x1] %vm1317_vm7, %v6370_v8  ;;  %6389 = vst.msk [vmem:[%s10797_s23 + $0x35] sm:$0x1] %vm1317_vm7, %v6372_v13  ;;  %v7376_v21 = vrot.slane %v7354_v17, %v10761_v54  ;;  %v7384_v22 = vcombine.high %v7362_v27, %v7362_v27 }
0x1dda   : > { %5377 = vst.msk [vmem:[%s10797_s23 + $0x3c] sm:$0x1] %vm1317_vm7, %v5361_v14  ;;  %6386 = vst.msk [vmem:[%s10797_s23 + $0x1d] sm:$0x1] %vm1317_vm7, %v6373_v42  ;;  %v7383_v24 = vrot.slane %v7355_v18, %v10761_v54  ;;  %v7385_v25 = vcombine.high %v7369_v20, %v7369_v20 }
0x1ddb   : > { %6390 = vst.msk [vmem:[%s10797_s23 + $0x3d] sm:$0x1] %vm1317_vm7, %v6374_v16  ;;  %7396 = vst.msk [vmem:[%s10797_s23 + $0x6] sm:$0x1] %vm1317_vm7, %v7362_v27  ;;  %v7386_v26 = vcombine.high %v7376_v21, %v7376_v21 }
0x1ddc   : > { %7400 = vst.msk [vmem:[%s10797_s23 + $0x26] sm:$0x1] %vm1317_vm7, %v7369_v20  ;;  %7397 = vst.msk [vmem:[%s10797_s23 + $0xe] sm:$0x1] %vm1317_vm7, %v7376_v21  ;;  %v7387_v28 = vcombine.high %v7383_v24, %v7383_v24 }
0x1ddd   : > { %7398 = vst.msk [vmem:[%s10797_s23 + $0x16] sm:$0x1] %vm1317_vm7, %v7384_v22  ;;  %7401 = vst.msk [vmem:[%s10797_s23 + $0x2e] sm:$0x1] %vm1317_vm7, %v7383_v24 }
0x1dde   : > { %7402 = vst.msk [vmem:[%s10797_s23 + $0x36] sm:$0x1] %vm1317_vm7, %v7385_v25  ;;  %7399 = vst.msk [vmem:[%s10797_s23 + $0x1e] sm:$0x1] %vm1317_vm7, %v7386_v26 }
0x1ddf   : > { %7403 = vst.msk [vmem:[%s10797_s23 + $0x3e] sm:$0x1] %vm1317_vm7, %v7387_v28 }
0x1e0c   : > { %v8035_v29 = vpop.f32.mrb[90].mxu0 }
0x1e0d   : > { %v8039_v30 = vadd.f32 %v8035_v29, %v10753_v10  ;;  %v9531_v31 = vpop.f32.mrb[91].mxu0 }
0x1e10   : > { %v8189_v59 = vpop.f32.mrb[92].mxu0 }
0x1e11   : > { %8272 = vrot.lane.b32.xlu1 %v8189_v59, %s9832_s14  ;;  %v9543_v34 = vpop.f32.mrb[93].mxu0  ;;  %9545 = vmatpush3.msk.msra.mxu1 %vm393_vm5, %v8189_v59  ;;  %s8430_s14 = sadd.s32 %s9810_s18, %s8782_s11 }
0x1e12   : > { %9547 = vmatmul.mubr.msk.f32.vlgmr.msra.gmra.mrb[94].mxu1 %vm389_vm6, %v10574_v7  ;;  %s8783_s18 = sshll.u32 %s8430_s14, 7 }
0x1e13   : > { %s10982_s5 = scalar_lea.hbm %s11050_s4, %s8783_s18 }
0x1e7f   : > { %v8114_v6 = vpop.f32.mrb[92].mxu1 }
0x1e80   : > { %v8118_v35 = vadd.f32 %v8114_v6, %v8039_v30  ;;  %v9536_v36 = vpop.f32.mrb[93].mxu1 }
0x1e83   : > { %v8273_v37 = vpop.permute.xlu1 %8272 }
0x1e84   : > { %9550 = vmatpush3.msk.msra.mxu0 %vm393_vm5, %v8273_v37 }
0x1e85   : > { %9552 = vmatmul.mubr.msk.f32.vlgmr.msra.gmra.mrb[94].mxu0 %vm389_vm6, %v10594_v51 }
0x1ee5   : > { %v8266_v10 = vpop.f32.mrb[94].mxu1 }
0x1ee6   : > { %v8270_v38 = vadd.f32 %v8266_v10, %v8118_v35  ;;  %v9548_v9 = vpop.f32.mrb[95].mxu1 }
0x1f58   : > { %v8345_v43 = vpop.f32.mrb[94].mxu0 }
0x1f59   : > { %v8349_v15 = vadd.f32 %v8345_v43, %v8270_v38  ;;  %v9553_v44 = vpop.f32.mrb[95].mxu0 }
0x1f5b   : > { %v8350_v7 = vadd.f32 %v8349_v15, %v10763_v55 }
0x1f5d   : > { %v8352_v45 = vcombine.high %v8350_v7, %v8350_v7  ;;  %v8359_v11 = vrot.slane %v8350_v7, %v10761_v54 }
0x1f5f   : > { %v8366_v47 = vrot.slane %v8352_v45, %v10761_v54  ;;  %v8367_v51 = vcombine.high %v8359_v11, %v8359_v11  ;;  %v8375_v48 = vrot.slane %v8359_v11, %v10761_v54 }
0x1f61   : > { %v8368_v19 = vcombine.high %v8366_v47, %v8366_v47  ;;  %v8382_v53 = vrot.slane %v8366_v47, %v10761_v54  ;;  %v8389_v55 = vrot.slane %v8367_v51, %v10761_v54  ;;  %v8397_v56 = vcombine.high %v8375_v48, %v8375_v48  ;;  %8409 = vst.msk [vmem:[%s10797_s23 + $0x7] sm:$0x1] %vm1317_vm7, %v8375_v48 }
0x1f63   : > { %v8396_v23 = vrot.slane %v8368_v19, %v10761_v54  ;;  %v8398_v33 = vcombine.high %v8382_v53, %v8382_v53  ;;  %v8399_v12 = vcombine.high %v8389_v55, %v8389_v55  ;;  %8410 = vst.msk [vmem:[%s10797_s23 + $0xf] sm:$0x1] %vm1317_vm7, %v8389_v55  ;;  %8411 = vst.msk [vmem:[%s10797_s23 + $0x17] sm:$0x1] %vm1317_vm7, %v8397_v56 }
0x1f64   : > { %8413 = vst.msk [vmem:[%s10797_s23 + $0x27] sm:$0x1] %vm1317_vm7, %v8382_v53 }
0x1f65   : > { %v8400_v54 = vcombine.high %v8396_v23, %v8396_v23  ;;  %8412 = vst.msk [vmem:[%s10797_s23 + $0x1f] sm:$0x1] %vm1317_vm7, %v8399_v12  ;;  %8414 = vst.msk [vmem:[%s10797_s23 + $0x2f] sm:$0x1] %vm1317_vm7, %v8396_v23 }
0x1f66   : > { %8415 = vst.msk [vmem:[%s10797_s23 + $0x37] sm:$0x1] %vm1317_vm7, %v8398_v33 }
0x1f67   : > { %8416 = vst.msk [vmem:[%s10797_s23 + $0x3f] sm:$0x1] %vm1317_vm7, %v8400_v54 }
0x1f68   : > { %9745 = shalt.err (!%p9742_p7)
}
0x1f69   : > { %s9746_s10 = scalar_lea.hbm %s10982_s5, 1024  ;;  %s9750_s11 = scalar_lea.hbm %s11050_s4, 8192 }
0x1f6a   : > { %p9747_p10 = scmp.ne.s32.totalorder %s10982_s5, %s9746_s10  ;;  %p9751_p13 = scmp.lt.u32.totalorder %s10982_s5, %s11050_s4 }
0x1f6b   : > { %p9752_p0 = scmp.lt.u32.totalorder %s9750_s11, %s9746_s10  ;;  %p9754_p2 = scmp.lt.u32.totalorder %s9746_s10, %s10982_s5 }
0x1f6c   : > { %p9748_p11 = pnand %p9747_p10, %p9924_p8 }
0x1f6d   : > { %p9753_p1 = por %p9752_p0, %p9751_p13 }
0x1f6e   : > { %p9749_p12 = pneg %p9748_p11 }
0x1f6f   : > { %p9755_p3 = por %p9754_p2, %p9753_p1 }
0x1f71   : > { %p9756_p4 = pnand %p9755_p3, %p9749_p12 }
0x1f73   : > { %9759 = shalt.err (!%p9756_p4)
}
0x1f74   : > { %s9836_s19 = smov 128   ;;  %s9837_s27 = smov 512  }
0x1f75   : > { %s9838_s6 = smov 8  }
0x1f76   : > { %9650 = dma.vmem_to_hbm [thread:$0]  (%p9924_p8), %s10977_s24, 1024, %s10982_s5, %s10994_s28, %s9836_s19, %s9837_s27, %s9838_s6  }
0x1f77 PF: > { %p9656_p5 = scmp.ge.s32.totalorder %s9826_s22, 2  ;;  %s8448_s7 = sand.u32 1, %s9798_s15  }
0x1f78   : > { %s8449_s9 = scalar_lea.sflag [#allocation4], %s8448_s7 }
0x1f79   : > { %p9653_p6 = pnand %p9656_p5, %p9928_p9 }
0x1f7b   : > { %9793 = dma.done.wait (!%p9653_p6), %s8449_s9, 1024  }
0x1f7c   : > { %9795 = vsyncadd (!%p9653_p6), %s8449_s9, 4294966272  ;;  %s17_s22 = sadd.s32 1, %s9826_s22   ;;  %s11054_s15 = smov %s9802_s16 }
0x1f7d   : > { %p14_p7 = scmp.ge.s32.totalorder %s17_s22, 10   ;;  %s11055_s16 = smov %s9806_s17 }
0x1f7e   : > { %s11056_s17 = smov %s9936_s8  ;;  %s11057_s18 = smov %s9818_s20 }
0x1f7f   : > { %s11058_s19 = smov %s9822_s21  ;;  %s11059_s20 = smov %s11062_s25 }
0x1f80   : > { %s11060_s21 = smov %s11066_s26  ;;  %16 = sbr.rel (!%p14_p7) target bundleno = 5 (0x5), region = 122 }
0x1f87   :  { %8454 = vsyncpa [#allocation4], 1 }
0x1f88   :  { %8456 = vsyncpa [#allocation4 + $0x1], 1 }

</bundles_post_ra>
